<compile_context>
chip_gen: v5e
topology: v5e:2x2
jax: 0.10.0
libtpu: 0.0.40
codegen_flags: <defaults>
</compile_context>

<pallas_src>
import functools

import jax
import jax.numpy as jnp
from jax.experimental import pallas as pl
from jax.experimental.pallas import tpu as pltpu

CLIP_TANH = 10.0
KL_SCALE = 5.0


def _bayesian_odd_kernel(x_ref, llr_ref, ow_ref, omask_ref,
                         logit_row_ref, logit_col_ref,
                         lw_ref, lmask_ref, u_ref,
                         out_ref, tilde_ref, kl_ref,
                         *, clip_tanh, kl_scale, n_neurons):
    j = pl.program_id(0)
    last = pl.num_programs(0) - 1

    ow = ow_ref[...]                                     # (N, TN) odd_weights cols
    u = u_ref[...]                                       # (N, TN) dropout noise
    total_mask = jnp.where(omask_ref[...] != 0, ow, 0.0)  # int8 mask -> select
    p_col = jax.nn.sigmoid(logit_row_ref[...])           # (1, TN) per-column prob

    # dropout_ori / dropout_tilde: single VPU select each (u/p compare in f32).
    w_drop = jnp.where(u > p_col, total_mask, 0.0)
    w_tilde = jnp.where(u > (1.0 - p_col), total_mask, 0.0)
    w_llr = jnp.where(lmask_ref[...] != 0, lw_ref[...], 0.0)   # (M, TN)

    # MXU: bf16 operands, f32 accumulation.  llr_part computed once, reused.
    x_bf = x_ref[...].astype(jnp.bfloat16)
    llr_part = jnp.dot(llr_ref[...].astype(jnp.bfloat16),
                       w_llr.astype(jnp.bfloat16),
                       preferred_element_type=jnp.float32)      # (B, TN)
    msg = jnp.dot(x_bf, w_drop.astype(jnp.bfloat16),
                  preferred_element_type=jnp.float32)
    msg_t = jnp.dot(x_bf, w_tilde.astype(jnp.bfloat16),
                    preferred_element_type=jnp.float32)

    out_ref[...] = jnp.tanh(0.5 * jnp.clip(msg + llr_part, -clip_tanh, clip_tanh))
    tilde_ref[...] = jnp.tanh(0.5 * jnp.clip(msg_t + llr_part, -clip_tanh, clip_tanh))

    # ---- KL term, accumulated across column tiles in the resident (1,1) output.
    sig_col = jax.nn.sigmoid(logit_col_ref[...])                # (N, 1)

    @pl.when(j == 0)
    def _():
        kl_ref[...] = jnp.zeros_like(kl_ref)

    kl_ref[...] += (kl_scale * kl_scale * 0.5) * jnp.sum(
        sig_col * (ow * ow), axis=(0, 1), keepdims=True)

    @pl.when(j == last)
    def _():
        # Logit-space-stable binary entropy: H(sigmoid(L)) = p*sp(-L) + (1-p)*sp(L).
        logit = logit_col_ref[...]                              # (N, 1)
        p = jax.nn.sigmoid(logit)
        log1pexp = jnp.log(1.0 + jnp.exp(-jnp.abs(logit)))
        sp_pos = jnp.maximum(logit, 0.0) + log1pexp             # softplus(L)
        sp_neg = jnp.maximum(-logit, 0.0) + log1pexp            # softplus(-L)
        h1 = p * sp_neg + (1.0 - p) * sp_pos
        sum_h1 = jnp.sum(h1, axis=(0, 1), keepdims=True)
        kl_ref[...] = (kl_ref[...] - sum_h1) * (1.0 / n_neurons)


def bayesian_odd_layer(x, llr, odd_weights, odd_mask, dropout_logit,
                       llr_weights, llr_mask, key, *, llr_mask_only=False,
                       clip_tanh=CLIP_TANH, tile_n=128):
    """Returns (output, init_arm_tilde, kl_term, u); `output` is torch's return."""
    b, n = x.shape
    bm, m = llr.shape
    assert bm == b and odd_weights.shape == (n, n) and llr_weights.shape == (m, n)
    assert n % tile_n == 0 and tile_n % 128 == 0

    # torch samples u inside forward; we sample it here (see PRNG note above).
    u = jax.random.uniform(key, (n, n), dtype=jnp.float32)

    # TODO(synk): fold these casts / mask products into parameter-prep (paid once).
    omask_i8 = (odd_mask != 0).astype(jnp.int8)
    lmask_i8 = (llr_mask != 0).astype(jnp.int8)
    lw = (jnp.ones_like(llr_weights, dtype=jnp.float32) if llr_mask_only
          else llr_weights.astype(jnp.float32))

    logit_row = dropout_logit.reshape(1, n).astype(jnp.float32)   # per-column (dropout)
    logit_col = dropout_logit.reshape(n, 1).astype(jnp.float32)   # per-row (KL)

    kernel = functools.partial(_bayesian_odd_kernel, clip_tanh=float(clip_tanh),
                               kl_scale=KL_SCALE, n_neurons=n)
    out, tilde, kl = pl.pallas_call(
        kernel,
        out_shape=(jax.ShapeDtypeStruct((b, n), jnp.float32),   # output
                   jax.ShapeDtypeStruct((b, n), jnp.float32),   # init_arm_tilde
                   jax.ShapeDtypeStruct((1, 1), jnp.float32)),  # kl_term
        grid=(n // tile_n,),
        in_specs=[
            pl.BlockSpec((b, n), lambda j: (0, 0)),          # x (resident)
            pl.BlockSpec((b, m), lambda j: (0, 0)),          # llr (resident)
            pl.BlockSpec((n, tile_n), lambda j: (0, j)),     # odd_weights cols
            pl.BlockSpec((n, tile_n), lambda j: (0, j)),     # odd mask (int8)
            pl.BlockSpec((1, tile_n), lambda j: (0, j)),     # dropout_logit (cols)
            pl.BlockSpec((n, 1), lambda j: (0, 0)),          # dropout_logit (rows)
            pl.BlockSpec((m, tile_n), lambda j: (0, j)),     # llr_weights cols
            pl.BlockSpec((m, tile_n), lambda j: (0, j)),     # llr mask (int8)
            pl.BlockSpec((n, tile_n), lambda j: (0, j)),     # u cols
        ],
        out_specs=(
            pl.BlockSpec((b, tile_n), lambda j: (0, j)),
            pl.BlockSpec((b, tile_n), lambda j: (0, j)),
            pl.BlockSpec((1, 1), lambda j: (0, 0)),          # resident KL accumulator
        ),
        compiler_params=pltpu.CompilerParams(
            dimension_semantics=("arbitrary",),              # carries KL reduction
            vmem_limit_bytes=48 * 1024 * 1024),
    )(x.astype(jnp.float32), llr.astype(jnp.float32),
      odd_weights.astype(jnp.float32), omask_i8,
      logit_row, logit_col, lw, lmask_i8, u)
    return out, tilde, kl[0, 0], u


def _reference(x, llr, ow, omask, u, logit, lw, lmask, clip_tanh=CLIP_TANH):
    total_mask = omask * ow
    p = jax.nn.sigmoid(logit)
    w_drop = total_mask * (u > p).astype(jnp.float32)
    w_tilde = total_mask * (u > (1.0 - p)).astype(jnp.float32)
    llr_part = llr @ (lmask * lw)
    out = jnp.tanh(0.5 * jnp.clip(x @ w_drop + llr_part, -clip_tanh, clip_tanh))
    tilde = jnp.tanh(0.5 * jnp.clip(x @ w_tilde + llr_part, -clip_tanh, clip_tanh))
    scaling1 = KL_SCALE ** 2 / 2.0 * p
    fkl = scaling1 * jnp.sum(ow ** 2, axis=1)
    h1 = -p * jnp.log(p) - (1.0 - p) * jnp.log(1.0 - p)
    kl = jnp.mean(fkl - h1)
    return out, tilde, kl


if __name__ == "__main__":
    # Small shapes consistent with the module: batch=8, code length M=16,
    # edges/neurons N=256 (two 128-wide column tiles -> exercises the grid).
    B, M, N = 8, 16, 256
    key = jax.random.PRNGKey(0)
    ks = jax.random.split(key, 8)

    x = jax.random.normal(ks[0], (B, N), dtype=jnp.float32)
    llr = jax.random.normal(ks[1], (B, M), dtype=jnp.float32)
    odd_weights = jax.random.normal(ks[2], (N, N), dtype=jnp.float32) * 0.1
    odd_mask = jax.random.bernoulli(ks[3], 0.3, (N, N)).astype(jnp.float32)   # w_odd2even_mask
    llr_weights = jax.random.normal(ks[4], (M, N), dtype=jnp.float32) * 0.1
    llr_mask = jax.random.bernoulli(ks[5], 0.5, (M, N)).astype(jnp.float32)   # w_skipconn2even_mask
    dropout_logit = jax.random.uniform(ks[6], (N,), dtype=jnp.float32)        # torch.rand(N)

    out, tilde, kl, u = bayesian_odd_layer(
        x, llr, odd_weights, odd_mask, dropout_logit, llr_weights, llr_mask,
        key=ks[7])
    jax.block_until_ready((out, tilde, kl, u))

    r_out, r_tilde, r_kl = _reference(
        x, llr, odd_weights, odd_mask, u, dropout_logit, llr_weights, llr_mask)

    assert out.shape == (B, N) and tilde.shape == (B, N)
    assert bool(jnp.all((u >= 0.0) & (u < 1.0)))
    # Matmuls use bf16 MXU operands with f32 accumulation -> loose tolerance on
    # the tanh outputs; the dropout threshold compare and KL path stay f32.
    assert jnp.allclose(out, r_out, atol=1e-2, rtol=1e-2)
    assert jnp.allclose(tilde, r_tilde, atol=1e-2, rtol=1e-2)
    assert jnp.allclose(kl, r_kl, atol=1e-4, rtol=1e-4)
    print("KERNEL_OK")
</pallas_src>

<mosaic_0001>
module attributes {stable_mosaic.version = 11 : i64} {
  func.func @_bayesian_odd_kernel(%arg0: i32, %arg1: memref<8x256xf32, #tpu.memory_space<vmem>>, %arg2: memref<8x16xf32, #tpu.memory_space<vmem>>, %arg3: memref<256x128xf32, #tpu.memory_space<vmem>>, %arg4: memref<256x128xi8, #tpu.memory_space<vmem>>, %arg5: memref<1x128xf32, #tpu.memory_space<vmem>>, %arg6: memref<256x1xf32, #tpu.memory_space<vmem>>, %arg7: memref<16x128xf32, #tpu.memory_space<vmem>>, %arg8: memref<16x128xi8, #tpu.memory_space<vmem>>, %arg9: memref<256x128xf32, #tpu.memory_space<vmem>>, %arg10: memref<8x128xf32, #tpu.memory_space<vmem>>, %arg11: memref<8x128xf32, #tpu.memory_space<vmem>>, %arg12: memref<1x1xf32, #tpu.memory_space<vmem>>) attributes {dimension_semantics = [#tpu.dimension_semantics<arbitrary>], iteration_bounds = array<i64: 2>, scalar_prefetch = 0 : i64, scratch_operands = 0 : i64, tpu.core_type = #tpu.core_type<tc>, window_params = [{pipeline_mode = #tpu.pipeline_mode<synchronous>, transform_indices = @transform_0, window_bounds = array<i64: 8, 256>}, {pipeline_mode = #tpu.pipeline_mode<synchronous>, transform_indices = @transform_1, window_bounds = array<i64: 8, 16>}, {transform_indices = @transform_2, window_bounds = array<i64: 256, 128>}, {transform_indices = @transform_3, window_bounds = array<i64: 256, 128>}, {transform_indices = @transform_4, window_bounds = array<i64: 1, 128>}, {pipeline_mode = #tpu.pipeline_mode<synchronous>, transform_indices = @transform_5, window_bounds = array<i64: 256, 1>}, {transform_indices = @transform_6, window_bounds = array<i64: 16, 128>}, {transform_indices = @transform_7, window_bounds = array<i64: 16, 128>}, {transform_indices = @transform_8, window_bounds = array<i64: 256, 128>}, {transform_indices = @transform_9, window_bounds = array<i64: 8, 128>}, {transform_indices = @transform_10, window_bounds = array<i64: 8, 128>}, {pipeline_mode = #tpu.pipeline_mode<synchronous>, transform_indices = @transform_11, window_bounds = array<i64: 1, 1>}]} {
    %c0 = arith.constant 0 : index
    %c0_0 = arith.constant 0 : index
    %0 = vector.load %arg3[%c0, %c0_0] : memref<256x128xf32, #tpu.memory_space<vmem>>, vector<256x128xf32>
    %c0_1 = arith.constant 0 : index
    %c0_2 = arith.constant 0 : index
    %1 = vector.load %arg9[%c0_1, %c0_2] : memref<256x128xf32, #tpu.memory_space<vmem>>, vector<256x128xf32>
    %c0_3 = arith.constant 0 : index
    %c0_4 = arith.constant 0 : index
    %2 = vector.load %arg4[%c0_3, %c0_4] : memref<256x128xi8, #tpu.memory_space<vmem>>, vector<256x128xi8>
    %c0_i8 = arith.constant 0 : i8
    %3 = vector.broadcast %c0_i8 : i8 to vector<256x128xi8>
    %4 = arith.cmpi ne, %2, %3 : vector<256x128xi8>
    %cst = arith.constant 0.000000e+00 : f32
    %5 = vector.broadcast %cst : f32 to vector<256x128xf32>
    %6 = arith.select %4, %0, %5 : vector<256x128xi1>, vector<256x128xf32>
    %c0_5 = arith.constant 0 : index
    %c0_6 = arith.constant 0 : index
    %7 = vector.load %arg5[%c0_5, %c0_6] : memref<1x128xf32, #tpu.memory_space<vmem>>, vector<1x128xf32>
    %8 = arith.negf %7 : vector<1x128xf32>
    %9 = math.exp %8 : vector<1x128xf32>
    %cst_7 = arith.constant 1.000000e+00 : f32
    %10 = vector.broadcast %cst_7 : f32 to vector<1x128xf32>
    %11 = arith.addf %10, %9 : vector<1x128xf32>
    %12 = arith.divf %10, %11 : vector<1x128xf32>
    %13 = vector.broadcast %12 : vector<1x128xf32> to vector<256x128xf32>
    %14 = arith.cmpf ogt, %1, %13 : vector<256x128xf32>
    %cst_8 = arith.constant 0.000000e+00 : f32
    %15 = vector.broadcast %cst_8 : f32 to vector<256x128xf32>
    %16 = arith.select %14, %6, %15 : vector<256x128xi1>, vector<256x128xf32>
    %cst_9 = arith.constant 1.000000e+00 : f32
    %17 = vector.broadcast %cst_9 : f32 to vector<1x128xf32>
    %18 = arith.subf %17, %12 : vector<1x128xf32>
    %19 = vector.broadcast %18 : vector<1x128xf32> to vector<256x128xf32>
    %20 = arith.cmpf ogt, %1, %19 : vector<256x128xf32>
    %cst_10 = arith.constant 0.000000e+00 : f32
    %21 = vector.broadcast %cst_10 : f32 to vector<256x128xf32>
    %22 = arith.select %20, %6, %21 : vector<256x128xi1>, vector<256x128xf32>
    %c0_11 = arith.constant 0 : index
    %c0_12 = arith.constant 0 : index
    %23 = vector.load %arg8[%c0_11, %c0_12] : memref<16x128xi8, #tpu.memory_space<vmem>>, vector<16x128xi8>
    %c0_i8_13 = arith.constant 0 : i8
    %24 = vector.broadcast %c0_i8_13 : i8 to vector<16x128xi8>
    %25 = arith.cmpi ne, %23, %24 : vector<16x128xi8>
    %c0_14 = arith.constant 0 : index
    %c0_15 = arith.constant 0 : index
    %26 = vector.load %arg7[%c0_14, %c0_15] : memref<16x128xf32, #tpu.memory_space<vmem>>, vector<16x128xf32>
    %cst_16 = arith.constant 0.000000e+00 : f32
    %27 = vector.broadcast %cst_16 : f32 to vector<16x128xf32>
    %28 = arith.select %25, %26, %27 : vector<16x128xi1>, vector<16x128xf32>
    %c0_17 = arith.constant 0 : index
    %c0_18 = arith.constant 0 : index
    %29 = vector.load %arg1[%c0_17, %c0_18] : memref<8x256xf32, #tpu.memory_space<vmem>>, vector<8x256xf32>
    %30 = arith.truncf %29 : vector<8x256xf32> to vector<8x256xbf16>
    %c0_19 = arith.constant 0 : index
    %c0_20 = arith.constant 0 : index
    %31 = vector.load %arg2[%c0_19, %c0_20] : memref<8x16xf32, #tpu.memory_space<vmem>>, vector<8x16xf32>
    %32 = arith.truncf %31 : vector<8x16xf32> to vector<8x16xbf16>
    %33 = arith.truncf %28 : vector<16x128xf32> to vector<16x128xbf16>
    %cst_21 = arith.constant dense<0.000000e+00> : vector<8x128xf32>
    %34 = tpu.matmul %32, %33, %cst_21 {dimension_numbers = #tpu.dot_dimension_numbers<[1], [0], [0], [1], [0, 0, 1, 1], [], []>} : vector<8x16xbf16>, vector<16x128xbf16>, vector<8x128xf32> -> vector<8x128xf32>
    %35 = arith.truncf %16 : vector<256x128xf32> to vector<256x128xbf16>
    %cst_22 = arith.constant dense<0.000000e+00> : vector<8x128xf32>
    %36 = tpu.matmul %30, %35, %cst_22 {dimension_numbers = #tpu.dot_dimension_numbers<[1], [0], [0], [1], [0, 0, 1, 1], [], []>} : vector<8x256xbf16>, vector<256x128xbf16>, vector<8x128xf32> -> vector<8x128xf32>
    %37 = arith.truncf %22 : vector<256x128xf32> to vector<256x128xbf16>
    %cst_23 = arith.constant dense<0.000000e+00> : vector<8x128xf32>
    %38 = tpu.matmul %30, %37, %cst_23 {dimension_numbers = #tpu.dot_dimension_numbers<[1], [0], [0], [1], [0, 0, 1, 1], [], []>} : vector<8x256xbf16>, vector<256x128xbf16>, vector<8x128xf32> -> vector<8x128xf32>
    %39 = arith.addf %36, %34 : vector<8x128xf32>
    %cst_24 = arith.constant -1.000000e+01 : f32
    %cst_25 = arith.constant 1.000000e+01 : f32
    %40 = vector.broadcast %cst_24 : f32 to vector<8x128xf32>
    %41 = arith.maximumf %40, %39 : vector<8x128xf32>
    %42 = vector.broadcast %cst_25 : f32 to vector<8x128xf32>
    %43 = arith.minimumf %42, %41 : vector<8x128xf32>
    %cst_26 = arith.constant 5.000000e-01 : f32
    %44 = vector.broadcast %cst_26 : f32 to vector<8x128xf32>
    %45 = arith.mulf %44, %43 : vector<8x128xf32>
    %46 = math.tanh %45 : vector<8x128xf32>
    %c0_27 = arith.constant 0 : index
    %c0_28 = arith.constant 0 : index
    %47 = vector.load %arg10[%c0_27, %c0_28] : memref<8x128xf32, #tpu.memory_space<vmem>>, vector<8x128xf32>
    tpu.vector_store %arg10[%c0_27, %c0_28], %46 {strides = array<i32>} : memref<8x128xf32, #tpu.memory_space<vmem>>, vector<8x128xf32>,
    %48 = arith.addf %38, %34 : vector<8x128xf32>
    %cst_29 = arith.constant -1.000000e+01 : f32
    %cst_30 = arith.constant 1.000000e+01 : f32
    %49 = vector.broadcast %cst_29 : f32 to vector<8x128xf32>
    %50 = arith.maximumf %49, %48 : vector<8x128xf32>
    %51 = vector.broadcast %cst_30 : f32 to vector<8x128xf32>
    %52 = arith.minimumf %51, %50 : vector<8x128xf32>
    %cst_31 = arith.constant 5.000000e-01 : f32
    %53 = vector.broadcast %cst_31 : f32 to vector<8x128xf32>
    %54 = arith.mulf %53, %52 : vector<8x128xf32>
    %55 = math.tanh %54 : vector<8x128xf32>
    %c0_32 = arith.constant 0 : index
    %c0_33 = arith.constant 0 : index
    %56 = vector.load %arg11[%c0_32, %c0_33] : memref<8x128xf32, #tpu.memory_space<vmem>>, vector<8x128xf32>
    tpu.vector_store %arg11[%c0_32, %c0_33], %55 {strides = array<i32>} : memref<8x128xf32, #tpu.memory_space<vmem>>, vector<8x128xf32>,
    %c0_34 = arith.constant 0 : index
    %c0_35 = arith.constant 0 : index
    %57 = vector.load %arg6[%c0_34, %c0_35] : memref<256x1xf32, #tpu.memory_space<vmem>>, vector<256x1xf32>
    %58 = arith.negf %57 : vector<256x1xf32>
    %59 = math.exp %58 : vector<256x1xf32>
    %cst_36 = arith.constant 1.000000e+00 : f32
    %60 = vector.broadcast %cst_36 : f32 to vector<256x1xf32>
    %61 = arith.addf %60, %59 : vector<256x1xf32>
    %62 = arith.divf %60, %61 : vector<256x1xf32>
    %c0_i32 = arith.constant 0 : i32
    %63 = arith.cmpi eq, %arg0, %c0_i32 : i32
    %64 = arith.extui %63 : i1 to i32
    %c0_i32_37 = arith.constant 0 : i32
    %65 = arith.cmpi ne, %64, %c0_i32_37 : i32
    scf.if %65 {
      %cst_45 = arith.constant 0.000000e+00 : f32
      %82 = vector.broadcast %cst_45 : f32 to vector<1x1xf32>
      %c0_46 = arith.constant 0 : index
      %c0_47 = arith.constant 0 : index
      %83 = vector.load %arg12[%c0_46, %c0_47] : memref<1x1xf32, #tpu.memory_space<vmem>>, vector<1x1xf32>
      tpu.vector_store %arg12[%c0_46, %c0_47], %82 {strides = array<i32>} : memref<1x1xf32, #tpu.memory_space<vmem>>, vector<1x1xf32>,
    } else {
    }
    %c0_38 = arith.constant 0 : index
    %c0_39 = arith.constant 0 : index
    %66 = vector.load %arg12[%c0_38, %c0_39] : memref<1x1xf32, #tpu.memory_space<vmem>>, vector<1x1xf32>
    %67 = arith.mulf %0, %0 : vector<256x128xf32>
    %68 = vector.broadcast %62 : vector<256x1xf32> to vector<256x128xf32>
    %69 = arith.mulf %68, %67 : vector<256x128xf32>
    %70 = vector.shape_cast %69 : vector<256x128xf32> to vector<1x256x128xf32>
    %cst_40 = arith.constant dense<0.000000e+00> : vector<1xf32>
    %71 = vector.multi_reduction <add>, %70, %cst_40 [1, 2] : vector<1x256x128xf32> to vector<1xf32>
    %72 = vector.shape_cast %71 : vector<1xf32> to vector<1x1x1xf32>
    %73 = vector.extract %72[0, 0, 0] : f32 from vector<1x1x1xf32>
    %74 = vector.broadcast %73 : f32 to vector<1x1xf32>
    %cst_41 = arith.constant 1.250000e+01 : f32
    %75 = vector.broadcast %cst_41 : f32 to vector<1x1xf32>
    %76 = arith.mulf %75, %74 : vector<1x1xf32>
    %77 = arith.addf %66, %76 : vector<1x1xf32>
    %c0_42 = arith.constant 0 : index
    %c0_43 = arith.constant 0 : index
    %78 = vector.load %arg12[%c0_42, %c0_43] : memref<1x1xf32, #tpu.memory_space<vmem>>, vector<1x1xf32>
    tpu.vector_store %arg12[%c0_42, %c0_43], %77 {strides = array<i32>} : memref<1x1xf32, #tpu.memory_space<vmem>>, vector<1x1xf32>,
    %c1_i32 = arith.constant 1 : i32
    %79 = arith.cmpi eq, %arg0, %c1_i32 : i32
    %80 = arith.extui %79 : i1 to i32
    %c0_i32_44 = arith.constant 0 : i32
    %81 = arith.cmpi ne, %80, %c0_i32_44 : i32
    scf.if %81 {
      %c0_45 = arith.constant 0 : index
      %c0_46 = arith.constant 0 : index
      %82 = vector.load %arg6[%c0_45, %c0_46] : memref<256x1xf32, #tpu.memory_space<vmem>>, vector<256x1xf32>
      %83 = arith.negf %82 : vector<256x1xf32>
      %84 = math.exp %83 : vector<256x1xf32>
      %cst_47 = arith.constant 1.000000e+00 : f32
      %85 = vector.broadcast %cst_47 : f32 to vector<256x1xf32>
      %86 = arith.addf %85, %84 : vector<256x1xf32>
      %87 = arith.divf %85, %86 : vector<256x1xf32>
      %88 = math.absf %82 : vector<256x1xf32>
      %cst_48 = arith.constant 0.000000e+00 : f32
      %89 = vector.broadcast %cst_48 : f32 to vector<256x1xf32>
      %90 = arith.subf %89, %88 : vector<256x1xf32>
      %91 = math.exp %90 : vector<256x1xf32>
      %cst_49 = arith.constant 1.000000e+00 : f32
      %92 = vector.broadcast %cst_49 : f32 to vector<256x1xf32>
      %93 = arith.addf %92, %91 : vector<256x1xf32>
      %94 = math.log %93 : vector<256x1xf32>
      %cst_50 = arith.constant 0.000000e+00 : f32
      %95 = vector.broadcast %cst_50 : f32 to vector<256x1xf32>
      %96 = arith.maximumf %82, %95 : vector<256x1xf32>
      %97 = arith.addf %96, %94 : vector<256x1xf32>
      %cst_51 = arith.constant 0.000000e+00 : f32
      %98 = vector.broadcast %cst_51 : f32 to vector<256x1xf32>
      %99 = arith.subf %98, %82 : vector<256x1xf32>
      %cst_52 = arith.constant 0.000000e+00 : f32
      %100 = vector.broadcast %cst_52 : f32 to vector<256x1xf32>
      %101 = arith.maximumf %99, %100 : vector<256x1xf32>
      %102 = arith.addf %101, %94 : vector<256x1xf32>
      %103 = arith.mulf %87, %102 : vector<256x1xf32>
      %cst_53 = arith.constant 1.000000e+00 : f32
      %104 = vector.broadcast %cst_53 : f32 to vector<256x1xf32>
      %105 = arith.subf %104, %87 : vector<256x1xf32>
      %106 = arith.mulf %105, %97 : vector<256x1xf32>
      %107 = arith.addf %103, %106 : vector<256x1xf32>
      %108 = vector.shape_cast %107 : vector<256x1xf32> to vector<1x256x1xf32>
      %cst_54 = arith.constant dense<0.000000e+00> : vector<1xf32>
      %109 = vector.multi_reduction <add>, %108, %cst_54 [1, 2] : vector<1x256x1xf32> to vector<1xf32>
      %110 = vector.shape_cast %109 : vector<1xf32> to vector<1x1x1xf32>
      %111 = vector.extract %110[0, 0, 0] : f32 from vector<1x1x1xf32>
      %112 = vector.broadcast %111 : f32 to vector<1x1xf32>
      %c0_55 = arith.constant 0 : index
      %c0_56 = arith.constant 0 : index
      %113 = vector.load %arg12[%c0_55, %c0_56] : memref<1x1xf32, #tpu.memory_space<vmem>>, vector<1x1xf32>
      %114 = arith.subf %113, %112 : vector<1x1xf32>
      %cst_57 = arith.constant 3.906250e-03 : f32
      %115 = vector.broadcast %cst_57 : f32 to vector<1x1xf32>
      %116 = arith.mulf %114, %115 : vector<1x1xf32>
      %c0_58 = arith.constant 0 : index
      %c0_59 = arith.constant 0 : index
      %117 = vector.load %arg12[%c0_58, %c0_59] : memref<1x1xf32, #tpu.memory_space<vmem>>, vector<1x1xf32>
      tpu.vector_store %arg12[%c0_58, %c0_59], %116 {strides = array<i32>} : memref<1x1xf32, #tpu.memory_space<vmem>>, vector<1x1xf32>,
    } else {
    }
    return
  }
  func.func @transform_0(%arg0: i32) -> (i32, i32) {
    %c0_i32 = arith.constant 0 : i32
    %c0_i32_0 = arith.constant 0 : i32
    %c0_i32_1 = arith.constant 0 : i32
    return %c0_i32, %c0_i32_0 : i32, i32
  }
  func.func @transform_1(%arg0: i32) -> (i32, i32) {
    %c0_i32 = arith.constant 0 : i32
    %c0_i32_0 = arith.constant 0 : i32
    %c0_i32_1 = arith.constant 0 : i32
    return %c0_i32, %c0_i32_0 : i32, i32
  }
  func.func @transform_2(%arg0: i32) -> (i32, i32) {
    %c0_i32 = arith.constant 0 : i32
    %c0_i32_0 = arith.constant 0 : i32
    return %c0_i32, %arg0 : i32, i32
  }
  func.func @transform_3(%arg0: i32) -> (i32, i32) {
    %c0_i32 = arith.constant 0 : i32
    %c0_i32_0 = arith.constant 0 : i32
    return %c0_i32, %arg0 : i32, i32
  }
  func.func @transform_4(%arg0: i32) -> (i32, i32) {
    %c0_i32 = arith.constant 0 : i32
    %c0_i32_0 = arith.constant 0 : i32
    return %c0_i32, %arg0 : i32, i32
  }
  func.func @transform_5(%arg0: i32) -> (i32, i32) {
    %c0_i32 = arith.constant 0 : i32
    %c0_i32_0 = arith.constant 0 : i32
    %c0_i32_1 = arith.constant 0 : i32
    return %c0_i32, %c0_i32_0 : i32, i32
  }
  func.func @transform_6(%arg0: i32) -> (i32, i32) {
    %c0_i32 = arith.constant 0 : i32
    %c0_i32_0 = arith.constant 0 : i32
    return %c0_i32, %arg0 : i32, i32
  }
  func.func @transform_7(%arg0: i32) -> (i32, i32) {
    %c0_i32 = arith.constant 0 : i32
    %c0_i32_0 = arith.constant 0 : i32
    return %c0_i32, %arg0 : i32, i32
  }
  func.func @transform_8(%arg0: i32) -> (i32, i32) {
    %c0_i32 = arith.constant 0 : i32
    %c0_i32_0 = arith.constant 0 : i32
    return %c0_i32, %arg0 : i32, i32
  }
  func.func @transform_9(%arg0: i32) -> (i32, i32) {
    %c0_i32 = arith.constant 0 : i32
    %c0_i32_0 = arith.constant 0 : i32
    return %c0_i32, %arg0 : i32, i32
  }
  func.func @transform_10(%arg0: i32) -> (i32, i32) {
    %c0_i32 = arith.constant 0 : i32
    %c0_i32_0 = arith.constant 0 : i32
    return %c0_i32, %arg0 : i32, i32
  }
  func.func @transform_11(%arg0: i32) -> (i32, i32) {
    %c0_i32 = arith.constant 0 : i32
    %c0_i32_0 = arith.constant 0 : i32
    %c0_i32_1 = arith.constant 0 : i32
    return %c0_i32, %c0_i32_0 : i32, i32
  }
}

</mosaic_0001>

<bundles_post_ra>
// kernel: tpu_custom_call.1
= control target key start
LH: loop header
LB: loop body
LE: loop exit
PB: predicated region body
PF: predicated region fallthrough
CT: control target
= control target key end

     0   :  { %s8649_s0 = inlined_call_operand.vmem [shape: f32[8,256], index: 0, kind: input, shape index: {}]   ;;  %s8650_s1 = inlined_call_operand.vmem [shape: f32[8,16], index: 1, kind: input, shape index: {}]   ;;  %s8651_s2 = inlined_call_operand.hbm [shape: f32[256,256], index: 2, kind: input, shape index: {}]   ;;  %s8652_s3 = inlined_call_operand.vmem [shape: s8[256,256], index: 3, kind: input, shape index: {}]   ;;  %s8653_s4 = inlined_call_operand.vmem [shape: f32[1,256], index: 4, kind: input, shape index: {}]   ;;  %s8654_s5 = inlined_call_operand.vmem [shape: f32[256,1], index: 5, kind: input, shape index: {}]   ;;  %s8655_s6 = inlined_call_operand.vmem [shape: f32[16,256], index: 6, kind: input, shape index: {}]   ;;  %s8656_s7 = inlined_call_operand.vmem [shape: s8[16,256], index: 7, kind: input, shape index: {}]   ;;  %s8657_s8 = inlined_call_operand.hbm [shape: f32[256,256], index: 8, kind: input, shape index: {}]   ;;  %s8658_s9 = inlined_call_operand.hbm [shape: f32[8,256], index: 9, kind: output, shape index: {0}]   ;;  %s8659_s10 = inlined_call_operand.hbm [shape: f32[8,256], index: 10, kind: output, shape index: {1}]   ;;  %s8660_s11 = inlined_call_operand.hbm [shape: f32[1,1], index: 11, kind: output, shape index: {2}]  }
   0x1   :  { %8775 = sst [smem:[#allocation118_spill]] %s8649_s0 }
   0x2   :  { %8776 = sst [smem:[#allocation119_spill]] %s8658_s9 }
   0x3   :  { %8777 = sst [smem:[#allocation120_spill]] %s8660_s11 }
   0x4   :  { %17 = vsyncpa [#allocation3], 0 }
   0x5   :  { %19 = vsyncpa [#allocation3 + $0x1], 0 }
   0x6   :  { %20 = vsyncpa [#allocation9], 0 }
   0x7   :  { %22 = vsyncpa [#allocation9 + $0x1], 0 }
   0x8   :  { %23 = vsyncpa [#allocation4], 0 }
   0x9   :  { %25 = vsyncpa [#allocation4 + $0x1], 0 }
   0xa   :  { %26 = vsyncpa [#allocation12], 0 }
   0xb   :  { %28 = vsyncpa [#allocation12 + $0x1], 0  ;;  %s4648_s17 = smov 0   ;;  %s4650_s18 = smov 0  }
   0xc   :  { %s4652_s19 = smov 0   ;;  %s4654_s20 = smov 0  }
   0xd LB: > { %8778 = sst [smem:[#allocation19_spill]] %s4568_s17  ;;  %s4669_s21 = sadd.s32 4294967295, %s4580_s20   ;;  %s4580_s20 = sphi %s4654_s20, %s9434_s20   ;;  %s4576_s19 = sphi %s4652_s19, %s9436_s19   ;;  %s4572_s18 = sphi %s4650_s18, %s9438_s18   ;;  %s4568_s17 = sphi %s4648_s17, %s9437_s17  }
   0xe   : > { %8779 = sst [smem:[#allocation20_spill]] %s4576_s19  ;;  %s8661_s22 = sadd.s32 4294967294, %s4580_s20  }
   0xf   : > { %s4673_s23 = sadd.s32 1, %s4580_s20   ;;  %s83_s24 = sadd.s32 1, %s4576_s19 }
  0x10   : > { %8780 = sst [smem:[#allocation21_spill]] %s4673_s23  ;;  %s80_s25 = ssub.s32 %s4580_s20, %s4673_s23 }
  0x11   : > { %p90_p0 = scmp.ne.s32.totalorder %s4576_s19, %s4572_s18  ;;  %p81_p1 = scmp.eq.s32.totalorder %s80_s25, 0 }
  0x12   : > { %p91_p2 = scmp.eq.s32.totalorder %s4580_s20, 0  ;;  %p96_p3 = scmp.ne.s32.totalorder %s4572_s18, %s4568_s17 }
  0x13   : > { %p97_p4 = scmp.eq.s32.totalorder %s4669_s21, 0  ;;  %p271_p7 = scmp.eq.s32.totalorder %s4669_s21, 1 }
  0x14   : > { %s4685_s26 = scalar_select %p81_p1, %s4576_s19, %s83_s24  }
  0x15   : > { %p4687_p5 = por %p91_p2, %p90_p0  ;;  %p4691_p6 = por %p97_p4, %p96_p3 }
  0x16   : > { %8781 = sst [smem:[#allocation22_spill]] %s4685_s26  ;;  %p277_p8 = scmp.eq.s32.totalorder %s8661_s22, 1 }
  0x17   : > { %p4700_p9 = por %p271_p7, %p90_p0  ;;  %p3703_p11 = scmp.ge.s32.totalorder %s4580_s20, 2 }
  0x18   : > { %p4704_p10 = por %p277_p8, %p96_p3  ;;  %s4712_s12 = sand.u32 (!%p3703_p11), 1, %s4576_s19  }
  0x19   : > { %349 = sbr.rel (%p3703_p11) target bundleno = 82 (0x52), region = 28  ;;  %s4715_s13 = sshll.u32 (!%p3703_p11), %s4580_s20, 3 }
  0x1a   : > { %s8785_s30 = scalar_select %p4704_p10, 1, 0 }
  0x1b   : > { %s8668_s14 = sshll.u32 (!%p3703_p11), %s4712_s12, 8  ;;  %s361_s24 = scalar_lea.hbm (!%p3703_p11), %s8651_s2, %s4715_s13 }
  0x1c   : > { %8786 = sst [smem:[#allocation23_spill]] %s8785_s30  ;;  %s362_s25 = sshll.u32 (!%p3703_p11), %s361_s24, 4  ;;  %s363_s25 = int_to_ptr.hbm [resolvable:$true] %s362_s25 }
  0x1d   : > { %s357_s22 = scalar_lea.vmem (!%p3703_p11), [#allocation2], %s8668_s14  ;;  %s354_s23 = scalar_lea.sflag (!%p3703_p11), [#allocation3], %s4712_s12 }
  0x1e   : > { %s364_s26 = sshll.u32 %s357_s22, 4  ;;  %s4390_s19 = sshra.s32 %s363_s25, 4  ;;  %s365_s26 = int_to_ptr.vmem [resolvable:$true] %s364_s26  ;;  %s4391_s19 = int_to_ptr.hbm [resolvable:$true] %s4390_s19 }
  0x1f   : > { %s4392_s30 = scalar_lea.hbm %s4391_s19, 256  ;;  %s4396_s9 = scalar_lea.hbm %s8651_s2, 512 }
  0x20   : > { %p4393_p12 = scmp.ne.s32.totalorder %s4391_s19, %s4392_s30  ;;  %p4397_p1 = scmp.lt.s32.totalorder %s4391_s19, %s8651_s2 }
  0x21   : > { %p4398_p2 = scmp.lt.s32.totalorder %s4396_s9, %s4392_s30 }
  0x22   : > { %p4394_p13 = pnand %p4393_p12, %p4687_p5 }
  0x23   : > { %p4399_p3 = por %p4398_p2, %p4397_p1 }
  0x24   : > { %p4395_p0 = pneg %p4394_p13 }
  0x26   : > { %p4400_p4 = pnand %p4399_p3, %p4395_p0 }
  0x28   : > { %4403 = shalt.err (!%p4400_p4)
}
  0x29   : > { %s8669_s22 = smov 256   ;;  %s8670_s24 = smov 128  }
  0x2a   : > { %s8671_s14 = smov 8   ;;  %373 = sbr.rel (!%p4687_p5) target bundleno = 54 (0x36), region = 36 }
  0x2b   : > { %3903 = dma.hbm_to_vmem [thread:$0]  (%p4687_p5), %s363_s25, 4096, %s365_s26, %s354_s23, %s8669_s22, %s8670_s24, %s8671_s14  }
  0x2c   : > { %s3706_s11 = sshll.u32 (%p4687_p5), %s4712_s12, 6  ;;  %s379_s19 = scalar_lea.vmem (%p4687_p5), %s8652_s3, %s4715_s13 }
  0x2d   : > { %v422_v0 = vld [vmem:[%s379_s19] sm:$0xff] (%p4687_p5)  ;;  %v424_v1 = vld [vmem:[%s379_s19 + $0x10] sm:$0xff] (%p4687_p5)  ;;  %s377_s30 = scalar_lea.vmem (%p4687_p5), [#allocation5], %s3706_s11 }
  0x2e   : > { %v426_v2 = vld [vmem:[%s379_s19 + $0x20] sm:$0xff] (%p4687_p5)  ;;  %423 = vst [vmem:[%s377_s30] sm:$0xff] (%p4687_p5), %v422_v0  ;;  %v428_v3 = vld [vmem:[%s379_s19 + $0x30] sm:$0xff] (%p4687_p5) }
  0x2f   : > { %425 = vst [vmem:[%s377_s30 + $0x8] sm:$0xff] %v424_v1  ;;  %v430_v4 = vld [vmem:[%s379_s19 + $0x40] sm:$0xff]  ;;  %v432_v5 = vld [vmem:[%s379_s19 + $0x50] sm:$0xff] }
  0x30   : > { %427 = vst [vmem:[%s377_s30 + $0x10] sm:$0xff] %v426_v2  ;;  %v434_v6 = vld [vmem:[%s379_s19 + $0x60] sm:$0xff]  ;;  %v436_v7 = vld [vmem:[%s379_s19 + $0x70] sm:$0xff] }
  0x31   : > { %429 = vst [vmem:[%s377_s30 + $0x18] sm:$0xff] %v428_v3 }
  0x32   : > { %431 = vst [vmem:[%s377_s30 + $0x20] sm:$0xff] %v430_v4 }
  0x33   : > { %433 = vst [vmem:[%s377_s30 + $0x28] sm:$0xff] %v432_v5 }
  0x34   : > { %435 = vst [vmem:[%s377_s30 + $0x30] sm:$0xff] %v434_v6 }
  0x35   : > { %437 = vst [vmem:[%s377_s30 + $0x38] sm:$0xff] %v436_v7 }
  0x36 PF: > { %449 = sbr.rel (!%p4687_p5) target bundleno = 59 (0x3b), region = 78  ;;  %s3708_s23 = sshll.u32 (%p4687_p5), %s4712_s12, 4 }
  0x37   : > { %s455_s15 = scalar_lea.vmem (%p4687_p5), %s8655_s6, %s4715_s13  ;;  %s453_s16 = scalar_lea.vmem (%p4687_p5), [#allocation6], %s3708_s23 }
  0x38   : > { %v486_v8 = vld [vmem:[%s455_s15] sm:$0xff] (%p4687_p5)  ;;  %v488_v9 = vld [vmem:[%s455_s15 + $0x10] sm:$0xff] (%p4687_p5) }
  0x39   : > { %487 = vst [vmem:[%s453_s16] sm:$0xff] (%p4687_p5), %v486_v8 }
  0x3a   : > { %489 = vst [vmem:[%s453_s16 + $0x8] sm:$0xff] (%p4687_p5), %v488_v9 }
  0x3b PF: > { %495 = sbr.rel (!%p4687_p5) target bundleno = 65 (0x41), region = 116  ;;  %s3710_s11 = sshll.u32 (%p4687_p5), %s4712_s12, 2 }
  0x3c   : > { %s3711_s17 = sshll.u32 (%p4687_p5), %s4580_s20, 1  ;;  %s499_s26 = scalar_lea.vmem (%p4687_p5), [#allocation7], %s3710_s11 }
  0x3d   : > { %s501_s30 = scalar_lea.vmem (%p4687_p5), %s8656_s7, %s3711_s17 }
  0x3e   : > { %v518_v10 = vld [vmem:[%s501_s30] sm:$0x3] (%p4687_p5)  ;;  %v520_v11 = vld [vmem:[%s501_s30 + $0x4] sm:$0x3] (%p4687_p5) }
  0x3f   : > { %519 = vst [vmem:[%s499_s26] sm:$0x3] (%p4687_p5), %v518_v10 }
  0x40   : > { %521 = vst [vmem:[%s499_s26 + $0x2] sm:$0x3] %v520_v11 }
  0x41 PF: > { %s550_s15 = scalar_lea.hbm %s8657_s8, %s4715_s13  ;;  %s8787_s16 = sshll.u32 %s4712_s12, 8 }
  0x42   : > { %s546_s22 = scalar_lea.vmem [#allocation8], %s8787_s16  ;;  %s551_s14 = sshll.u32 %s550_s15, 4  ;;  %s552_s14 = int_to_ptr.hbm [resolvable:$true] %s551_s14 }
  0x43   : > { %s553_s24 = sshll.u32 %s546_s22, 4  ;;  %s543_s17 = scalar_lea.sflag [#allocation9], %s4712_s12  ;;  %s554_s24 = int_to_ptr.vmem [resolvable:$true] %s553_s24 }
  0x44   : > { %s4418_s9 = sshra.s32 %s552_s14, 4  ;;  %s4424_s26 = scalar_lea.hbm %s8657_s8, 512  ;;  %s4419_s9 = int_to_ptr.hbm [resolvable:$true] %s4418_s9 }
  0x45   : > { %s4420_s11 = scalar_lea.hbm %s4419_s9, 256  ;;  %p4425_p0 = scmp.lt.s32.totalorder %s4419_s9, %s8657_s8 }
  0x46   : > { %p4421_p8 = scmp.ne.s32.totalorder %s4419_s9, %s4420_s11  ;;  %p4426_p1 = scmp.lt.s32.totalorder %s4424_s26, %s4420_s11 }
  0x48   : > { %p4422_p12 = pnand %p4421_p8, %p4687_p5  ;;  %p4427_p2 = por %p4426_p1, %p4425_p0 }
  0x4a   : > { %p4423_p13 = pneg %p4422_p12 }
  0x4c   : > { %p4428_p3 = pnand %p4427_p2, %p4423_p13 }
  0x4e   : > { %4431 = shalt.err (!%p4428_p3)
}
  0x4f   : > { %s8788_s12 = smov 8   ;;  %s8789_s22 = smov 128  }
  0x50   : > { %s8790_s25 = smov 256  }
  0x51   : > { %3904 = dma.hbm_to_vmem [thread:$0]  (%p4687_p5), %s552_s14, 4096, %s554_s24, %s543_s17, %s8790_s25, %s8789_s22, %s8788_s12  }
  0x52 PF: > { %p3714_p4 = scmp.ge.s32.totalorder %s4580_s20, 1  ;;  %p561_p8 = scmp.lt.s32.totalorder %s4580_s20, 3 }
  0x54   : > { %p562_p12 = pnand %p3714_p4, %p561_p8 }
  0x56   : > { %565 = sbr.rel (%p562_p12) target bundleno = 1414 (0x586), region = 154 }
  0x5b   : > { %s4782_s15 = sand.u32 1, %s4572_s18  }
  0x5c   : > { %s3715_s16 = sshll.u32 %s4782_s15, 8  ;;  %s568_s9 = scalar_lea.sflag [#allocation3], %s4782_s15 }
  0x5d   : > { %s4786_s27 = scalar_lea.vmem [#allocation2], %s3715_s16 }
  0x5e   : > { %4547 = dma.done.wait (%p4691_p6), %s568_s9, 4096  }
  0x5f   : > { %4549 = vsyncadd (%p4691_p6), %s568_s9, 4294963200  ;;  %s3716_s14 = sshll.u32 %s4782_s15, 6  ;;  %s3717_s24 = sshll.u32 %s4782_s15, 4 }
  0x60   : > { %s3718_s17 = sshll.u32 %s4782_s15, 2  ;;  %s4795_s11 = scalar_lea.vmem [#allocation5], %s3716_s14 }
  0x61   : > { %s4797_s19 = scalar_lea.vmem [#allocation6], %s3717_s24  ;;  %s4799_s30 = scalar_lea.vmem [#allocation7], %s3718_s17 }
  0x62   : > { %s599_s26 = scalar_lea.sflag [#allocation9], %s4782_s15  ;;  %s4802_s23 = scalar_lea.vmem [#allocation8], %s3715_s16 }
  0x63   : > { %4551 = dma.done.wait (%p4691_p6), %s599_s26, 4096  }
  0x64   : > { %4553 = vsyncadd (%p4691_p6), %s599_s26, 4294963200  ;;  %v1304_v12 = vld [vmem:[%s8654_s5] sm:$0xff]  ;;  %v1305_v13 = vld [vmem:[%s8654_s5 + $0x8] sm:$0xff]  ;;  %p667_p5 = scmp.lt.s32.totalorder %s4669_s21, 1  ;;  %s9009_s0 = sld [smem:[#allocation118_spill]] }
  0x65   : > { %v1306_v14 = vld [vmem:[%s8654_s5 + $0x10] sm:$0xff]  ;;  %v1307_v15 = vld [vmem:[%s8654_s5 + $0x18] sm:$0xff]  ;;  %v3825_v16 = vmul.f32 -1.442695, %v1304_v12  ;;  %v1308_v17 = vld [vmem:[%s8654_s5 + $0x20] sm:$0xff]  ;;  %p3857_p6 = scmp.ne.s32.totalorder %s4669_s21, 0 }
  0x66   : > { %v3826_v18 = vmul.f32 -1.442695, %v1305_v13  ;;  %v1309_v19 = vld [vmem:[%s8654_s5 + $0x28] sm:$0xff]  ;;  %v3827_v20 = vmul.f32 -1.442695, %v1306_v14  ;;  %v1310_v21 = vld [vmem:[%s8654_s5 + $0x30] sm:$0xff] }
  0x67   : > { %3963 = vpow2.f32 %v3825_v16  ;;  %v3828_v22 = vmul.f32 -1.442695, %v1307_v15  ;;  %v1311_v23 = vld [vmem:[%s8654_s5 + $0x38] sm:$0xff]  ;;  %v3829_v24 = vmul.f32 -1.442695, %v1308_v17  ;;  %v1312_v25 = vld [vmem:[%s8654_s5 + $0x40] sm:$0xff] }
  0x68   : > { %3965 = vpow2.f32 %v3826_v18  ;;  %v3830_v26 = vmul.f32 -1.442695, %v1309_v19  ;;  %v1313_v27 = vld [vmem:[%s8654_s5 + $0x48] sm:$0xff]  ;;  %v1314_v28 = vld [vmem:[%s8654_s5 + $0x50] sm:$0xff]  ;;  %v3831_v29 = vmul.f32 -1.442695, %v1310_v21 }
  0x69   : > { %3967 = vpow2.f32 %v3827_v20  ;;  %v1315_v30 = vld [vmem:[%s8654_s5 + $0x58] sm:$0xff]  ;;  %v1316_v31 = vld [vmem:[%s8654_s5 + $0x60] sm:$0xff]  ;;  %v3832_v32 = vmul.f32 -1.442695, %v1311_v23  ;;  %v1317_v34 = vld [vmem:[%s8654_s5 + $0x68] sm:$0xff]  ;;  %s5613_s28 = scalar_select %p667_p5, %s4669_s21, 1 }
  0x6a   : > { %3969 = vpow2.f32 %v3828_v22  ;;  %v3833_v35 = vmul.f32 -1.442695, %v1312_v25  ;;  %v1318_v37 = vld [vmem:[%s8654_s5 + $0x70] sm:$0xff]  ;;  %v3834_v38 = vmul.f32 -1.442695, %v1313_v27  ;;  %v1319_v41 = vld [vmem:[%s8654_s5 + $0x78] sm:$0xff] }
  0x6b   : > { %3971 = vpow2.f32 %v3829_v24  ;;  %v3835_v39 = vmul.f32 -1.442695, %v1314_v28  ;;  %v3836_v42 = vmul.f32 -1.442695, %v1315_v30  ;;  %v3837_v43 = vmul.f32 -1.442695, %v1316_v31  ;;  %s669_s12 = scalar_lea.vmem %s8653_s4, %s5613_s28 }
  0x6c   : > { %3973 = vpow2.f32 %v3830_v26  ;;  %v1320_v45 = vld [vmem:[%s8654_s5 + $0x80] sm:$0xff]  ;;  %v3838_v46 = vmul.f32 -1.442695, %v1317_v34  ;;  %v1321_v48 = vld [vmem:[%s8654_s5 + $0x88] sm:$0xff]  ;;  %v3839_v49 = vmul.f32 -1.442695, %v1318_v37 }
  0x6d   : > { %v4847_v33 = vpop.eup %3963  ;;  %3975 = vpow2.f32 %v3831_v29  ;;  %v1322_v51 = vld [vmem:[%s8654_s5 + $0x90] sm:$0xff]  ;;  %v3840_v52 = vmul.f32 -1.442695, %v1319_v41  ;;  %v1323_v54 = vld [vmem:[%s8654_s5 + $0x98] sm:$0xff]  ;;  %v3841_v55 = vmul.f32 -1.442695, %v1320_v45 }
  0x6e   : > { %v4852_v36 = vpop.eup %3965  ;;  %3977 = vpow2.f32 %v3832_v32  ;;  %v1324_v57 = vld [vmem:[%s8654_s5 + $0xa0] sm:$0xff]  ;;  %v3842_v58 = vmul.f32 -1.442695, %v1321_v48  ;;  %v1325_v60 = vld [vmem:[%s8654_s5 + $0xa8] sm:$0xff]  ;;  %v3843_v61 = vmul.f32 -1.442695, %v1322_v51 }
  0x6f   : > { %v4857_v40 = vpop.eup %3967  ;;  %3979 = vpow2.f32 %v3833_v35  ;;  %v1326_v63 = vld [vmem:[%s8654_s5 + $0xb0] sm:$0xff]  ;;  %v1327_v0 = vld [vmem:[%s8654_s5 + $0xb8] sm:$0xff]  ;;  %v3844_v1 = vmul.f32 -1.442695, %v1323_v54  ;;  %v1328_v3 = vld [vmem:[%s8654_s5 + $0xc0] sm:$0xff]  ;;  %v4915_v28 = vadd.f32 1.0, %v4847_v33 }
  0x70   : > { %v4862_v44 = vpop.eup %3969  ;;  %3981 = vpow2.f32 %v3834_v38  ;;  %v1329_v4 = vld [vmem:[%s8654_s5 + $0xc8] sm:$0xff]  ;;  %v1330_v5 = vld [vmem:[%s8654_s5 + $0xd0] sm:$0xff]  ;;  %v3845_v6 = vmul.f32 -1.442695, %v1324_v57  ;;  %v1331_v8 = vld [vmem:[%s8654_s5 + $0xd8] sm:$0xff]  ;;  %v4918_v30 = vadd.f32 1.0, %v4852_v36 }
  0x71   : > { %v4867_v47 = vpop.eup %3971  ;;  %3983 = vpow2.f32 %v3835_v39  ;;  %v1332_v9 = vld [vmem:[%s8654_s5 + $0xe0] sm:$0xff]  ;;  %v1333_v10 = vld [vmem:[%s8654_s5 + $0xe8] sm:$0xff]  ;;  %v3846_v11 = vmul.f32 -1.442695, %v1325_v60  ;;  %v1334_v13 = vld [vmem:[%s8654_s5 + $0xf0] sm:$0xff]  ;;  %v4921_v31 = vadd.f32 1.0, %v4857_v40  ;;  %vm1469_vm0 = vweird.f32 %v4915_v28 }
  0x72   : > { %v3974_v50 = vpop.eup %3973  ;;  %3985 = vpow2.f32 %v3836_v42  ;;  %v1335_v14 = vld [vmem:[%s8654_s5 + $0xf8] sm:$0xff]  ;;  %v3847_v15 = vmul.f32 -1.442695, %v1326_v63  ;;  %v3848_v16 = vmul.f32 -1.442695, %v1327_v0  ;;  %v4924_v32 = vadd.f32 1.0, %v4862_v44 }
  0x73   : > { %v3976_v53 = vpop.eup %3975  ;;  %3987 = vpow2.f32 %v3837_v43  ;;  %v3849_v18 = vmul.f32 -1.442695, %v1328_v3  ;;  %v3850_v19 = vmul.f32 -1.442695, %v1329_v4  ;;  %v3851_v20 = vmul.f32 -1.442695, %v1330_v5 }
  0x74   : > { %v3978_v56 = vpop.eup %3977  ;;  %3989 = vpow2.f32 %v3838_v46  ;;  %v3852_v22 = vmul.f32 -1.442695, %v1331_v8  ;;  %v3853_v23 = vmul.f32 -1.442695, %v1332_v9  ;;  %v3854_v24 = vmul.f32 -1.442695, %v1333_v10 }
  0x75   : > { %v3980_v59 = vpop.eup %3979  ;;  %3991 = vpow2.f32 %v3839_v49  ;;  %v3855_v26 = vmul.f32 -1.442695, %v1334_v13  ;;  %v3856_v27 = vmul.f32 -1.442695, %v1335_v14  ;;  %v4927_v35 = vadd.f32 1.0, %v4867_v47 }
  0x76   : > { %v3982_v62 = vpop.eup %3981  ;;  %3993 = vpow2.f32 %v3840_v52  ;;  %v4929_v37 = vadd.f32 1.0, %v3974_v50  ;;  %v4931_v33 = vadd.f32 1.0, %v3976_v53  ;;  %v4933_v39 = vadd.f32 1.0, %v3978_v56 }
  0x77   : > { %v3984_v2 = vpop.eup %3983  ;;  %3995 = vpow2.f32 %v3841_v55  ;;  %v4935_v36 = vadd.f32 1.0, %v3980_v59  ;;  %v1475_v40 = vand.u32 2147483648, %v4915_v28  ;;  %v4938_v42 = vadd.f32 1.0, %v3982_v62 }
  0x78   : > { %v3986_v7 = vpop.eup %3985  ;;  %3997 = vpow2.f32 %v3842_v58  ;;  %v4940_v43 = vadd.f32 1.0, %v3984_v2  ;;  %v1473_v47 = vand.u32 2147483647, %v4915_v28  ;;  %v1490_v48 = vand.u32 2147483648, %v4918_v30 }
  0x79   : > { %v3988_v12 = vpop.eup %3987  ;;  %3999 = vpow2.f32 %v3843_v61  ;;  %v4942_v44 = vadd.f32 1.0, %v3986_v7  ;;  %v1488_v52 = vand.u32 2147483647, %v4918_v30  ;;  %v4955_v55 = vor.u32 1.1754944e-38, %v1475_v40 }
  0x7a   : > { %v3990_v17 = vpop.eup %3989  ;;  %4001 = vpow2.f32 %v3844_v1  ;;  %v4944_v46 = vadd.f32 1.0, %v3988_v12  ;;  %v1505_v56 = vand.u32 2147483648, %v4921_v31  ;;  %v1520_v60 = vand.u32 2147483648, %v4924_v32 }
  0x7b   : > { %v3992_v21 = vpop.eup %3991  ;;  %4003 = vpow2.f32 %v3845_v6  ;;  %v4948_v50 = vadd.f32 1.0, %v3990_v17  ;;  %v4965_v63 = vor.u32 1.1754944e-38, %v1490_v48  ;;  %v1503_v0 = vand.u32 2147483647, %v4921_v31 }
  0x7c   : > { %v3994_v25 = vpop.eup %3993  ;;  %4005 = vpow2.f32 %v3846_v11  ;;  %v4950_v51 = vadd.f32 1.0, %v3992_v21  ;;  %v1518_v4 = vand.u32 2147483647, %v4924_v32  ;;  %v4976_v7 = vor.u32 1.1754944e-38, %v1505_v56 }
  0x7d   : > { %v3996_v29 = vpop.eup %3995  ;;  %4007 = vpow2.f32 %v3847_v15  ;;  %v4953_v54 = vadd.f32 1.0, %v3994_v25  ;;  %v1535_v8 = vand.u32 2147483648, %v4927_v35  ;;  %v4983_v11 = vor.u32 1.1754944e-38, %v1520_v60 }
  0x7e   : > { %v3998_v34 = vpop.eup %3997  ;;  %4009 = vpow2.f32 %v3848_v16  ;;  %v4958_v58 = vadd.f32 1.0, %v3996_v29  ;;  %v1550_v12 = vand.u32 2147483648, %v4929_v37  ;;  %vm1484_vm1 = vweird.f32 %v4918_v30 }
  0x7f   : > { %v4000_v38 = vpop.eup %3999  ;;  %4011 = vpow2.f32 %v3849_v18  ;;  %v4960_v59 = vadd.f32 1.0, %v3998_v34  ;;  %v1533_v16 = vand.u32 2147483647, %v4927_v35  ;;  %vm5009_vm4 = vcmp.eq.f32.partialorder %v1473_v47, 8.507059e+37 }
  0x80   : > { %v4002_v41 = vpop.eup %4001  ;;  %4013 = vpow2.f32 %v3850_v19  ;;  %v4963_v62 = vadd.f32 1.0, %v4000_v38  ;;  %v1548_v19 = vand.u32 2147483647, %v4929_v37  ;;  %v5015_v29 = vor.u32 1.1754944e-38, %v1550_v12 }
  0x81   : > { %v4004_v45 = vpop.eup %4003  ;;  %4015 = vpow2.f32 %v3851_v20  ;;  %v4968_v2 = vadd.f32 1.0, %v4002_v41  ;;  %v1565_v20 = vand.u32 2147483648, %v4931_v33  ;;  %v1563_v34 = vand.u32 2147483647, %v4931_v33 }
  0x82   : > { %v4006_v49 = vpop.eup %4005  ;;  %4017 = vpow2.f32 %v3852_v22  ;;  %v4970_v3 = vadd.f32 1.0, %v4004_v45  ;;  %vm5024_vm6 = vcmp.eq.f32.partialorder %v1488_v52, 8.507059e+37  ;;  %vm5037_vm8 = vcmp.eq.f32.partialorder %v1503_v0, 8.507059e+37 }
  0x83   : > { %v4008_v53 = vpop.eup %4007  ;;  %4019 = vpow2.f32 %v3853_v23  ;;  %v4973_v6 = vadd.f32 1.0, %v4006_v49  ;;  %v5042_v52 = vor.u32 1.1754944e-38, %v1565_v20  ;;  %vm5049_vm12 = vcmp.eq.f32.partialorder %v1518_v4, 8.507059e+37 }
  0x84   : > { %v4010_v57 = vpop.eup %4009  ;;  %4021 = vpow2.f32 %v3854_v24  ;;  %v4979_v10 = vadd.f32 1.0, %v4008_v53  ;;  %v5005_v24 = vor.u32 1.1754944e-38, %v1535_v8  ;;  %vm5055_vm13 = vcmp.eq.f32.partialorder %v1533_v16, 8.507059e+37 }
  0x85   : > { %v4012_v61 = vpop.eup %4011  ;;  %4023 = vpow2.f32 %v3855_v26  ;;  %v4986_v14 = vadd.f32 1.0, %v4010_v57  ;;  %vm5062_vm9 = vcmp.eq.f32.partialorder %v1548_v19, 8.507059e+37  ;;  %vm5068_vm5 = vcmp.eq.f32.partialorder %v1563_v34, 8.507059e+37 }
  0x86   : > { %v4014_v1 = vpop.eup %4013  ;;  %4025 = vpow2.f32 %v3856_v27  ;;  %v4988_v15 = vadd.f32 1.0, %v4012_v61  ;;  %v8807_v47 = vmov 0  ;;  %vm8817_vm15 = vweird.f32 %v4924_v32 }
  0x87   : > { %v4016_v5 = vpop.eup %4015  ;;  %4027 = vrcp.f32 %v4915_v28  ;;  %v4993_v18 = vadd.f32 1.0, %v4014_v1  ;;  %v8808_v47 = vsel %vm5068_vm5, 4294967295, %v8807_v47  ;;  %v8833_v20 = vand.u32 2147483648, %v4933_v39 }
  0x88   : > { %v4018_v9 = vpop.eup %4017  ;;  %4029 = vrcp.f32 %v4918_v30  ;;  %v4999_v22 = vadd.f32 1.0, %v4016_v5 }
  0x89   : > { %v4020_v13 = vpop.eup %4019  ;;  %4031 = vrcp.f32 %v4921_v31  ;;  %v5001_v23 = vadd.f32 1.0, %v4018_v9 }
  0x8a   : > { %v4022_v17 = vpop.eup %4021  ;;  %4033 = vrcp.f32 %v4924_v32  ;;  %v5007_v26 = vadd.f32 1.0, %v4020_v13 }
  0x8b   : > { %v4024_v21 = vpop.eup %4023  ;;  %4035 = vrcp.f32 %v4927_v35  ;;  %v5020_v40 = vadd.f32 1.0, %v4022_v17 }
  0x8c   : > { %v4026_v25 = vpop.eup %4025  ;;  %8791 = vst [vmem:[#allocation24_spill] sm:$0xff] %v5007_v26  ;;  %4037 = vrcp.f32 %v4929_v37  ;;  %v5022_v41 = vadd.f32 1.0, %v4024_v21 }
  0x8d   : > { %v5018_v38 = vpop.eup %4027  ;;  %8794 = vst [vmem:[#allocation25_spill] sm:$0xff] %v5020_v40  ;;  %4039 = vrcp.f32 %v4931_v33  ;;  %v5033_v49 = vadd.f32 1.0, %v4026_v25 }
  0x8e   : > { %8795 = vst [vmem:[#allocation26_spill] sm:$0xff] %v5022_v41  ;;  %v5031_v48 = vpop.eup %4029  ;;  %v1465_v53 = vmul.f32 %v5018_v38, %v4915_v28  ;;  %vm1470_vm10 = vweird.f32 %v5018_v38  ;;  %4041 = vrcp.f32 %v4933_v39  ;;  %v8834_v28 = vand.u32 2147483647, %v4933_v39 }
  0x8f   : > { %8798 = vst [vmem:[#allocation27_spill] sm:$0xff] %v5033_v49  ;;  %v4032_v60 = vpop.eup %4031  ;;  %v1480_v61 = vmul.f32 %v5031_v48, %v4918_v30  ;;  %vm1485_vm11 = vweird.f32 %v5031_v48  ;;  %4043 = vrcp.f32 %v4935_v36  ;;  %vm5076_vm3 = vmor %vm1469_vm0, %vm1470_vm10  ;;  %vm8813_vm0 = vweird.f32 %v4921_v31 }
  0x90   : > { %v4034_v0 = vpop.eup %4033  ;;  %v1466_v5 = vsub.f32 1.0, %v1465_v53  ;;  %v1495_v8 = vmul.f32 %v4032_v60, %v4921_v31  ;;  %vm1500_vm14 = vweird.f32 %v4032_v60  ;;  %vm5088_vm2 = vmor %vm1484_vm1, %vm1485_vm11  ;;  %vm1589_vm11 = vweird.f32 %v4935_v36 }
  0x91   : > { %v4036_v13 = vpop.eup %4035  ;;  %v1481_v17 = vsub.f32 1.0, %v1480_v61  ;;  %v1510_v4 = vmul.f32 %v4034_v0, %v4924_v32  ;;  %vm5099_vm10 = vmor %vm8813_vm0, %vm1500_vm14  ;;  %vm8816_vm7 = vweird.f32 %v4034_v0  ;;  %vm8821_vm14 = vweird.f32 %v4927_v35 }
  0x92   : > { %v4038_v21 = vpop.eup %4037  ;;  %v1467_v16 = vmul.f32 %v5018_v38, %v1466_v5  ;;  %v1496_v25 = vsub.f32 1.0, %v1495_v8  ;;  %v1525_v53 = vmul.f32 %v4036_v13, %v4927_v35  ;;  %vm5112_vm5 = vmor %vm8817_vm15, %vm8816_vm7  ;;  %4045 = vrcp.f32 %v4938_v42 }
  0x93   : > { %v4040_v61 = vpop.eup %4039  ;;  %v1482_v12 = vmul.f32 %v5031_v48, %v1481_v17  ;;  %v1511_v5 = vsub.f32 1.0, %v1510_v4  ;;  %v1540_v8 = vmul.f32 %v4038_v21, %v4929_v37  ;;  %4047 = vrcp.f32 %v4940_v43 }
  0x94   : > { %v1468_v34 = vadd.f32 %v5018_v38, %v1467_v16  ;;  %v1497_v57 = vmul.f32 %v4032_v60, %v1496_v25  ;;  %v1526_v49 = vsub.f32 1.0, %v1525_v53  ;;  %v1555_v17 = vmul.f32 %v4040_v61, %v4931_v33  ;;  %v5093_v4 = vpop.eup %4041 }
  0x95   : > { %v1483_v41 = vadd.f32 %v5031_v48, %v1482_v12  ;;  %v1512_v30 = vmul.f32 %v4034_v0, %v1511_v5  ;;  %v1541_v40 = vsub.f32 1.0, %v1540_v8  ;;  %vm1560_vm1 = vweird.f32 %v4040_v61  ;;  %v5104_v25 = vpop.eup %4043 }
  0x96   : > { %v1472_v53 = vsel %vm5076_vm3, %v5018_v38, %v1468_v34  ;;  %v1498_v26 = vadd.f32 %v4032_v60, %v1497_v57  ;;  %v1527_v12 = vmul.f32 %v4036_v13, %v1526_v49  ;;  %v1556_v5 = vsub.f32 1.0, %v1555_v17 }
  0x97   : > { %v5119_v8 = vsel %vm5009_vm4, %v4955_v55, %v1472_v53  ;;  %v1487_v19 = vsel %vm5088_vm2, %v5031_v48, %v1483_v41  ;;  %v1513_v38 = vadd.f32 %v4034_v0, %v1512_v30  ;;  %vm8820_vm3 = vweird.f32 %v4036_v13 }
  0x98   : > { %vm5127_vm0 = vmor %vm8821_vm14, %vm8820_vm3  ;;  %v1542_v57 = vmul.f32 %v4038_v21, %v1541_v40  ;;  %v5134_v49 = vsel %vm5024_vm6, %v4965_v63, %v1487_v19  ;;  %v1502_v55 = vsel %vm5099_vm10, %v4032_v60, %v1498_v26  ;;  %v1528_v27 = vadd.f32 %v4036_v13, %v1527_v12 }
  0x99   : > { %vm8824_vm4 = vweird.f32 %v4038_v21  ;;  %vm8825_vm2 = vweird.f32 %v4929_v37  ;;  %v1557_v35 = vmul.f32 %v4040_v61, %v1556_v5  ;;  %v5148_v40 = vsel %vm5037_vm8, %v4976_v7, %v1502_v55  ;;  %v4046_v55 = vpop.eup %4045 }
  0x9a   : > { %vm5141_vm7 = vmor %vm8825_vm2, %vm8824_vm4  ;;  %v1517_v63 = vsel %vm5112_vm5, %v4034_v0, %v1513_v38  ;;  %v1543_v45 = vadd.f32 %v4038_v21, %v1542_v57  ;;  %vm8828_vm6 = vweird.f32 %v4931_v33  ;;  %v1570_v37 = vmul.f32 %v5093_v4, %v4933_v39  ;;  %v4048_v41 = vpop.eup %4047 }
  0x9b   : > { %vm1561_vm15 = vmor %vm8828_vm6, %vm1560_vm1  ;;  %v5160_v26 = vsel %vm5049_vm12, %v4983_v11, %v1517_v63  ;;  %v1532_v7 = vsel %vm5127_vm0, %v4036_v13, %v1528_v27  ;;  %v1558_v48 = vadd.f32 %v4040_v61, %v1557_v35  ;;  %vm1575_vm8 = vweird.f32 %v5093_v4 }
  0x9c   : > { %v5168_v56 = vsel %vm5055_vm13, %v5005_v24, %v1532_v7  ;;  %v1547_v33 = vsel %vm5141_vm7, %v4038_v21, %v1543_v45  ;;  %v1571_v60 = vsub.f32 1.0, %v1570_v37  ;;  %v1585_v1 = vmul.f32 %v5104_v25, %v4935_v36 }
  0x9d   : > { %v5177_v11 = vsel %vm5062_vm9, %v5015_v29, %v1547_v33  ;;  %v1562_v0 = vsel %vm1561_vm15, %v4040_v61, %v1558_v48  ;;  %vm1590_vm5 = vweird.f32 %v5104_v25  ;;  %v1595_v13 = vand.u32 2147483648, %v4935_v36 }
  0x9e   : > { %vm8829_vm12 = vnez %v8808_v47  ;;  %v1572_v9 = vmul.f32 %v5093_v4, %v1571_v60  ;;  %v1586_v21 = vsub.f32 1.0, %v1585_v1  ;;  %vm8830_vm13 = vweird.f32 %v4933_v39  ;;  %vm5208_vm1 = vmor %vm1589_vm11, %vm1590_vm5 }
  0x9f   : > { %v5184_v24 = vsel %vm8829_vm12, %v5042_v52, %v1562_v0  ;;  %vm5190_vm10 = vmor %vm8830_vm13, %vm1575_vm8  ;;  %v1581_v61 = vor.u32 1.1754944e-38, %v8833_v20  ;;  %v1608_v34 = vand.u32 2147483647, %v4938_v42  ;;  %v1610_v47 = vand.u32 2147483648, %v4938_v42 }
  0xa0   : > { %v1573_v52 = vadd.f32 %v5093_v4, %v1572_v9  ;;  %vm1579_vm9 = vcmp.eq.f32.partialorder %v8834_v28, 8.507059e+37  ;;  %v1587_v17 = vmul.f32 %v5104_v25, %v1586_v21  ;;  %v1623_v16 = vand.u32 2147483647, %v4940_v43 }
  0xa1   : > { %v8837_v53 = vand.u32 2147483647, %v4935_v36  ;;  %v1596_v39 = vor.u32 1.1754944e-38, %v1595_v13  ;;  %v1625_v12 = vand.u32 2147483648, %v4940_v43  ;;  %4049 = vrcp.f32 %v4942_v44 }
  0xa2   : > { %v1577_v5 = vsel %vm5190_vm10, %v5093_v4, %v1573_v52  ;;  %v1588_v19 = vadd.f32 %v5104_v25, %v1587_v17  ;;  %vm1604_vm11 = vweird.f32 %v4938_v42  ;;  %vm1619_vm14 = vweird.f32 %v4940_v43 }
  0xa3   : > { %vm5214_vm3 = vcmp.eq.f32.partialorder %v8837_v53, 8.507059e+37  ;;  %v5226_v36 = vsel %vm1579_vm9, %v1581_v61, %v1577_v5  ;;  %vm5228_vm0 = vcmp.eq.f32.partialorder %v1608_v34, 8.507059e+37  ;;  %v1611_v32 = vor.u32 1.1754944e-38, %v1610_v47 }
  0xa4   : > { %v1638_v57 = vand.u32 2147483647, %v4942_v44  ;;  %v1592_v4 = vsel %vm5208_vm1, %v5104_v25, %v1588_v19  ;;  %vm5236_vm4 = vcmp.eq.f32.partialorder %v1623_v16, 8.507059e+37  ;;  %vm1634_vm2 = vweird.f32 %v4942_v44 }
  0xa5   : > { %4051 = vrcp.f32 %v4944_v46  ;;  %v5244_v35 = vsel %vm5214_vm3, %v1596_v39, %v1592_v4  ;;  %v1600_v63 = vmul.f32 %v4046_v55, %v4938_v42  ;;  %v1626_v45 = vor.u32 1.1754944e-38, %v1625_v12 }
  0xa6   : > { %v1640_v37 = vand.u32 2147483648, %v4942_v44  ;;  %vm1605_vm7 = vweird.f32 %v4046_v55  ;;  %v1615_v25 = vmul.f32 %v4048_v41, %v4940_v43  ;;  %vm1649_vm6 = vweird.f32 %v4944_v46 }
  0xa7   : > { %v1653_v7 = vand.u32 2147483647, %v4944_v46  ;;  %v4050_v48 = vpop.eup %4049  ;;  %v1601_v33 = vsub.f32 1.0, %v1600_v63  ;;  %vm5251_vm15 = vcmp.eq.f32.partialorder %v1638_v57, 8.507059e+37  ;;  %v1655_v1 = vand.u32 2147483648, %v4944_v46  ;;  %vm5264_vm5 = vmor %vm1604_vm11, %vm1605_vm7 }
  0xa8   : > { %4053 = vrcp.f32 %v4948_v50  ;;  %v1616_v0 = vsub.f32 1.0, %v1615_v25  ;;  %vm1620_vm8 = vweird.f32 %v4048_v41  ;;  %v1630_v13 = vmul.f32 %v4050_v48, %v4942_v44 }
  0xa9   : > { %v1668_v9 = vand.u32 2147483647, %v4948_v50  ;;  %v1602_v21 = vmul.f32 %v4046_v55, %v1601_v33  ;;  %v1641_v29 = vor.u32 1.1754944e-38, %v1640_v37  ;;  %v1670_v20 = vand.u32 2147483648, %v4948_v50  ;;  %vm5274_vm10 = vmor %vm1619_vm14, %vm1620_vm8 }
  0xaa   : > { %4055 = vrcp.f32 %v4950_v51  ;;  %v1617_v47 = vmul.f32 %v4048_v41, %v1616_v0  ;;  %v1631_v52 = vsub.f32 1.0, %v1630_v13  ;;  %vm1635_vm12 = vweird.f32 %v4050_v48 }
  0xab   : > { %v4052_v61 = vpop.eup %4051  ;;  %vm5268_vm13 = vcmp.eq.f32.partialorder %v1653_v7, 8.507059e+37  ;;  %v1603_v17 = vadd.f32 %v4046_v55, %v1602_v21  ;;  %v1656_v30 = vor.u32 1.1754944e-38, %v1655_v1  ;;  %vm1664_vm9 = vweird.f32 %v4948_v50  ;;  %vm5289_vm14 = vmor %vm1634_vm2, %vm1635_vm12 }
  0xac   : > { %v1645_v42 = vmul.f32 %v4052_v61, %v4944_v46  ;;  %v1618_v53 = vadd.f32 %v4048_v41, %v1617_v47  ;;  %v1632_v31 = vmul.f32 %v4050_v48, %v1631_v52  ;;  %vm1650_vm1 = vweird.f32 %v4052_v61 }
  0xad   : > { %vm5280_vm3 = vcmp.eq.f32.partialorder %v1668_v9, 8.507059e+37  ;;  %vm1679_vm11 = vweird.f32 %v4950_v51  ;;  %v1607_v43 = vsel %vm5264_vm5, %v4046_v55, %v1603_v17  ;;  %v1671_v57 = vor.u32 1.1754944e-38, %v1670_v20 }
  0xae   : > { %v4054_v12 = vpop.eup %4053  ;;  %v1646_v19 = vsub.f32 1.0, %v1645_v42  ;;  %4057 = vrcp.f32 %v4953_v54  ;;  %v5296_v4 = vsel %vm5228_vm0, %v1611_v32, %v1607_v43  ;;  %v1622_v63 = vsel %vm5274_vm10, %v4048_v41, %v1618_v53  ;;  %vm5312_vm0 = vmor %vm1649_vm6, %vm1650_vm1 }
  0xaf   : > { %v1633_v37 = vadd.f32 %v4050_v48, %v1632_v31  ;;  %v1660_v55 = vmul.f32 %v4054_v12, %v4948_v50  ;;  %v5303_v44 = vsel %vm5236_vm4, %v1626_v45, %v1622_v63  ;;  %v1683_v33 = vand.u32 2147483647, %v4950_v51 }
  0xb0   : > { %v4056_v25 = vpop.eup %4055  ;;  %v1647_v7 = vmul.f32 %v4052_v61, %v1646_v19  ;;  %v1685_v1 = vand.u32 2147483648, %v4950_v51  ;;  %vm1665_vm2 = vweird.f32 %v4054_v12  ;;  %vm1694_vm4 = vweird.f32 %v4953_v54 }
  0xb1   : > { %v1637_v38 = vsel %vm5289_vm14, %v4050_v48, %v1633_v37  ;;  %v1661_v41 = vsub.f32 1.0, %v1660_v55  ;;  %v1675_v27 = vmul.f32 %v4056_v25, %v4950_v51  ;;  %v1698_v48 = vand.u32 2147483647, %v4953_v54  ;;  %vm5328_vm6 = vmor %vm1664_vm9, %vm1665_vm2 }
  0xb2   : > { %v5319_v45 = vsel %vm5251_vm15, %v1641_v29, %v1637_v38  ;;  %v1648_v0 = vadd.f32 %v4052_v61, %v1647_v7  ;;  %vm1680_vm7 = vweird.f32 %v4056_v25  ;;  %4059 = vrcp.f32 %v4958_v58 }
  0xb3   : > { %v1662_v13 = vmul.f32 %v4054_v12, %v1661_v41  ;;  %v1676_v9 = vsub.f32 1.0, %v1675_v27  ;;  %vm5332_vm15 = vcmp.eq.f32.partialorder %v1683_v33, 8.507059e+37  ;;  %v1686_v20 = vor.u32 1.1754944e-38, %v1685_v1  ;;  %vm5344_vm8 = vmor %vm1679_vm11, %vm1680_vm7 }
  0xb4   : > { %v4058_v46 = vpop.eup %4057  ;;  %v1652_v21 = vsel %vm5312_vm0, %v4052_v61, %v1648_v0  ;;  %v1700_v34 = vand.u32 2147483648, %v4953_v54  ;;  %vm5348_vm12 = vcmp.eq.f32.partialorder %v1698_v48, 8.507059e+37  ;;  %v1713_v42 = vand.u32 2147483647, %v4958_v58 }
  0xb5   : > { %v5339_v47 = vsel %vm5268_vm13, %v1656_v30, %v1652_v21  ;;  %v1663_v52 = vadd.f32 %v4054_v12, %v1662_v13  ;;  %v1677_v17 = vmul.f32 %v4056_v25, %v1676_v9  ;;  %v1690_v61 = vmul.f32 %v4058_v46, %v4953_v54 }
  0xb6   : > { %vm1695_vm5 = vweird.f32 %v4058_v46  ;;  %v1715_v28 = vand.u32 2147483648, %v4958_v58  ;;  %4061 = vrcp.f32 %v4960_v59  ;;  %v1701_v43 = vor.u32 1.1754944e-38, %v1700_v34 }
  0xb7   : > { %v1667_v30 = vsel %vm5328_vm6, %v4054_v12, %v1663_v52  ;;  %v1678_v53 = vadd.f32 %v4056_v25, %v1677_v17  ;;  %v1691_v31 = vsub.f32 1.0, %v1690_v61  ;;  %vm1709_vm13 = vweird.f32 %v4958_v58  ;;  %vm5374_vm10 = vmor %vm1694_vm4, %vm1695_vm5 }
  0xb8   : > { %v5359_v51 = vsel %vm5280_vm3, %v1671_v57, %v1667_v30  ;;  %v1728_v5 = vand.u32 2147483647, %v4960_v59  ;;  %v4060_v19 = vpop.eup %4059  ;;  %v1730_v12 = vand.u32 2147483648, %v4960_v59  ;;  %4063 = vrcp.f32 %v4963_v62 }
  0xb9   : > { %v1682_v63 = vsel %vm5344_vm8, %v4056_v25, %v1678_v53  ;;  %v1692_v37 = vmul.f32 %v4058_v46, %v1691_v31  ;;  %v1705_v57 = vmul.f32 %v4060_v19, %v4958_v58  ;;  %vm5379_vm9 = vcmp.eq.f32.partialorder %v1713_v42, 8.507059e+37 }
  0xba   : > { %v5369_v55 = vsel %vm5332_vm15, %v1686_v20, %v1682_v63  ;;  %v1716_v7 = vor.u32 1.1754944e-38, %v1715_v28  ;;  %vm1710_vm1 = vweird.f32 %v4060_v19  ;;  %vm1724_vm3 = vweird.f32 %v4960_v59 }
  0xbb   : > { %v1693_v33 = vadd.f32 %v4058_v46, %v1692_v37  ;;  %v1743_v1 = vand.u32 2147483647, %v4963_v62  ;;  %v1706_v38 = vsub.f32 1.0, %v1705_v57  ;;  %vm5385_vm11 = vcmp.eq.f32.partialorder %v1728_v5, 8.507059e+37  ;;  %vm5404_vm2 = vmor %vm1709_vm13, %vm1710_vm1 }
  0xbc   : > { %v1745_v32 = vand.u32 2147483648, %v4963_v62  ;;  %4065 = vrcp.f32 %v4968_v2  ;;  %v4062_v41 = vpop.eup %4061  ;;  %v1731_v0 = vor.u32 1.1754944e-38, %v1730_v12  ;;  %vm1739_vm14 = vweird.f32 %v4963_v62 }
  0xbd   : > { %v1697_v27 = vsel %vm5374_vm10, %v4058_v46, %v1693_v33  ;;  %v1758_v48 = vand.u32 2147483647, %v4968_v2  ;;  %v1707_v9 = vmul.f32 %v4060_v19, %v1706_v38  ;;  %v1720_v21 = vmul.f32 %v4062_v41, %v4960_v59 }
  0xbe   : > { %v5397_v13 = vsel %vm5348_vm12, %v1701_v43, %v1697_v27  ;;  %vm1754_vm0 = vweird.f32 %v4968_v2  ;;  %v4064_v60 = vpop.eup %4063  ;;  %vm1725_vm4 = vweird.f32 %v4062_v41  ;;  %vm5408_vm7 = vcmp.eq.f32.partialorder %v1743_v1, 8.507059e+37 }
  0xbf   : > { %v1760_v20 = vand.u32 2147483648, %v4968_v2  ;;  %4067 = vrcp.f32 %v4970_v3  ;;  %v1708_v34 = vadd.f32 %v4060_v19, %v1707_v9  ;;  %v1721_v52 = vsub.f32 1.0, %v1720_v21  ;;  %vm5431_vm8 = vmor %vm1724_vm3, %vm1725_vm4 }
  0xc0   : > { %v1735_v17 = vmul.f32 %v4064_v60, %v4963_v62  ;;  %v1746_v61 = vor.u32 1.1754944e-38, %v1745_v32  ;;  %vm1740_vm6 = vweird.f32 %v4064_v60  ;;  %vm5415_vm15 = vcmp.eq.f32.partialorder %v1758_v48, 8.507059e+37 }
  0xc1   : > { %v1773_v50 = vand.u32 2147483647, %v4970_v3  ;;  %4069 = vrcp.f32 %v4973_v6  ;;  %v1712_v42 = vsel %vm5404_vm2, %v4060_v19, %v1708_v34  ;;  %v1722_v28 = vmul.f32 %v4062_v41, %v1721_v52  ;;  %vm5441_vm10 = vmor %vm1739_vm14, %vm1740_vm6 }
  0xc2   : > { %v4066_v16 = vpop.eup %4065  ;;  %v1736_v30 = vsub.f32 1.0, %v1735_v17  ;;  %v1775_v53 = vand.u32 2147483648, %v4970_v3  ;;  %v5426_v31 = vsel %vm5379_vm9, %v1716_v7, %v1712_v42  ;;  %v1761_v63 = vor.u32 1.1754944e-38, %v1760_v20 }
  0xc3   : > { %v1750_v5 = vmul.f32 %v4066_v16, %v4968_v2  ;;  %vm1769_vm5 = vweird.f32 %v4970_v3  ;;  %v1723_v19 = vadd.f32 %v4062_v41, %v1722_v28  ;;  %vm1755_vm12 = vweird.f32 %v4066_v16 }
  0xc4   : > { %v1737_v37 = vmul.f32 %v4064_v60, %v1736_v30  ;;  %vm1784_vm13 = vweird.f32 %v4973_v6  ;;  %vm5445_vm9 = vcmp.eq.f32.partialorder %v1773_v50, 8.507059e+37  ;;  %v1788_v25 = vand.u32 2147483647, %v4973_v6  ;;  %vm5465_vm3 = vmor %vm1754_vm0, %vm1755_vm12 }
  0xc5   : > { %v4068_v12 = vpop.eup %4067  ;;  %v1751_v39 = vsub.f32 1.0, %v1750_v5  ;;  %4071 = vrcp.f32 %v4979_v10  ;;  %v1727_v7 = vsel %vm5431_vm8, %v4062_v41, %v1723_v19  ;;  %v1776_v62 = vor.u32 1.1754944e-38, %v1775_v53 }
  0xc6   : > { %v1738_v33 = vadd.f32 %v4064_v60, %v1737_v37  ;;  %v1765_v1 = vmul.f32 %v4068_v12, %v4970_v3  ;;  %v5456_v32 = vsel %vm5385_vm11, %v1731_v0, %v1727_v7  ;;  %v1790_v48 = vand.u32 2147483648, %v4973_v6  ;;  %v1017_v3 = vld [vmem:[%s669_s12] sm:$0x1] }
  0xc7   : > { %v4070_v38 = vpop.eup %4069  ;;  %v1752_v27 = vmul.f32 %v4066_v16, %v1751_v39  ;;  %vm1799_vm1 = vweird.f32 %v4979_v10  ;;  %vm1770_vm14 = vweird.f32 %v4068_v12  ;;  %vm5474_vm11 = vcmp.eq.f32.partialorder %v1788_v25, 8.507059e+37 }
  0xc8   : > { %v1742_v9 = vsel %vm5441_vm10, %v4064_v60, %v1738_v33  ;;  %v1766_v21 = vsub.f32 1.0, %v1765_v1  ;;  %v1780_v54 = vmul.f32 %v4070_v38, %v4973_v6  ;;  %v1803_v60 = vand.u32 2147483647, %v4979_v10  ;;  %vm5484_vm2 = vmor %vm1769_vm5, %vm1770_vm14 }
  0xc9   : > { %v5472_v0 = vsel %vm5408_vm7, %v1746_v61, %v1742_v9  ;;  %v1753_v46 = vadd.f32 %v4066_v16, %v1752_v27  ;;  %vm1785_vm0 = vweird.f32 %v4070_v38  ;;  %4073 = vrcp.f32 %v4986_v14 }
  0xca   : > { %v1767_v2 = vmul.f32 %v4068_v12, %v1766_v21  ;;  %v1781_v34 = vsub.f32 1.0, %v1780_v54  ;;  %v1791_v61 = vor.u32 1.1754944e-38, %v1790_v48  ;;  %v1805_v50 = vand.u32 2147483648, %v4979_v10  ;;  %vm5497_vm4 = vmor %vm1784_vm13, %vm1785_vm0 }
  0xcb   : > { %v4072_v52 = vpop.eup %4071  ;;  %v1757_v17 = vsel %vm5465_vm3, %v4066_v16, %v1753_v46  ;;  %v1818_v42 = vand.u32 2147483647, %v4986_v14  ;;  %vm5501_vm7 = vcmp.eq.f32.partialorder %v1803_v60, 8.507059e+37  ;;  %vm1814_vm6 = vweird.f32 %v4986_v14  ;;  %v8906_v16 = vld [vmem:[#allocation24_spill] sm:$0xff] }
  0xcc   : > { %v5492_v28 = vsel %vm5415_vm15, %v1761_v63, %v1757_v17  ;;  %v1768_v30 = vadd.f32 %v4068_v12, %v1767_v2  ;;  %v1782_v53 = vmul.f32 %v4070_v38, %v1781_v34  ;;  %v1795_v43 = vmul.f32 %v4072_v52, %v4979_v10 }
  0xcd   : > { %v1820_v58 = vand.u32 2147483648, %v4986_v14  ;;  %4075 = vrcp.f32 %v4988_v15  ;;  %vm1800_vm15 = vweird.f32 %v4072_v52  ;;  %v1806_v37 = vor.u32 1.1754944e-38, %v1805_v50 }
  0xce   : > { %v1772_v5 = vsel %vm5484_vm2, %v4068_v12, %v1768_v30  ;;  %v1783_v63 = vadd.f32 %v4070_v38, %v1782_v53  ;;  %v1796_v19 = vsub.f32 1.0, %v1795_v43  ;;  %vm5514_vm8 = vcmp.eq.f32.partialorder %v1818_v42, 8.507059e+37  ;;  %vm5529_vm5 = vmor %vm1799_vm1, %vm1800_vm15 }
  0xcf   : > { %v5512_v6 = vsel %vm5445_vm9, %v1776_v62, %v1772_v5  ;;  %v1833_v39 = vand.u32 2147483647, %v4988_v15  ;;  %v4074_v25 = vpop.eup %4073  ;;  %v1835_v12 = vand.u32 2147483648, %v4988_v15  ;;  %4077 = vrcp.f32 %v4993_v18 }
  0xd0   : > { %v1787_v7 = vsel %vm5497_vm4, %v4070_v38, %v1783_v63  ;;  %v1797_v33 = vmul.f32 %v4072_v52, %v1796_v19  ;;  %v1810_v62 = vmul.f32 %v4074_v25, %v4986_v14  ;;  %v1821_v27 = vor.u32 1.1754944e-38, %v1820_v58 }
  0xd1   : > { %v5525_v57 = vsel %vm5474_vm11, %v1791_v61, %v1787_v7  ;;  %vm1829_vm12 = vweird.f32 %v4988_v15  ;;  %vm1815_vm13 = vweird.f32 %v4074_v25  ;;  %vm1844_vm10 = vweird.f32 %v4993_v18 }
  0xd2   : > { %v1798_v38 = vadd.f32 %v4072_v52, %v1797_v33  ;;  %v1848_v48 = vand.u32 2147483647, %v4993_v18  ;;  %v1811_v41 = vsub.f32 1.0, %v1810_v62  ;;  %vm5537_vm9 = vcmp.eq.f32.partialorder %v1833_v39, 8.507059e+37  ;;  %vm5555_vm14 = vmor %vm1814_vm6, %vm1815_vm13 }
  0xd3   : > { %v4076_v9 = vpop.eup %4075  ;;  %v1850_v10 = vand.u32 2147483648, %v4993_v18  ;;  %4079 = vrcp.f32 %v4999_v22  ;;  %v1836_v20 = vor.u32 1.1754944e-38, %v1835_v12  ;;  %v1863_v60 = vand.u32 2147483647, %v4999_v22 }
  0xd4   : > { %v1802_v54 = vsel %vm5529_vm5, %v4072_v52, %v1798_v38  ;;  %v1825_v46 = vmul.f32 %v4076_v9, %v4988_v15  ;;  %v1812_v34 = vmul.f32 %v4074_v25, %v1811_v41  ;;  %vm1830_vm1 = vweird.f32 %v4076_v9  ;;  %v8913_v41 = vld [vmem:[#allocation25_spill] sm:$0xff] }
  0xd5   : > { %v5549_v2 = vsel %vm5501_vm7, %v1806_v37, %v1802_v54  ;;  %vm1859_vm3 = vweird.f32 %v4999_v22  ;;  %v4078_v17 = vpop.eup %4077  ;;  %vm5559_vm11 = vcmp.eq.f32.partialorder %v1848_v48, 8.507059e+37  ;;  %v1865_v50 = vand.u32 2147483648, %v4999_v22  ;;  %vm5578_vm4 = vmor %vm1829_vm12, %vm1830_vm1 }
  0xd6   : > { %v1826_v52 = vsub.f32 1.0, %v1825_v46  ;;  %4081 = vrcp.f32 %v5001_v23  ;;  %v1813_v42 = vadd.f32 %v4074_v25, %v1812_v34  ;;  %v1840_v30 = vmul.f32 %v4078_v17, %v4993_v18 }
  0xd7   : > { %v1851_v53 = vor.u32 1.1754944e-38, %v1850_v10  ;;  %v1878_v14 = vand.u32 2147483647, %v5001_v23  ;;  %vm5567_vm0 = vcmp.eq.f32.partialorder %v1863_v60, 8.507059e+37  ;;  %vm1874_vm2 = vweird.f32 %v5001_v23 }
  0xd8   : > { %v1827_v43 = vmul.f32 %v4076_v9, %v1826_v52  ;;  %4083 = vrcp.f32 %v8906_v16  ;;  %v1817_v5 = vsel %vm5555_vm14, %v4074_v25, %v1813_v42  ;;  %v1841_v19 = vsub.f32 1.0, %v1840_v30 }
  0xd9   : > { %v4080_v58 = vpop.eup %4079  ;;  %vm1845_vm7 = vweird.f32 %v4078_v17  ;;  %v1880_v37 = vand.u32 2147483648, %v5001_v23  ;;  %v5586_v39 = vsel %vm5514_vm8, %v1821_v27, %v1817_v5  ;;  %v1866_v25 = vor.u32 1.1754944e-38, %v1865_v50  ;;  %v8918_v5 = vld [vmem:[#allocation26_spill] sm:$0xff] }
  0xda   : > { %v1828_v7 = vadd.f32 %v4076_v9, %v1827_v43  ;;  %v1855_v33 = vmul.f32 %v4080_v58, %v4999_v22  ;;  %v1842_v15 = vmul.f32 %v4078_v17, %v1841_v19  ;;  %vm1860_vm6 = vweird.f32 %v4080_v58  ;;  %vm5599_vm8 = vmor %vm1844_vm10, %vm1845_vm7 }
  0xdb   : > { %vm5589_vm15 = vcmp.eq.f32.partialorder %v1878_v14, 8.507059e+37  ;;  %vm1889_vm5 = vweird.f32 %v8906_v16  ;;  %v1893_v1 = vand.u32 2147483647, %v8906_v16  ;;  %v1895_v48 = vand.u32 2147483648, %v8906_v16  ;;  %vm5622_vm10 = vmor %vm1859_vm3, %vm1860_vm6 }
  0xdc   : > { %v4082_v62 = vpop.eup %4081  ;;  %v1832_v59 = vsel %vm5578_vm4, %v4076_v9, %v1828_v7  ;;  %v1856_v38 = vsub.f32 1.0, %v1855_v33  ;;  %4085 = vrcp.f32 %v8913_v41  ;;  %v1843_v54 = vadd.f32 %v4078_v17, %v1842_v15 }
  0xdd   : > { %v5607_v10 = vsel %vm5537_vm9, %v1836_v20, %v1832_v59  ;;  %v1870_v46 = vmul.f32 %v4082_v62, %v5001_v23  ;;  %v1881_v60 = vor.u32 1.1754944e-38, %v1880_v37  ;;  %vm1875_vm12 = vweird.f32 %v4082_v62 }
  0xde   : > { %v4084_v18 = vpop.eup %4083  ;;  %v1857_v9 = vmul.f32 %v4080_v58, %v1856_v38  ;;  %vm1904_vm13 = vweird.f32 %v8913_v41  ;;  %v1908_v34 = vand.u32 2147483647, %v8913_v41  ;;  %v1847_v21 = vsel %vm5599_vm8, %v4078_v17, %v1843_v54  ;;  %vm5646_vm3 = vmor %vm1874_vm2, %vm1875_vm12  ;;  %v8925_v38 = vld [vmem:[#allocation27_spill] sm:$0xff] }
  0xdf   : > { %v1871_v29 = vsub.f32 1.0, %v1870_v46  ;;  %v1885_v52 = vmul.f32 %v4084_v18, %v8906_v16  ;;  %vm5627_vm9 = vcmp.eq.f32.partialorder %v1893_v1, 8.507059e+37  ;;  %v5633_v42 = vsel %vm5559_vm11, %v1851_v53, %v1847_v21  ;;  %v740_v1 = vld [vmem:[%s4795_s11 + $0x18] sm:$0xff] }
  0xe0   : > { %v1858_v30 = vadd.f32 %v4080_v58, %v1857_v9  ;;  %v1896_v17 = vor.u32 1.1754944e-38, %v1895_v48  ;;  %v1910_v14 = vand.u32 2147483648, %v8913_v41  ;;  %vm1890_vm1 = vweird.f32 %v4084_v18 }
  0xe1   : > { %v1872_v22 = vmul.f32 %v4082_v62, %v1871_v29  ;;  %v1886_v43 = vsub.f32 1.0, %v1885_v52  ;;  %4087 = vrcp.f32 %v8918_v5  ;;  %vm5650_vm14 = vcmp.eq.f32.partialorder %v1908_v34, 8.507059e+37  ;;  %vm5664_vm11 = vmor %vm1889_vm5, %vm1890_vm1 }
  0xe2   : > { %v4086_v63 = vpop.eup %4085  ;;  %v1862_v61 = vsel %vm5622_vm10, %v4080_v58, %v1858_v30  ;;  %v1923_v37 = vand.u32 2147483647, %v8918_v5  ;;  %v1925_v7 = vand.u32 2147483648, %v8918_v5  ;;  %v1911_v27 = vor.u32 1.1754944e-38, %v1910_v14  ;;  %v744_v30 = vld [vmem:[%s4795_s11 + $0x38] sm:$0xff] }
  0xe3   : > { %v5658_v33 = vsel %vm5567_vm0, %v1866_v25, %v1862_v61  ;;  %v1873_v58 = vadd.f32 %v4082_v62, %v1872_v22  ;;  %v1887_v15 = vmul.f32 %v4084_v18, %v1886_v43  ;;  %v1900_v23 = vmul.f32 %v4086_v63, %v8913_v41 }
  0xe4   : > { %vm1905_vm2 = vweird.f32 %v4086_v63  ;;  %vm1919_vm4 = vweird.f32 %v8918_v5  ;;  %4089 = vrcp.f32 %v8925_v38  ;;  %v1926_v46 = vor.u32 1.1754944e-38, %v1925_v7 }
  0xe5   : > { %v1877_v25 = vsel %vm5646_vm3, %v4082_v62, %v1873_v58  ;;  %v1888_v48 = vadd.f32 %v4084_v18, %v1887_v15  ;;  %v1901_v54 = vsub.f32 1.0, %v1900_v23  ;;  %vm5676_vm0 = vcmp.eq.f32.partialorder %v1923_v37, 8.507059e+37  ;;  %vm5692_vm6 = vmor %vm1904_vm13, %vm1905_vm2  ;;  %v1172_v23 = vld [vmem:[%s4799_s30] sm:$0x3] }
  0xe6   : > { %v5674_v16 = vsel %vm5589_vm15, %v1881_v60, %v1877_v25  ;;  %v1938_v34 = vand.u32 2147483647, %v8925_v38  ;;  %v1940_v21 = vand.u32 2147483648, %v8925_v38  ;;  %vm748_vm7 = vnez %v740_v1 }
  0xe7   : > { %v4088_v20 = vpop.eup %4087  ;;  %v1892_v62 = vsel %vm5664_vm11, %v4084_v18, %v1888_v48  ;;  %v1902_v29 = vmul.f32 %v4086_v63, %v1901_v54  ;;  %v3722_v52 = vmul.f32 -1.442695, %v1017_v3  ;;  %vm1934_vm5 = vweird.f32 %v8925_v38  ;;  %v1173_v48 = vld [vmem:[%s4799_s30 + $0x2] sm:$0x3] }
  0xe8   : > { %v5687_v12 = vsel %vm5627_vm9, %v1896_v17, %v1892_v62  ;;  %v1915_v14 = vmul.f32 %v4088_v20, %v8918_v5  ;;  %vm1920_vm15 = vweird.f32 %v4088_v20  ;;  %vm5698_vm8 = vcmp.eq.f32.partialorder %v1938_v34, 8.507059e+37 }
  0xe9   : > { %v1903_v18 = vadd.f32 %v4086_v63, %v1902_v29  ;;  %v8676_v50 = vmov 0   ;;  %4091 = vpow2.f32 %v3722_v52  ;;  %vm752_vm12 = vnez %v744_v30  ;;  %vm5722_vm13 = vmor %vm1919_vm4, %vm1920_vm15 }
  0xea   : > { %v5703_v17 = vsel %vm748_vm7, 16843009, %v8676_v50  ;;  %v4090_v41 = vpop.eup %4089  ;;  %v1916_v43 = vsub.f32 1.0, %v1915_v14  ;;  %v1941_v58 = vor.u32 1.1754944e-38, %v1940_v21  ;;  %v5711_v15 = vsel %vm752_vm12, 16843009, %v8676_v50 }
  0xeb   : > { %v775_v61 = vunpack.c.2.s8 %v5703_v17  ;;  %v776_v53 = vunpack.c.3.s8 %v5703_v17  ;;  %v1907_v37 = vsel %vm5692_vm6, %v4086_v63, %v1903_v18  ;;  %v1930_v7 = vmul.f32 %v4090_v41, %v8925_v38  ;;  %v5748_v38 = vld [vmem:[%s4786_s27 + $0x78] sm:$0xff] }
  0xec   : > { %v5716_v1 = vsel %vm5650_vm14, %v1911_v27, %v1907_v37  ;;  %v1917_v59 = vmul.f32 %v4088_v20, %v1916_v43  ;;  %vm1935_vm10 = vweird.f32 %v4090_v41  ;;  %v791_v34 = vunpack.c.2.s8 %v5711_v15  ;;  %8937 = vst [vmem:[#allocation25_spill] sm:$0xff] %v5748_v38 }
  0xed   : > { %v821_v3 = vpack.c.b16 %v775_v61, %v775_v61  ;;  %v823_v25 = vpack.c.b16 %v776_v53, %v776_v53  ;;  %v1931_v54 = vsub.f32 1.0, %v1930_v7  ;;  %v792_v21 = vunpack.c.3.s8 %v5711_v15  ;;  %vm5732_vm3 = vmor %vm1934_vm5, %vm1935_vm10 }
  0xee   : > { %v1918_v19 = vadd.f32 %v4088_v20, %v1917_v59  ;;  %vm1174_vm9 = vnez %v1172_v23  ;;  %v853_v30 = vpack.c.b16 %v791_v34, %v791_v34  ;;  %vm1175_vm1 = vnez %v1173_v48 }
  0xef   : > { %v822_v27 = vpack.c.b8 %v821_v3, %v821_v3  ;;  %v824_v62 = vpack.c.b8 %v823_v25, %v823_v25  ;;  %v4092_v29 = vpop.eup %4091  ;;  %v1932_v52 = vmul.f32 %v4090_v41, %v1931_v54  ;;  %v855_v5 = vpack.c.b16 %v792_v21, %v792_v21 }
  0xf0   : > { %v1922_v60 = vsel %vm5722_vm13, %v4088_v20, %v1918_v19  ;;  %v5736_v18 = vadd.f32 1.0, %v4092_v29  ;;  %v5745_v20 = vld [vmem:[%s4786_s27 + $0x70] sm:$0xff]  ;;  %v1178_v9 = vsel %vm1174_vm9, 16843009, %v8676_v50  ;;  %v854_v63 = vpack.c.b8 %v853_v30, %v853_v30  ;;  %v1177_v19 = vld [vmem:[%s4797_s19 + $0x8] sm:$0xff] }
  0xf1   : > { %vm871_vm14 = vnez %v822_v27  ;;  %vm872_vm11 = vnez %v824_v62  ;;  %v5740_v43 = vsel %vm5676_vm0, %v1926_v46, %v1922_v60  ;;  %v1933_v61 = vadd.f32 %v4090_v41, %v1932_v52  ;;  %8936 = vst [vmem:[#allocation24_spill] sm:$0xff] %v5745_v20  ;;  %v5921_v29 = vld [vmem:[%s4802_s23 + $0xd0] sm:$0xff] }
  0xf2   : > { %v903_v53 = vsel %vm871_vm14, 16843009, %v8676_v50  ;;  %v904_v37 = vsel %vm872_vm11, 16843009, %v8676_v50  ;;  %4093 = vrcp.f32 %v5736_v18  ;;  %v1031_v3 = vand.u32 2147483647, %v5736_v18 }
  0xf3   : > { %v935_v7 = vunpack.c.0.s8 %v903_v53  ;;  %v936_v59 = vunpack.c.0.s8 %v904_v37  ;;  %v1937_v46 = vsel %vm5732_vm3, %v4090_v41, %v1933_v61  ;;  %v1033_v25 = vand.u32 2147483648, %v5736_v18  ;;  %v5789_v61 = vld [vmem:[%s4786_s27 + $0xf0] sm:$0xff]  ;;  %v5792_v53 = vld [vmem:[%s4786_s27 + $0xf8] sm:$0xff] }
  0xf4   : > { %v5759_v54 = vsel %vm5698_vm8, %v1941_v58, %v1937_v46  ;;  %v856_v23 = vpack.c.b8 %v855_v5, %v855_v5  ;;  %vm1027_vm0 = vweird.f32 %v5736_v18  ;;  %v1176_v58 = vld [vmem:[%s4797_s19] sm:$0xff]  ;;  %vm887_vm7 = vnez %v854_v63  ;;  %8944 = vst [vmem:[#allocation26_spill] sm:$0xff] %v5789_v61 }
  0xf5   : > { %vm5761_vm2 = vcmp.ne.s32.totalorder %v935_v7, 0  ;;  %vm5765_vm4 = vcmp.ne.s32.totalorder %v936_v59, 0  ;;  %v5778_v27 = vor.u32 1.1754944e-38, %v1033_v25  ;;  %v1179_v62 = vsel %vm1175_vm1, 16843009, %v8676_v50  ;;  %8945 = vst [vmem:[#allocation27_spill] sm:$0xff] %v5792_v53 }
  0xf6   : > { %v999_v41 = vsel %vm5761_vm2, %v5745_v20, 0.0  ;;  %v1000_v22 = vsel %vm5765_vm4, %v5748_v38, 0.0  ;;  %vm888_vm6 = vnez %v856_v23  ;;  %vm5782_vm15 = vcmp.eq.f32.partialorder %v1031_v3, 8.507059e+37  ;;  %v739_v63 = vld [vmem:[%s4795_s11 + $0x10] sm:$0xff]  ;;  %v5828_v3 = vld [vmem:[%s4786_s27 + $0x60] sm:$0xff] }
  0xf7   : > { %v919_v52 = vsel %vm887_vm7, 16843009, %v8676_v50  ;;  %v920_v30 = vsel %vm888_vm6, 16843009, %v8676_v50  ;;  %v1180_v5 = vunpack.c.0.s8 %v1178_v9  ;;  %v1181_v60 = vunpack.c.0.s8 %v1179_v62  ;;  %8950 = vst [vmem:[#allocation28_spill] sm:$0xff] %v5828_v3 }
  0xf8   : > { %v4094_v14 = vpop.eup %4093  ;;  %v951_v37 = vunpack.c.0.s8 %v919_v52  ;;  %v952_v7 = vunpack.c.0.s8 %v920_v30  ;;  %v3724_v48 = vpack.c.bf16 %v1177_v19, %v1176_v58  ;;  %v773_v59 = vunpack.c.0.s8 %v5703_v17 }
  0xf9   : > { %v1023_v46 = vmul.f32 %v4094_v14, %v5736_v18  ;;  %vm1028_vm5 = vweird.f32 %v4094_v14  ;;  %vm1182_vm8 = vcmp.ne.s32.totalorder %v1180_v5, 0  ;;  %vm1183_vm12 = vcmp.ne.s32.totalorder %v1181_v60, 0 }
  0xfa   : > { %vm5796_vm13 = vcmp.ne.s32.totalorder %v951_v37, 0  ;;  %vm984_vm10 = vcmp.ne.s32.totalorder %v952_v7, 0  ;;  %v774_v9 = vunpack.c.1.s8 %v5703_v17  ;;  %v817_v25 = vpack.c.b16 %v773_v59, %v773_v59  ;;  %vm3723_vm9 = vmpackc.low %vm1183_vm12, %vm1182_vm8  ;;  %v5823_v7 = vld [vmem:[%s4795_s11 + $0x30] sm:$0xff] }
  0xfb   : > { %v1024_v34 = vsub.f32 1.0, %v1023_v46  ;;  %v1015_v21 = vsel %vm5796_vm13, %v5789_v61, 0.0  ;;  %v1016_v23 = vsel %vm984_vm10, %v5792_v53, 0.0  ;;  %v789_v58 = vunpack.c.0.s8 %v5711_v15  ;;  %3725 = vmatpush.bf16.msk.msra.mxu0 %vm3723_vm9, %v3724_v48  ;;  %vm5815_vm3 = vmor %vm1027_vm0, %vm1028_vm5 }
  0xfc   : > { %v5807_v19 = vpack.c.bf16 %v1000_v22, %v999_v41  ;;  %v818_v62 = vpack.c.b8 %v817_v25, %v817_v25  ;;  %v819_v52 = vpack.c.b16 %v774_v9, %v774_v9  ;;  %v790_v17 = vunpack.c.1.s8 %v5711_v15 }
  0xfd   : > { %v1025_v30 = vmul.f32 %v4094_v14, %v1024_v34  ;;  %v5810_v5 = vpack.c.bf16 %v1016_v23, %v1015_v21  ;;  %v849_v60 = vpack.c.b16 %v789_v58, %v789_v58  ;;  %vm747_vm1 = vnez %v739_v63  ;;  %v719_v34 = vld [vmem:[%s4802_s23 + $0x70] sm:$0xff]  ;;  %v720_v21 = vld [vmem:[%s4802_s23 + $0x78] sm:$0xff] }
  0xfe   : > { %v820_v41 = vpack.c.b8 %v819_v52, %v819_v52  ;;  %vm869_vm14 = vnez %v818_v62  ;;  %v851_v22 = vpack.c.b16 %v790_v17, %v790_v17  ;;  %v5820_v15 = vsel %vm747_vm1, 16843009, %v8676_v50  ;;  %v735_v58 = vld [vmem:[%s4802_s23 + $0xf0] sm:$0xff] }
  0xff   : > { %v1026_v48 = vadd.f32 %v4094_v14, %v1025_v30  ;;  %v901_v59 = vsel %vm869_vm14, 16843009, %v8676_v50  ;;  %v850_v46 = vpack.c.b8 %v849_v60, %v849_v60  ;;  %v771_v18 = vunpack.c.2.s8 %v5820_v15  ;;  %v736_v30 = vld [vmem:[%s4802_s23 + $0xf8] sm:$0xff]  ;;  %v5843_v60 = vld [vmem:[%s4786_s27 + $0x68] sm:$0xff] }
 0x100   : > { %vm870_vm11 = vnez %v820_v41  ;;  %v933_v9 = vunpack.c.0.s8 %v901_v59  ;;  %v852_v25 = vpack.c.b8 %v851_v22, %v851_v22  ;;  %v772_v63 = vunpack.c.3.s8 %v5820_v15  ;;  %8951 = vst [vmem:[#allocation29_spill] sm:$0xff] %v5843_v60  ;;  %v717_v41 = vld [vmem:[%s4802_s23 + $0x60] sm:$0xff]  ;;  %v718_v59 = vld [vmem:[%s4802_s23 + $0x68] sm:$0xff] }
 0x101   : > { %v1030_v23 = vsel %vm5815_vm3, %v4094_v14, %v1026_v48  ;;  %v902_v62 = vsel %vm870_vm11, 16843009, %v8676_v50  ;;  %vm885_vm2 = vnez %v850_v46  ;;  %v813_v52 = vpack.c.b16 %v771_v18, %v771_v18  ;;  %v733_v18 = vld [vmem:[%s4802_s23 + $0xe0] sm:$0xff] }
 0x102   : > { %vm751_vm4 = vnez %v5823_v7  ;;  %v1035_v17 = vsel %vm5782_vm15, %v5778_v27, %v1030_v23  ;;  %v934_v22 = vunpack.c.0.s8 %v902_v62  ;;  %vm5846_vm0 = vcmp.ne.s32.totalorder %v933_v9, 0 }
 0x103   : > { %vm886_vm7 = vnez %v852_v25  ;;  %v5850_v14 = vperm.slane %v1035_v17, 0  ;;  %v1104_v48 = vsub.f32 1.0, %v1035_v17  ;;  %v997_v46 = vsel %vm5846_vm0, %v5828_v3, 0.0 }
 0x104   : > { %v917_v27 = vsel %vm885_vm2, 16843009, %v8676_v50  ;;  %vm5857_vm6 = vcmp.ne.s32.totalorder %v934_v22, 0  ;;  %v918_v9 = vsel %vm886_vm7, 16843009, %v8676_v50  ;;  %v814_v23 = vpack.c.b8 %v813_v52, %v813_v52  ;;  %v5875_v52 = vld [vmem:[%s4786_s27 + $0xe0] sm:$0xff] }
 0x105   : > { %v949_v25 = vunpack.c.0.s8 %v917_v27  ;;  %vm1054_vm15 = vcmp.gt.f32.partialorder %v719_v34, %v5850_v14  ;;  %vm1055_vm5 = vcmp.gt.f32.partialorder %v720_v21, %v5850_v14  ;;  %vm1070_vm8 = vcmp.gt.f32.partialorder %v735_v58, %v5850_v14  ;;  %8956 = vst [vmem:[#allocation30_spill] sm:$0xff] %v5875_v52  ;;  %v734_v22 = vld [vmem:[%s4802_s23 + $0xe8] sm:$0xff]  ;;  %v5880_v27 = vld [vmem:[%s4786_s27 + $0xe8] sm:$0xff] }
 0x106   : > { %vm1071_vm12 = vcmp.gt.f32.partialorder %v736_v30, %v5850_v14  ;;  %vm3727_vm13 = vmpackc.low %vm1055_vm5, %vm1054_vm15  ;;  %v5867_v62 = vperm.slane %v1104_v48, 0  ;;  %v998_v17 = vsel %vm5857_vm6, %v5843_v60, 0.0  ;;  %vm1052_vm10 = vcmp.gt.f32.partialorder %v717_v41, %v5850_v14  ;;  %8957 = vst [vmem:[#allocation31_spill] sm:$0xff] %v5880_v27  ;;  %v6195_v60 = vld [vmem:[%s4802_s23 + $0xa0] sm:$0xff] }
 0x107   : > { %vm1053_vm9 = vcmp.gt.f32.partialorder %v718_v59, %v5850_v14  ;;  %3729 = vmatpush.bf16.msk.msra.mxu1 %vm3727_vm13, %v5807_v19  ;;  %vm3751_vm1 = vmpackc.low %vm1071_vm12, %vm1070_vm8  ;;  %v3731_v37 = vpack.c.bf16 %v998_v17, %v997_v46  ;;  %v950_v48 = vunpack.c.0.s8 %v918_v9  ;;  %vm5882_vm3 = vcmp.ne.s32.totalorder %v949_v25, 0  ;;  %v5956_v46 = vld [vmem:[%s4802_s23 + $0x40] sm:$0xff] }
 0x108   : > { %vm1068_vm14 = vcmp.gt.f32.partialorder %v733_v18, %v5850_v14  ;;  %3753 = vmatpush.bf16.msk.msra.mxu2 %vm3751_vm1, %v5810_v5  ;;  %vm1122_vm11 = vcmp.gt.f32.partialorder %v719_v34, %v5867_v62  ;;  %vm1123_vm2 = vcmp.gt.f32.partialorder %v720_v21, %v5867_v62  ;;  %vm1138_vm0 = vcmp.gt.f32.partialorder %v735_v58, %v5867_v62  ;;  %vm3730_vm6 = vmpackc.low %vm1053_vm9, %vm1052_vm10  ;;  %v715_v21 = vld [vmem:[%s4802_s23 + $0x50] sm:$0xff]  ;;  %v716_v58 = vld [vmem:[%s4802_s23 + $0x58] sm:$0xff] }
 0x109   : > { %vm1139_vm7 = vcmp.gt.f32.partialorder %v736_v30, %v5867_v62  ;;  %vm3776_vm15 = vmpackc.low %vm1123_vm2, %vm1122_vm11  ;;  %vm5896_vm5 = vcmp.ne.s32.totalorder %v950_v48, 0  ;;  %v1013_v34 = vsel %vm5882_vm3, %v5875_v52, 0.0  ;;  %vm1069_vm8 = vcmp.gt.f32.partialorder %v734_v22, %v5850_v14 }
 0x10a   : > { %vm1120_vm12 = vcmp.gt.f32.partialorder %v717_v41, %v5867_v62  ;;  %3778 = vmatpush.bf16.msk.msra.mxu3 %vm3776_vm15, %v5807_v19  ;;  %vm3800_vm13 = vmpackc.low %vm1139_vm7, %vm1138_vm0  ;;  %v1014_v30 = vsel %vm5896_vm5, %v5880_v27, 0.0  ;;  %vm1121_vm10 = vcmp.gt.f32.partialorder %v718_v59, %v5867_v62  ;;  %vm1136_vm9 = vcmp.gt.f32.partialorder %v733_v18, %v5867_v62  ;;  %v5924_v59 = vld [vmem:[%s4802_s23 + $0xd8] sm:$0xff] }
 0x10b   : > { %vm1137_vm1 = vcmp.gt.f32.partialorder %v734_v22, %v5867_v62  ;;  %3802 = vmatpush.bf16.msk.msrb.mxu0 %vm3800_vm13, %v5810_v5  ;;  %3732 = vmatpush.bf16.msk.msra.mxu1 %vm3730_vm6, %v3731_v37  ;;  %vm3754_vm3 = vmpackc.low %vm1069_vm8, %vm1068_vm14  ;;  %v3755_v50 = vpack.c.bf16 %v1014_v30, %v1013_v34  ;;  %v815_v19 = vpack.c.b16 %v772_v63, %v772_v63  ;;  %v8962_v9 = vmov 0   ;;  %v5941_v63 = vld [vmem:[%s4786_s27 + $0x50] sm:$0xff] }
 0x10c   : > { %vm867_vm11 = vnez %v814_v23  ;;  %vm3779_vm2 = vmpackc.low %vm1121_vm10, %vm1120_vm12  ;;  %vm1050_vm0 = vcmp.gt.f32.partialorder %v715_v21, %v5850_v14  ;;  %vm1051_vm7 = vcmp.gt.f32.partialorder %v716_v58, %v5850_v14  ;;  %v5934_v5 = vsel %vm751_vm4, 16843009, %v8962_v9 }
 0x10d   : > { %v899_v25 = vsel %vm867_vm11, 16843009, %v8962_v9  ;;  %3756 = vmatpush.bf16.msk.msra.mxu2 %vm3754_vm3, %v3755_v50  ;;  %vm3803_vm14 = vmpackc.low %vm1137_vm1, %vm1136_vm9  ;;  %v816_v41 = vpack.c.b8 %v815_v19, %v815_v19  ;;  %v787_v17 = vunpack.c.2.s8 %v5934_v5  ;;  %v788_v48 = vunpack.c.3.s8 %v5934_v5 }
 0x10e   : > { %v931_v23 = vunpack.c.0.s8 %v899_v25  ;;  %3781 = vmatpush.bf16.msk.msra.mxu3 %vm3779_vm2, %v3731_v37  ;;  %vm1066_vm4 = vcmp.gt.f32.partialorder %v5921_v29, %v5850_v14  ;;  %vm1067_vm6 = vcmp.gt.f32.partialorder %v5924_v59, %v5850_v14  ;;  %vm1118_vm15 = vcmp.gt.f32.partialorder %v715_v21, %v5867_v62  ;;  %vm5978_vm3 = vmpackc.low %vm1051_vm7, %vm1050_vm0 }
 0x10f   : > { %vm1119_vm5 = vcmp.gt.f32.partialorder %v716_v58, %v5867_v62  ;;  %3805 = vmatpush.bf16.msk.msrb.mxu0 %vm3803_vm14, %v3755_v50  ;;  %vm868_vm8 = vnez %v816_v41  ;;  %v845_v18 = vpack.c.b16 %v787_v17, %v787_v17  ;;  %v847_v22 = vpack.c.b16 %v788_v48, %v788_v48  ;;  %v5966_v50 = vld [vmem:[%s4786_s27 + $0x58] sm:$0xff] }
 0x110   : > { %vm5951_vm12 = vcmp.ne.s32.totalorder %v931_v23, 0  ;;  %v900_v37 = vsel %vm868_vm8, 16843009, %v8962_v9  ;;  %vm1134_vm13 = vcmp.gt.f32.partialorder %v5921_v29, %v5867_v62  ;;  %v769_v30 = vunpack.c.0.s8 %v5820_v15  ;;  %8965 = vst [vmem:[#allocation32_spill] sm:$0xff] %v5966_v50  ;;  %vm5990_vm14 = vmpackc.low %vm1119_vm5, %vm1118_vm15 }
 0x111   : > { %v995_v34 = vsel %vm5951_vm12, %v5941_v63, 0.0  ;;  %v932_v19 = vunpack.c.0.s8 %v900_v37  ;;  %v846_v25 = vpack.c.b8 %v845_v18, %v845_v18  ;;  %v848_v41 = vpack.c.b8 %v847_v22, %v847_v22  ;;  %vm6010_vm8 = vmpackc.low %vm1067_vm6, %vm1066_vm4 }
 0x112   : > { %v770_v23 = vunpack.c.1.s8 %v5820_v15  ;;  %vm1135_vm10 = vcmp.gt.f32.partialorder %v5924_v59, %v5867_v62  ;;  %v809_v17 = vpack.c.b16 %v769_v30, %v769_v30  ;;  %vm1048_vm9 = vcmp.gt.f32.partialorder %v5956_v46, %v5850_v14  ;;  %v714_v15 = vld [vmem:[%s4802_s23 + $0x48] sm:$0xff]  ;;  %v6095_v59 = vld [vmem:[%s4786_s27 + $0xc8] sm:$0xff] }
 0x113   : > { %v785_v48 = vunpack.c.0.s8 %v5934_v5  ;;  %vm964_vm1 = vcmp.ne.s32.totalorder %v932_v19, 0  ;;  %vm883_vm11 = vnez %v846_v25  ;;  %vm884_vm2 = vnez %v848_v41  ;;  %v5995_v25 = vld [vmem:[%s4786_s27 + $0xd0] sm:$0xff]  ;;  %v5998_v41 = vld [vmem:[%s4786_s27 + $0xd8] sm:$0xff]  ;;  %vm6025_vm4 = vmpackc.low %vm1135_vm10, %vm1134_vm13  ;;  %8983 = vst [vmem:[#allocation36_spill] sm:$0xff] %v6095_v59 }
 0x114   : > { %v811_v18 = vpack.c.b16 %v770_v23, %v770_v23  ;;  %v996_v22 = vsel %vm964_vm1, %v5966_v50, 0.0  ;;  %v915_v37 = vsel %vm883_vm11, 16843009, %v8962_v9  ;;  %v916_v30 = vsel %vm884_vm2, 16843009, %v8962_v9  ;;  %8970 = vst [vmem:[#allocation33_spill] sm:$0xff] %v5995_v25 }
 0x115   : > { %v810_v53 = vpack.c.b8 %v809_v17, %v809_v17  ;;  %v3734_v61 = vpack.c.bf16 %v996_v22, %v995_v34  ;;  %8971 = vst [vmem:[#allocation34_spill] sm:$0xff] %v5998_v41  ;;  %v947_v23 = vunpack.c.0.s8 %v915_v37  ;;  %v948_v27 = vunpack.c.0.s8 %v916_v30  ;;  %v729_v37 = vld [vmem:[%s4802_s23 + $0xc0] sm:$0xff]  ;;  %v730_v30 = vld [vmem:[%s4802_s23 + $0xc8] sm:$0xff] }
 0x116   : > { %v812_v52 = vpack.c.b8 %v811_v18, %v811_v18  ;;  %vm1049_vm7 = vcmp.gt.f32.partialorder %v714_v15, %v5850_v14  ;;  %v786_v21 = vunpack.c.1.s8 %v5934_v5  ;;  %v841_v58 = vpack.c.b16 %v785_v48, %v785_v48  ;;  %v6030_v48 = vld [vmem:[%s4786_s27 + $0x40] sm:$0xff]  ;;  %v6034_v18 = vld [vmem:[%s4786_s27 + $0x48] sm:$0xff] }
 0x117   : > { %vm865_vm0 = vnez %v810_v53  ;;  %3735 = vmatpush.bf16.msk.msra.mxu1 %vm5978_vm3, %v3734_v61  ;;  %vm979_vm15 = vcmp.ne.s32.totalorder %v947_v23, 0  ;;  %vm980_vm5 = vcmp.ne.s32.totalorder %v948_v27, 0  ;;  %3784 = vmatpush.bf16.msk.msra.mxu3 %vm5990_vm14, %v3734_v61  ;;  %vm1116_vm13 = vcmp.gt.f32.partialorder %v5956_v46, %v5867_v62  ;;  %v738_v23 = vld [vmem:[%s4795_s11 + $0x8] sm:$0xff]  ;;  %vm6058_vm3 = vmpackc.low %vm1049_vm7, %vm1048_vm9 }
 0x118   : > { %vm866_vm12 = vnez %v812_v52  ;;  %v897_v5 = vsel %vm865_vm0, 16843009, %v8962_v9  ;;  %v1011_v34 = vsel %vm979_vm15, %v5995_v25, 0.0  ;;  %v1012_v27 = vsel %vm980_vm5, %v5998_v41, 0.0 }
 0x119   : > { %v898_v61 = vsel %vm866_vm12, 16843009, %v8962_v9  ;;  %v929_v52 = vunpack.c.0.s8 %v897_v5  ;;  %v3758_v7 = vpack.c.bf16 %v1012_v27, %v1011_v34  ;;  %v842_v29 = vpack.c.b8 %v841_v58, %v841_v58  ;;  %v6064_v34 = vld [vmem:[%s4786_s27 + $0xc0] sm:$0xff] }
 0x11a   : > { %v930_v22 = vunpack.c.0.s8 %v898_v61  ;;  %v843_v19 = vpack.c.b16 %v786_v21, %v786_v21  ;;  %vm1117_vm10 = vcmp.gt.f32.partialorder %v714_v15, %v5867_v62  ;;  %8980 = vst [vmem:[#allocation35_spill] sm:$0xff] %v6064_v34  ;;  %vm1064_vm2 = vcmp.gt.f32.partialorder %v729_v37, %v5850_v14  ;;  %v1190_v58 = vld [vmem:[%s8650_s1] sm:$0xff]  ;;  %v6154_v15 = vld [vmem:[%s4786_s27 + $0x30] sm:$0xff] }
 0x11b   : > { %vm6038_vm6 = vcmp.ne.s32.totalorder %v929_v52, 0  ;;  %3759 = vmatpush.bf16.msk.msra.mxu2 %vm6010_vm8, %v3758_v7  ;;  %3808 = vmatpush.bf16.msk.msrb.mxu0 %vm6025_vm4, %v3758_v7  ;;  %vm881_vm11 = vnez %v842_v29  ;;  %vm1065_vm14 = vcmp.gt.f32.partialorder %v730_v30, %v5850_v14  ;;  %vm6072_vm9 = vmpackc.low %vm1117_vm10, %vm1116_vm13  ;;  %v6077_v52 = vld [vmem:[%s4802_s23 + $0x30] sm:$0xff]  ;;  %v6080_v7 = vld [vmem:[%s4802_s23 + $0x38] sm:$0xff]  ;;  %vm746_vm7 = vnez %v738_v23 }
 0x11c   : > { %vm962_vm1 = vcmp.ne.s32.totalorder %v930_v22, 0  ;;  %v993_v21 = vsel %vm6038_vm6, %v6030_v48, 0.0  ;;  %v844_v53 = vpack.c.b8 %v843_v19, %v843_v19  ;;  %v913_v27 = vsel %vm881_vm11, 16843009, %v8962_v9  ;;  %v742_v22 = vld [vmem:[%s4795_s11 + $0x28] sm:$0xff]  ;;  %v6090_v19 = vld [vmem:[%s4802_s23 + $0xb0] sm:$0xff]  ;;  %vm6119_vm10 = vmpackc.low %vm1065_vm14, %vm1064_vm2 }
 0x11d   : > { %v994_v5 = vsel %vm962_vm1, %v6034_v18, 0.0  ;;  %v945_v61 = vunpack.c.0.s8 %v913_v27  ;;  %vm1132_vm15 = vcmp.gt.f32.partialorder %v729_v37, %v5867_v62  ;;  %vm1133_vm5 = vcmp.gt.f32.partialorder %v730_v30, %v5867_v62  ;;  %v6149_v37 = vld [vmem:[%s4802_s23 + $0x20] sm:$0xff] }
 0x11e   : > { %v3737_v17 = vpack.c.bf16 %v994_v5, %v993_v21  ;;  %vm882_vm0 = vnez %v844_v53  ;;  %v6087_v46 = vsel %vm746_vm7, 16843009, %v8962_v9  ;;  %vm1046_vm12 = vcmp.gt.f32.partialorder %v6077_v52, %v5850_v14 }
 0x11f   : > { %v914_v29 = vsel %vm882_vm0, 16843009, %v8962_v9  ;;  %vm6097_vm8 = vcmp.ne.s32.totalorder %v945_v61, 0  ;;  %v767_v53 = vunpack.c.2.s8 %v6087_v46  ;;  %v768_v5 = vunpack.c.3.s8 %v6087_v46 }
 0x120   : > { %3738 = vmatpush.bf16.msk.msra.mxu1 %vm6058_vm3, %v3737_v17  ;;  %v946_v21 = vunpack.c.0.s8 %v914_v29  ;;  %3787 = vmatpush.bf16.msk.msra.mxu3 %vm6072_vm9, %v3737_v17  ;;  %v1009_v27 = vsel %vm6097_vm8, %v6064_v34, 0.0  ;;  %vm1047_vm4 = vcmp.gt.f32.partialorder %v6080_v7, %v5850_v14  ;;  %vm750_vm6 = vnez %v742_v22  ;;  %v6124_v29 = vld [vmem:[%s4802_s23 + $0xb8] sm:$0xff]  ;;  %vm3809_vm3 = vmpackc.low %vm1133_vm5, %vm1132_vm15 }
 0x121   : > { %v805_v17 = vpack.c.b16 %v767_v53, %v767_v53  ;;  %v807_v61 = vpack.c.b16 %v768_v5, %v768_v5  ;;  %v6127_v23 = vsel %vm750_vm6, 16843009, %v8962_v9  ;;  %vm1062_vm1 = vcmp.gt.f32.partialorder %v6090_v19, %v5850_v14 }
 0x122   : > { %vm978_vm13 = vcmp.ne.s32.totalorder %v946_v21, 0  ;;  %v783_v21 = vunpack.c.2.s8 %v6127_v23  ;;  %v784_v53 = vunpack.c.3.s8 %v6127_v23  ;;  %v1191_v5 = vpack.c.bf16 %v1190_v58, %v1190_v58 }
 0x123   : > { %v1010_v22 = vsel %vm978_vm13, %v6095_v59, 0.0  ;;  %v806_v25 = vpack.c.b8 %v805_v17, %v805_v17  ;;  %v808_v34 = vpack.c.b8 %v807_v61, %v807_v61  ;;  %vm1193_vm11 = vcmask 130048  }
 0x124   : > { %v3761_v41 = vpack.c.bf16 %v1010_v22, %v1009_v27  ;;  %v837_v38 = vpack.c.b16 %v783_v21, %v783_v21  ;;  %v839_v20 = vpack.c.b16 %v784_v53, %v784_v53  ;;  %vm1063_vm2 = vcmp.gt.f32.partialorder %v6124_v29, %v5850_v14  ;;  %3726 = vmatmul.msk.bf16.vlgmr.msra.gmra.mxu0 %vm1193_vm11, %v1191_v5  ;;  %v6164_v21 = vld [vmem:[%s4802_s23 + $0x28] sm:$0xff]  ;;  %vm6174_vm11 = vmpackc.low %vm1047_vm4, %vm1046_vm12 }
 0x125   : > { %vm1114_vm14 = vcmp.gt.f32.partialorder %v6077_v52, %v5867_v62  ;;  %vm863_vm9 = vnez %v806_v25  ;;  %vm864_vm0 = vnez %v808_v34  ;;  %vm1115_vm7 = vcmp.gt.f32.partialorder %v6080_v7, %v5867_v62  ;;  %v6211_v7 = vld [vmem:[%s4802_s23 + $0xa8] sm:$0xff]  ;;  %v6246_v52 = vld [vmem:[%s4786_s27 + $0xa0] sm:$0xff] }
 0x126   : > { %3762 = vmatpush.bf16.msk.msra.mxu2 %vm6119_vm10, %v3761_v41  ;;  %3811 = vmatpush.bf16.msk.msrb.mxu0 %vm3809_vm3, %v3761_v41  ;;  %vm1130_vm15 = vcmp.gt.f32.partialorder %v6090_v19, %v5867_v62  ;;  %v895_v30 = vsel %vm863_vm9, 16843009, %v8962_v9  ;;  %v896_v58 = vsel %vm864_vm0, 16843009, %v8962_v9  ;;  %v838_v27 = vpack.c.b8 %v837_v38, %v837_v38  ;;  %v6157_v41 = vld [vmem:[%s4786_s27 + $0x38] sm:$0xff]  ;;  %vm3788_vm12 = vmpackc.low %vm1115_vm7, %vm1114_vm14  ;;  %v737_v19 = vld [vmem:[%s4795_s11] sm:$0xff] }
 0x127   : > { %v840_v17 = vpack.c.b8 %v839_v20, %v839_v20  ;;  %v927_v25 = vunpack.c.0.s8 %v895_v30  ;;  %v928_v34 = vunpack.c.0.s8 %v896_v58  ;;  %v765_v61 = vunpack.c.0.s8 %v6087_v46  ;;  %v6183_v30 = vld [vmem:[%s4786_s27 + $0xb0] sm:$0xff]  ;;  %v6186_v58 = vld [vmem:[%s4786_s27 + $0xb8] sm:$0xff]  ;;  %vm6204_vm0 = vmpackc.low %vm1063_vm2, %vm1062_vm1  ;;  %8994 = vst [vmem:[#allocation39_spill] sm:$0xff] %v6246_v52 }
 0x128   : > { %v766_v22 = vunpack.c.1.s8 %v6087_v46  ;;  %vm879_vm5 = vnez %v838_v27  ;;  %vm1131_vm6 = vcmp.gt.f32.partialorder %v6124_v29, %v5867_v62  ;;  %vm1044_vm13 = vcmp.gt.f32.partialorder %v6149_v37, %v5850_v14  ;;  %8990 = vst [vmem:[#allocation37_spill] sm:$0xff] %v6183_v30 }
 0x129   : > { %vm880_vm8 = vnez %v840_v17  ;;  %vm959_vm10 = vcmp.ne.s32.totalorder %v927_v25, 0  ;;  %vm960_vm3 = vcmp.ne.s32.totalorder %v928_v34, 0  ;;  %v911_v38 = vsel %vm879_vm5, 16843009, %v8962_v9  ;;  %8991 = vst [vmem:[#allocation38_spill] sm:$0xff] %v6186_v58  ;;  %vm3812_vm1 = vmpackc.low %vm1131_vm6, %vm1130_vm15 }
 0x12a   : > { %v912_v46 = vsel %vm880_vm8, 16843009, %v8962_v9  ;;  %v991_v53 = vsel %vm959_vm10, %v6154_v15, 0.0  ;;  %v992_v5 = vsel %vm960_vm3, %v6157_v41, 0.0  ;;  %v943_v27 = vunpack.c.0.s8 %v911_v38 }
 0x12b   : > { %v944_v17 = vunpack.c.0.s8 %v912_v46  ;;  %v3740_v25 = vpack.c.bf16 %v992_v5, %v991_v53  ;;  %v801_v34 = vpack.c.b16 %v765_v61, %v765_v61  ;;  %v803_v59 = vpack.c.b16 %v766_v22, %v766_v22 }
 0x12c   : > { %v781_v3 = vunpack.c.0.s8 %v6127_v23  ;;  %vm975_vm4 = vcmp.ne.s32.totalorder %v943_v27, 0  ;;  %vm1045_vm14 = vcmp.gt.f32.partialorder %v6164_v21, %v5850_v14  ;;  %v782_v61 = vunpack.c.1.s8 %v6127_v23 }
 0x12d   : > { %vm976_vm9 = vcmp.ne.s32.totalorder %v944_v17, 0  ;;  %3741 = vmatpush.bf16.msk.msra.mxu1 %vm6174_vm11, %v3740_v25  ;;  %v1007_v22 = vsel %vm975_vm4, %v6183_v30, 0.0  ;;  %3790 = vmatpush.bf16.msk.msra.mxu3 %vm3788_vm12, %v3740_v25  ;;  %v802_v46 = vpack.c.b8 %v801_v34, %v801_v34  ;;  %v804_v53 = vpack.c.b8 %v803_v59, %v803_v59  ;;  %v6236_v17 = vld [vmem:[%s4786_s27 + $0x20] sm:$0xff]  ;;  %v6239_v25 = vld [vmem:[%s4786_s27 + $0x28] sm:$0xff] }
 0x12e   : > { %v1008_v38 = vsel %vm976_vm9, %v6186_v58, 0.0  ;;  %v833_v20 = vpack.c.b16 %v781_v3, %v781_v3  ;;  %v835_v5 = vpack.c.b16 %v782_v61, %v782_v61  ;;  %vm1060_vm2 = vcmp.gt.f32.partialorder %v6195_v60, %v5850_v14 }
 0x12f   : > { %v3764_v23 = vpack.c.bf16 %v1008_v38, %v1007_v22  ;;  %vm861_vm7 = vnez %v802_v46  ;;  %vm862_vm5 = vnez %v804_v53  ;;  %vm1061_vm8 = vcmp.gt.f32.partialorder %v6211_v7, %v5850_v14  ;;  %v6251_v22 = vld [vmem:[%s4802_s23 + $0x10] sm:$0xff]  ;;  %v741_v38 = vld [vmem:[%s4795_s11 + $0x20] sm:$0xff] }
 0x130   : > { %vm1112_vm10 = vcmp.gt.f32.partialorder %v6149_v37, %v5867_v62  ;;  %v893_v3 = vsel %vm861_vm7, 16843009, %v8962_v9  ;;  %v894_v59 = vsel %vm862_vm5, 16843009, %v8962_v9  ;;  %v834_v29 = vpack.c.b8 %v833_v20, %v833_v20  ;;  %v6337_v37 = vld [vmem:[%s4802_s23] sm:$0xff] }
 0x131   : > { %3765 = vmatpush.bf16.msk.msra.mxu2 %vm6204_vm0, %v3764_v23  ;;  %3814 = vmatpush.bf16.msk.msrb.mxu0 %vm3812_vm1, %v3764_v23  ;;  %v836_v27 = vpack.c.b8 %v835_v5, %v835_v5  ;;  %v925_v34 = vunpack.c.0.s8 %v893_v3  ;;  %v926_v61 = vunpack.c.0.s8 %v894_v59  ;;  %vm1113_vm15 = vcmp.gt.f32.partialorder %v6164_v21, %v5867_v62  ;;  %vm6260_vm1 = vmpackc.low %vm1045_vm14, %vm1044_vm13 }
 0x132   : > { %vm1128_vm6 = vcmp.gt.f32.partialorder %v6195_v60, %v5867_v62  ;;  %vm877_vm3 = vnez %v834_v29  ;;  %vm1129_vm12 = vcmp.gt.f32.partialorder %v6211_v7, %v5867_v62  ;;  %vm745_vm4 = vnez %v737_v19  ;;  %v6269_v19 = vld [vmem:[%s4786_s27 + $0xa8] sm:$0xff]  ;;  %vm6277_vm13 = vmpackc.low %vm1113_vm15, %vm1112_vm10 }
 0x133   : > { %vm878_vm11 = vnez %v836_v27  ;;  %vm957_vm9 = vcmp.ne.s32.totalorder %v925_v34, 0  ;;  %vm958_vm0 = vcmp.ne.s32.totalorder %v926_v61, 0  ;;  %v909_v53 = vsel %vm877_vm3, 16843009, %v8962_v9  ;;  %8997 = vst [vmem:[#allocation40_spill] sm:$0xff] %v6269_v19  ;;  %v6282_v27 = vld [vmem:[%s4802_s23 + $0x18] sm:$0xff]  ;;  %vm6296_vm10 = vmpackc.low %vm1061_vm8, %vm1060_vm2 }
 0x134   : > { %v910_v23 = vsel %vm878_vm11, 16843009, %v8962_v9  ;;  %v989_v20 = vsel %vm957_vm9, %v6236_v17, 0.0  ;;  %v990_v5 = vsel %vm958_vm0, %v6239_v25, 0.0  ;;  %v941_v3 = vunpack.c.0.s8 %v909_v53  ;;  %v6288_v53 = vld [vmem:[%s4802_s23 + $0x90] sm:$0xff]  ;;  %vm3815_vm2 = vmpackc.low %vm1129_vm12, %vm1128_vm6 }
 0x135   : > { %v942_v59 = vunpack.c.0.s8 %v910_v23  ;;  %v3743_v34 = vpack.c.bf16 %v990_v5, %v989_v20  ;;  %v753_v61 = vsel %vm745_vm4, 16843009, %v8962_v9  ;;  %vm1042_vm14 = vcmp.gt.f32.partialorder %v6251_v22, %v5850_v14  ;;  %v6301_v20 = vld [vmem:[%s4802_s23 + $0x98] sm:$0xff] }
 0x136   : > { %vm749_vm7 = vnez %v741_v38  ;;  %vm973_vm5 = vcmp.ne.s32.totalorder %v941_v3, 0  ;;  %v763_v21 = vunpack.c.2.s8 %v753_v61  ;;  %v764_v23 = vunpack.c.3.s8 %v753_v61 }
 0x137   : > { %vm974_vm3 = vcmp.ne.s32.totalorder %v942_v59, 0  ;;  %3744 = vmatpush.bf16.msk.msra.mxu1 %vm6260_vm1, %v3743_v34  ;;  %v1005_v38 = vsel %vm973_vm5, %v6246_v52, 0.0  ;;  %3793 = vmatpush.bf16.msk.msra.mxu3 %vm6277_vm13, %v3743_v34  ;;  %vm1043_vm8 = vcmp.gt.f32.partialorder %v6282_v27, %v5850_v14  ;;  %v6318_v46 = vsel %vm749_vm7, 16843009, %v8962_v9  ;;  %v6345_v52 = vld [vmem:[%s4786_s27 + $0x18] sm:$0xff] }
 0x138   : > { %v1006_v5 = vsel %vm974_vm3, %v6269_v19, 0.0  ;;  %v797_v59 = vpack.c.b16 %v763_v21, %v763_v21  ;;  %v799_v58 = vpack.c.b16 %v764_v23, %v764_v23  ;;  %v779_v30 = vunpack.c.2.s8 %v6318_v46  ;;  %v6342_v19 = vld [vmem:[%s4786_s27 + $0x10] sm:$0xff] }
 0x139   : > { %v3767_v3 = vpack.c.bf16 %v1006_v5, %v1005_v38  ;;  %vm1058_vm15 = vcmp.gt.f32.partialorder %v6288_v53, %v5850_v14  ;;  %v780_v60 = vunpack.c.3.s8 %v6318_v46  ;;  %vm1059_vm11 = vcmp.gt.f32.partialorder %v6301_v20, %v5850_v14 }
 0x13a   : > { %vm1110_vm6 = vcmp.gt.f32.partialorder %v6251_v22, %v5867_v62  ;;  %vm1111_vm12 = vcmp.gt.f32.partialorder %v6282_v27, %v5867_v62  ;;  %v798_v7 = vpack.c.b8 %v797_v59, %v797_v59  ;;  %v800_v29 = vpack.c.b8 %v799_v58, %v799_v58  ;;  %v721_v27 = vld [vmem:[%s4802_s23 + $0x80] sm:$0xff] }
 0x13b   : > { %3768 = vmatpush.bf16.msk.msra.mxu2 %vm6296_vm10, %v3767_v3  ;;  %3817 = vmatpush.bf16.msk.msrb.mxu0 %vm3815_vm2, %v3767_v3  ;;  %v829_v34 = vpack.c.b16 %v779_v30, %v779_v30  ;;  %v761_v21 = vunpack.c.0.s8 %v753_v61  ;;  %v831_v23 = vpack.c.b16 %v780_v60, %v780_v60  ;;  %vm1126_vm4 = vcmp.gt.f32.partialorder %v6288_v53, %v5867_v62  ;;  %vm6356_vm2 = vmpackc.low %vm1043_vm8, %vm1042_vm14 }
 0x13c   : > { %vm1127_vm9 = vcmp.gt.f32.partialorder %v6301_v20, %v5867_v62  ;;  %v762_v38 = vunpack.c.1.s8 %v753_v61  ;;  %vm859_vm0 = vnez %v798_v7  ;;  %vm860_vm1 = vnez %v800_v29  ;;  %vm3794_vm14 = vmpackc.low %vm1111_vm12, %vm1110_vm6  ;;  %v1186_v20 = vld [vmem:[%s9009_s0] sm:$0xff] }
 0x13d   : > { %v830_v5 = vpack.c.b8 %v829_v34, %v829_v34  ;;  %v793_v3 = vpack.c.b16 %v761_v21, %v761_v21  ;;  %v891_v58 = vsel %vm859_vm0, 16843009, %v8962_v9  ;;  %v892_v30 = vsel %vm860_vm1, 16843009, %v8962_v9  ;;  %vm6390_vm6 = vmpackc.low %vm1059_vm11, %vm1058_vm15 }
 0x13e   : > { %v832_v59 = vpack.c.b8 %v831_v23, %v831_v23  ;;  %v795_v60 = vpack.c.b16 %v762_v38, %v762_v38  ;;  %v923_v50 = vunpack.c.0.s8 %v891_v58  ;;  %v924_v61 = vunpack.c.0.s8 %v892_v30  ;;  %v6361_v23 = vld [vmem:[%s4786_s27 + $0x90] sm:$0xff]  ;;  %v6367_v58 = vld [vmem:[%s4786_s27 + $0x98] sm:$0xff]  ;;  %vm3818_vm15 = vmpackc.low %vm1127_vm9, %vm1126_vm4 }
 0x13f   : > { %vm875_vm13 = vnez %v830_v5  ;;  %v794_v7 = vpack.c.b8 %v793_v3, %v793_v3  ;;  %vm1040_vm5 = vcmp.gt.f32.partialorder %v6337_v37, %v5850_v14  ;;  %9004 = vst [vmem:[#allocation41_spill] sm:$0xff] %v6367_v58  ;;  %v778_v21 = vunpack.c.1.s8 %v6318_v46 }
 0x140   : > { %vm876_vm7 = vnez %v832_v59  ;;  %v907_v29 = vsel %vm875_vm13, 16843009, %v8962_v9  ;;  %v796_v34 = vpack.c.b8 %v795_v60, %v795_v60  ;;  %vm955_vm3 = vcmp.ne.s32.totalorder %v923_v50, 0  ;;  %v706_v59 = vld [vmem:[%s4802_s23 + $0x8] sm:$0xff] }
 0x141   : > { %vm956_vm10 = vcmp.ne.s32.totalorder %v924_v61, 0  ;;  %v908_v38 = vsel %vm876_vm7, 16843009, %v8962_v9  ;;  %v939_v5 = vunpack.c.0.s8 %v907_v29  ;;  %v987_v3 = vsel %vm955_vm3, %v6342_v19, 0.0 }
 0x142   : > { %v988_v50 = vsel %vm956_vm10, %v6345_v52, 0.0  ;;  %v940_v30 = vunpack.c.0.s8 %v908_v38  ;;  %vm857_vm8 = vnez %v794_v7  ;;  %vm858_vm1 = vnez %v796_v34  ;;  %v6395_v7 = vld [vmem:[%s4786_s27] sm:$0xff] }
 0x143   : > { %v3746_v60 = vpack.c.bf16 %v988_v50, %v987_v3  ;;  %vm6376_vm0 = vcmp.ne.s32.totalorder %v939_v5, 0  ;;  %v889_v29 = vsel %vm857_vm8, 16843009, %v8962_v9  ;;  %v890_v34 = vsel %vm858_vm1, 16843009, %v8962_v9  ;;  %v6408_v3 = vld [vmem:[%s4786_s27 + $0x8] sm:$0xff] }
 0x144   : > { %vm972_vm13 = vcmp.ne.s32.totalorder %v940_v30, 0  ;;  %v1003_v22 = vsel %vm6376_vm0, %v6361_v23, 0.0  ;;  %v921_v38 = vunpack.c.0.s8 %v889_v29  ;;  %v922_v50 = vunpack.c.0.s8 %v890_v34 }
 0x145   : > { %3747 = vmatpush.bf16.msk.msra.mxu1 %vm6356_vm2, %v3746_v60  ;;  %v1004_v5 = vsel %vm972_vm13, %v6367_v58, 0.0  ;;  %3796 = vmatpush.bf16.msk.msra.mxu3 %vm3794_vm14, %v3746_v60  ;;  %vm1041_vm11 = vcmp.gt.f32.partialorder %v706_v59, %v5850_v14  ;;  %v777_v30 = vunpack.c.0.s8 %v6318_v46  ;;  %v827_v46 = vpack.c.b16 %v778_v21, %v778_v21 }
 0x146   : > { %v3770_v61 = vpack.c.bf16 %v1004_v5, %v1003_v22  ;;  %vm953_vm12 = vcmp.ne.s32.totalorder %v921_v38, 0  ;;  %vm954_vm7 = vcmp.ne.s32.totalorder %v922_v50, 0  ;;  %vm3748_vm4 = vmpackc.low %vm1041_vm11, %vm1040_vm5  ;;  %vm1108_vm9 = vcmp.gt.f32.partialorder %v6337_v37, %v5867_v62  ;;  %v722_v38 = vld [vmem:[%s4802_s23 + $0x88] sm:$0xff] }
 0x147   : > { %v985_v53 = vsel %vm953_vm12, %v6395_v7, 0.0  ;;  %v825_v60 = vpack.c.b16 %v777_v30, %v777_v30  ;;  %v986_v29 = vsel %vm954_vm7, %v6408_v3, 0.0  ;;  %vm1109_vm3 = vcmp.gt.f32.partialorder %v706_v59, %v5867_v62  ;;  %v6436_v59 = vld [vmem:[%s4786_s27 + $0x88] sm:$0xff] }
 0x148   : > { %3771 = vmatpush.bf16.msk.msra.mxu2 %vm6390_vm6, %v3770_v61  ;;  %3820 = vmatpush.bf16.msk.msrb.mxu0 %vm3818_vm15, %v3770_v61  ;;  %v3749_v22 = vpack.c.bf16 %v986_v29, %v985_v53  ;;  %vm3797_vm10 = vmpackc.low %vm1109_vm3, %vm1108_vm9  ;;  %v828_v5 = vpack.c.b8 %v827_v46, %v827_v46  ;;  %v1188_v50 = vpack.c.bf16 %v1186_v20, %v1186_v20  ;;  %v6430_v61 = vld [vmem:[%s4786_s27 + $0x80] sm:$0xff]  ;;  %s3720_s27 = sshll.u32 %s4782_s15, 3 }
 0x149   : > { %v826_v34 = vpack.c.b8 %v825_v60, %v825_v60  ;;  %vm1056_vm5 = vcmp.gt.f32.partialorder %v721_v27, %v5850_v14  ;;  %vm1057_vm8 = vcmp.gt.f32.partialorder %v722_v38, %v5850_v14  ;;  %vm1124_vm0 = vcmp.gt.f32.partialorder %v721_v27, %v5867_v62  ;;  %s6446_s9 = scalar_lea.vmem [#allocation11], %s3720_s27  ;;  %s6449_s14 = scalar_lea.vmem [#allocation10], %s3720_s27 }
 0x14a   : > { %3750 = vmatpush.bf16.msk.msra.mxu1 %vm3748_vm4, %v3749_v22  ;;  %3799 = vmatpush.bf16.msk.msra.mxu3 %vm3797_vm10, %v3749_v22  ;;  %vm874_vm14 = vnez %v828_v5  ;;  %vm1125_vm1 = vcmp.gt.f32.partialorder %v722_v38, %v5867_v62  ;;  %vm3772_vm15 = vmpackc.low %vm1057_vm8, %vm1056_vm5 }
 0x14b   : > { %vm873_vm2 = vnez %v826_v34  ;;  %v906_v37 = vsel %vm874_vm14, 16843009, %v8962_v9  ;;  %vm3821_vm11 = vmpackc.low %vm1125_vm1, %vm1124_vm0 }
 0x14c   : > { %v905_v30 = vsel %vm873_vm2, 16843009, %v8962_v9  ;;  %v938_v53 = vunpack.c.0.s8 %v906_v37  ;;  %v1187_v9 = vld [vmem:[%s9009_s0 + $0x8] sm:$0xff] }
 0x14d   : > { %v937_v21 = vunpack.c.0.s8 %v905_v30  ;;  %1250 = vmatmul.bf16.vlgmr.msra.gmra.mxu1 %v1188_v50  ;;  %1281 = vmatmul.bf16.vlgmr.msra.gmra.mxu3 %v1188_v50  ;;  %v1189_v29 = vpack.c.bf16 %v1187_v9, %v1187_v9 }
 0x14e   : > { %vm970_vm6 = vcmp.ne.s32.totalorder %v938_v53, 0 }
 0x14f   : > { %vm969_vm13 = vcmp.ne.s32.totalorder %v937_v21, 0  ;;  %v1002_v14 = vsel %vm970_vm6, %v6436_v59, 0.0 }
 0x150   : > { %v1001_v60 = vsel %vm969_vm13, %v6430_v61, 0.0 }
 0x151   : > { %v3773_v20 = vpack.c.bf16 %v1002_v14, %v1001_v60 }
 0x153   : > { %3774 = vmatpush.bf16.msk.msra.mxu2 %vm3772_vm15, %v3773_v20  ;;  %3823 = vmatpush.bf16.msk.msrb.mxu0 %vm3821_vm11, %v3773_v20 }
 0x156   : > { %1263 = vmatmul.bf16.vlgmr.msra.gmra.mxu2 %v1189_v29  ;;  %1294 = vmatmul.bf16.vlgmr.msrb.gmra.mxu0 %v1189_v29 }
 0x1a1   : > { %v1206_v62 = vpop.f32.mrf.mxu0 }
 0x1a9   : > { %v1208_v46 = vpop.f32.mrf.mxu0 }
 0x1ca   : > { %v1251_v22 = vpop.f32.mrf.mxu1 }
 0x1cb   : > { %v1252_v37 = vadd.f32 %v1251_v22, %v1206_v62 }
 0x1d0   : > { %v1282_v34 = vpop.f32.mrf.mxu3 }
 0x1d1   : > { %v1283_v27 = vadd.f32 %v1282_v34, %v1206_v62 }
 0x1d2   : > { %v1253_v38 = vpop.f32.mrf.mxu1 }
 0x1d3   : > { %v1295_v5 = vpop.f32.mrf.mxu0 }
 0x1d4   : > { %v1296_v50 = vadd.f32 %v1295_v5, %v1283_v27 }
 0x1d6   : > { %v3824_v30 = vclamps-f32 %v1296_v50, 10.0 }
 0x1d8   : > { %v1301_v21 = vmul.f32 0.5, %v3824_v30  ;;  %v1284_v53 = vpop.f32.mrf.mxu3 }
 0x1d9   : > { %v1264_v58 = vpop.f32.mrf.mxu2 }
 0x1da   : > { %v1265_v60 = vadd.f32 %v1264_v58, %v1252_v37  ;;  %4095 = vtanh.f32 %v1301_v21 }
 0x1db   : > { %v1297_v9 = vpop.f32.mrf.mxu0 }
 0x1dc   : > { %v3775_v14 = vclamps-f32 %v1265_v60, 10.0 }
 0x1de   : > { %v1270_v20 = vmul.f32 0.5, %v3775_v14 }
 0x1e0   : > { %v4096_v29 = vpop.eup %4095  ;;  %4097 = vtanh.f32 %v1270_v20 }
 0x1e1   : > { %1303 = vst [vmem:[%s6446_s9] sm:$0xff] %v4096_v29  ;;  %v1266_v46 = vpop.f32.mrf.mxu2 }
 0x1e3   : > { %1947 = sbr.rel (%p3857_p6) target bundleno = 490 (0x1ea), region = 178 }
 0x1e6   : > { %v4098_v34 = vpop.eup %4097 }
 0x1e7   : > { %1272 = vst [vmem:[%s6449_s14] sm:$0xff] %v4098_v34 }
 0x1e8   : > { %vm1948_vm12 = vcmask 0   ;;  %v4586_v58 = vmov 0.0  }
 0x1e9   : > { %1949 = vst.msk [vmem:[#allocation13] sm:$0x1] %vm1948_vm12, %v4586_v58 }
 0x1ea PF: > { %v9010_v62 = vmov 0   ;;  %v9011_v38 = vld [vmem:[#allocation32_spill] sm:$0xff]  ;;  %v9013_v53 = vld [vmem:[#allocation29_spill] sm:$0xff]  ;;  %vm8700_vm7 = vcmask 0   ;;  %p3858_p13 = scmp.ne.s32.totalorder %s4669_s21, 1 }
 0x1eb   : > { %4101 = vset.pattern.permute.xlu2 %v9010_v62  ;;  %4100 = vset.pattern.permute.xlu1 %v9010_v62  ;;  %v9012_v37 = vld [vmem:[#allocation28_spill] sm:$0xff]  ;;  %v1964_v60 = vmul.f32 %v9013_v53, %v9013_v53 }
 0x1ec   : > { %4099 = vset.pattern.permute.xlu0 %v9010_v62  ;;  %2005 = vperm.xlu2 %4101, %v5168_v56   ;;  %v1963_v21 = vmul.f32 %v9012_v37, %v9012_v37  ;;  %v9014_v29 = vld [vmem:[#allocation24_spill] sm:$0xff] }
 0x1ed   : > { %1995 = vperm.xlu1 %4100, %v5148_v40   ;;  %1985 = vperm.xlu0 %4099, %v5119_v8   ;;  %v1965_v46 = vmul.f32 %v9014_v29, %v9014_v29 }
 0x1f4   : > { %2010 = vperm.xlu2 %4101, %v5177_v11   ;;  %v1951_v11 = vmul.f32 %v6395_v7, %v6395_v7 }
 0x1f5   : > { %2000 = vperm.xlu1 %4100, %v5160_v26   ;;  %1990 = vperm.xlu0 %4099, %v5134_v49  }
 0x1fc   : > { %2025 = vperm.xlu2 %4101, %v5244_v35  }
 0x1fd   : > { %2020 = vperm.xlu1 %4100, %v5226_v36   ;;  %2015 = vperm.xlu0 %4099, %v5184_v24   ;;  %v1952_v24 = vmul.f32 %v6408_v3, %v6408_v3  ;;  %v1953_v36 = vmul.f32 %v6342_v19, %v6342_v19 }
 0x204   : > { %2040 = vperm.xlu2 %4101, %v5319_v45   ;;  %v1954_v45 = vmul.f32 %v6345_v52, %v6345_v52 }
 0x205   : > { %2035 = vperm.xlu1 %4100, %v5303_v44   ;;  %2030 = vperm.xlu0 %4099, %v5296_v4  }
 0x20c   : > { %2055 = vperm.xlu2 %4101, %v5369_v55  }
 0x20d   : > { %2050 = vperm.xlu1 %4100, %v5359_v51   ;;  %2045 = vperm.xlu0 %4099, %v5339_v47   ;;  %v1955_v51 = vmul.f32 %v6236_v17, %v6236_v17 }
 0x214   : > { %2070 = vperm.xlu2 %4101, %v5456_v32  }
 0x215   : > { %2065 = vperm.xlu1 %4100, %v5426_v31   ;;  %2060 = vperm.xlu0 %4099, %v5397_v13   ;;  %v1956_v31 = vmul.f32 %v6239_v25, %v6239_v25  ;;  %v1960_v25 = vmul.f32 %v6034_v18, %v6034_v18 }
 0x21c   : > { %2085 = vperm.xlu2 %4101, %v5512_v6  }
 0x21d   : > { %2080 = vperm.xlu1 %4100, %v5492_v28   ;;  %2075 = vperm.xlu0 %4099, %v5472_v0  }
 0x224   : > { %2100 = vperm.xlu2 %4101, %v5586_v39  }
 0x225   : > { %2095 = vperm.xlu1 %4100, %v5549_v2   ;;  %2090 = vperm.xlu0 %4099, %v5525_v57   ;;  %v1957_v2 = vmul.f32 %v6154_v15, %v6154_v15  ;;  %v1961_v15 = vmul.f32 %v5941_v63, %v5941_v63 }
 0x22c   : > { %2115 = vperm.xlu2 %4101, %v5658_v33   ;;  %v1958_v33 = vmul.f32 %v6157_v41, %v6157_v41 }
 0x22d   : > { %2110 = vperm.xlu1 %4100, %v5633_v42   ;;  %2105 = vperm.xlu0 %4099, %v5607_v10  }
 0x234   : > { %2130 = vperm.xlu2 %4101, %v5716_v1  }
 0x235   : > { %2125 = vperm.xlu1 %4100, %v5687_v12   ;;  %2120 = vperm.xlu0 %4099, %v5674_v16   ;;  %v1959_v12 = vmul.f32 %v6030_v48, %v6030_v48  ;;  %v1962_v48 = vmul.f32 %v9011_v38, %v9011_v38  ;;  %v9022_v38 = vld [vmem:[#allocation36_spill] sm:$0xff] }
 0x23d   : > { %2140 = vperm.xlu1 %4100, %v5759_v54   ;;  %2135 = vperm.xlu0 %4099, %v5740_v43  }
 0x246   : > { %v2006_v8 = vpop.permute.xlu2 %2005 }
 0x247   : > { %v2147_v28 = vmul.f32 %v2006_v8, %v1955_v51 }
 0x24e   : > { %v2011_v49 = vpop.permute.xlu2 %2010 }
 0x24f   : > { %v2148_v42 = vmul.f32 %v2011_v49, %v1956_v31  ;;  %v9015_v49 = vld [vmem:[#allocation25_spill] sm:$0xff] }
 0x250   : > { %v9016_v31 = vld [vmem:[#allocation41_spill] sm:$0xff] }
 0x256   : > { %v2026_v56 = vpop.permute.xlu2 %2025 }
 0x257   : > { %v2151_v52 = vmul.f32 %v2026_v56, %v1959_v12  ;;  %v1967_v56 = vmul.f32 %v6430_v61, %v6430_v61 }
 0x25e   : > { %v2041_v6 = vpop.permute.xlu2 %2040 }
 0x25f   : > { %v1996_v40 = vpop.permute.xlu1 %1995  ;;  %v1986_v26 = vpop.permute.xlu0 %1985  ;;  %v2154_v18 = vmul.f32 %v2041_v6, %v1962_v48  ;;  %v1976_v48 = vmul.f32 %v9022_v38, %v9022_v38 }
 0x260   : > { %v2143_v44 = vmul.f32 %v1986_v26, %v1951_v11  ;;  %v2145_v55 = vmul.f32 %v1996_v40, %v1953_v36  ;;  %v1966_v40 = vmul.f32 %v9015_v49, %v9015_v49 }
 0x266   : > { %v2056_v22 = vpop.permute.xlu2 %2055 }
 0x267   : > { %v2001_v35 = vpop.permute.xlu1 %2000  ;;  %v1991_v4 = vpop.permute.xlu0 %1990  ;;  %v2157_v26 = vmul.f32 %v2056_v22, %v1965_v46  ;;  %v9021_v22 = vld [vmem:[#allocation35_spill] sm:$0xff]  ;;  %v9025_v46 = vld [vmem:[#allocation30_spill] sm:$0xff] }
 0x268   : > { %v2144_v47 = vmul.f32 %v1991_v4, %v1952_v24  ;;  %v2146_v32 = vmul.f32 %v2001_v35, %v1954_v45  ;;  %v1968_v4 = vmul.f32 %v6436_v59, %v6436_v59 }
 0x26a   : > { %v2175_v13 = vadd.f32 %v2144_v47, %v2143_v44 }
 0x26c   : > { %v2176_v0 = vadd.f32 %v2175_v13, %v2145_v55  ;;  %v1969_v55 = vmul.f32 %v6361_v23, %v6361_v23  ;;  %v9019_v23 = vld [vmem:[#allocation37_spill] sm:$0xff] }
 0x26e   : > { %v2177_v57 = vadd.f32 %v2176_v0, %v2146_v32  ;;  %v2071_v34 = vpop.permute.xlu2 %2070  ;;  %v1970_v32 = vmul.f32 %v9016_v31, %v9016_v31 }
 0x26f   : > { %v2021_v39 = vpop.permute.xlu1 %2020  ;;  %v2016_v10 = vpop.permute.xlu0 %2015  ;;  %v2160_v13 = vmul.f32 %v2071_v34, %v1968_v4  ;;  %v1979_v34 = vmul.f32 %v9025_v46, %v9025_v46 }
 0x270   : > { %v2178_v16 = vadd.f32 %v2177_v57, %v2147_v28  ;;  %v2149_v1 = vmul.f32 %v2016_v10, %v1957_v2  ;;  %v2150_v54 = vmul.f32 %v2021_v39, %v1958_v33  ;;  %v9017_v57 = vld [vmem:[#allocation39_spill] sm:$0xff] }
 0x271   : > { %v1971_v2 = vmul.f32 %v9017_v57, %v9017_v57 }
 0x272   : > { %v2179_v43 = vadd.f32 %v2178_v16, %v2148_v42  ;;  %v9018_v42 = vld [vmem:[#allocation40_spill] sm:$0xff] }
 0x273   : > { %v1972_v33 = vmul.f32 %v9018_v42, %v9018_v42  ;;  %v1950_v42 = vld [vmem:[#allocation13] sm:$0x1] }
 0x274   : > { %v2180_v17 = vadd.f32 %v2179_v43, %v2149_v1  ;;  %v1973_v1 = vmul.f32 %v9019_v23, %v9019_v23 }
 0x276   : > { %v2181_v19 = vadd.f32 %v2180_v17, %v2150_v54  ;;  %v2086_v47 = vpop.permute.xlu2 %2085 }
 0x277   : > { %v2036_v7 = vpop.permute.xlu1 %2035  ;;  %v2031_v3 = vpop.permute.xlu0 %2030  ;;  %v2163_v16 = vmul.f32 %v2086_v47, %v1971_v2 }
 0x278   : > { %v2152_v41 = vmul.f32 %v2031_v3, %v1960_v25  ;;  %v2182_v27 = vadd.f32 %v2181_v19, %v2151_v52  ;;  %v2153_v5 = vmul.f32 %v2036_v7, %v1961_v15  ;;  %v9020_v52 = vld [vmem:[#allocation38_spill] sm:$0xff] }
 0x279   : > { %v1974_v19 = vmul.f32 %v9020_v52, %v9020_v52 }
 0x27a   : > { %v2183_v50 = vadd.f32 %v2182_v27, %v2152_v41  ;;  %v1975_v41 = vmul.f32 %v9021_v22, %v9021_v22 }
 0x27c   : > { %v2184_v30 = vadd.f32 %v2183_v50, %v2153_v5 }
 0x27e   : > { %v2185_v20 = vadd.f32 %v2184_v30, %v2154_v18  ;;  %v2101_v12 = vpop.permute.xlu2 %2100  ;;  %v9023_v18 = vld [vmem:[#allocation33_spill] sm:$0xff] }
 0x27f   : > { %v2051_v9 = vpop.permute.xlu1 %2050  ;;  %v2046_v63 = vpop.permute.xlu0 %2045  ;;  %v2166_v27 = vmul.f32 %v2101_v12, %v1974_v19  ;;  %v1977_v53 = vmul.f32 %v9023_v18, %v9023_v18 }
 0x280   : > { %v2155_v14 = vmul.f32 %v2046_v63, %v1963_v21  ;;  %v2156_v58 = vmul.f32 %v2051_v9, %v1964_v60 }
 0x282   : > { %v2186_v62 = vadd.f32 %v2185_v20, %v2155_v14  ;;  %v9024_v14 = vld [vmem:[#allocation34_spill] sm:$0xff] }
 0x283   : > { %v1978_v20 = vmul.f32 %v9024_v14, %v9024_v14 }
 0x284   : > { %v2187_v8 = vadd.f32 %v2186_v62, %v2156_v58 }
 0x286   : > { %v2188_v35 = vadd.f32 %v2187_v8, %v2157_v26  ;;  %v2116_v21 = vpop.permute.xlu2 %2115 }
 0x287   : > { %v2066_v11 = vpop.permute.xlu1 %2065  ;;  %v2061_v24 = vpop.permute.xlu0 %2060  ;;  %v2169_v29 = vmul.f32 %v2116_v21, %v1977_v53 }
 0x288   : > { %v2158_v36 = vmul.f32 %v2061_v24, %v1966_v40  ;;  %v2159_v44 = vmul.f32 %v2066_v11, %v1967_v56  ;;  %v9026_v40 = vld [vmem:[#allocation31_spill] sm:$0xff] }
 0x289   : > { %v1980_v26 = vmul.f32 %v9026_v40, %v9026_v40 }
 0x28a   : > { %v2189_v45 = vadd.f32 %v2188_v35, %v2158_v36  ;;  %v9027_v35 = vld [vmem:[#allocation26_spill] sm:$0xff] }
 0x28b   : > { %v1981_v4 = vmul.f32 %v9027_v35, %v9027_v35 }
 0x28c   : > { %v2190_v51 = vadd.f32 %v2189_v45, %v2159_v44  ;;  %v9028_v45 = vld [vmem:[#allocation27_spill] sm:$0xff] }
 0x28d   : > { %v1982_v47 = vmul.f32 %v9028_v45, %v9028_v45 }
 0x28e   : > { %v2191_v6 = vadd.f32 %v2190_v51, %v2160_v13  ;;  %v2131_v24 = vpop.permute.xlu2 %2130 }
 0x28f   : > { %v2081_v0 = vpop.permute.xlu1 %2080  ;;  %v2076_v61 = vpop.permute.xlu0 %2075  ;;  %v2172_v44 = vmul.f32 %v2131_v24, %v1980_v26 }
 0x290   : > { %v2161_v28 = vmul.f32 %v2076_v61, %v1969_v55  ;;  %v2162_v39 = vmul.f32 %v2081_v0, %v1970_v32 }
 0x292   : > { %v2192_v59 = vadd.f32 %v2191_v6, %v2161_v28 }
 0x294   : > { %v2193_v10 = vadd.f32 %v2192_v59, %v2162_v39 }
 0x296   : > { %v2194_v25 = vadd.f32 %v2193_v10, %v2163_v16 }
 0x297   : > { %v2096_v43 = vpop.permute.xlu1 %2095  ;;  %v2091_v54 = vpop.permute.xlu0 %2090 }
 0x298   : > { %v2164_v17 = vmul.f32 %v2091_v54, %v1972_v33  ;;  %v2165_v15 = vmul.f32 %v2096_v43, %v1973_v1 }
 0x29a   : > { %v2195_v7 = vadd.f32 %v2194_v25, %v2164_v17 }
 0x29c   : > { %v2196_v3 = vadd.f32 %v2195_v7, %v2165_v15 }
 0x29e   : > { %v2197_v37 = vadd.f32 %v2196_v3, %v2166_v27 }
 0x29f   : > { %v2111_v5 = vpop.permute.xlu1 %2110  ;;  %v2106_v50 = vpop.permute.xlu0 %2105 }
 0x2a0   : > { %v2167_v30 = vmul.f32 %v2106_v50, %v1975_v41  ;;  %v2168_v60 = vmul.f32 %v2111_v5, %v1976_v48 }
 0x2a2   : > { %v2198_v9 = vadd.f32 %v2197_v37, %v2167_v30 }
 0x2a4   : > { %v2199_v63 = vadd.f32 %v2198_v9, %v2168_v60 }
 0x2a6   : > { %v2200_v49 = vadd.f32 %v2199_v63, %v2169_v29 }
 0x2a7   : > { %v2126_v58 = vpop.permute.xlu1 %2125  ;;  %v2121_v62 = vpop.permute.xlu0 %2120 }
 0x2a8   : > { %v2170_v8 = vmul.f32 %v2121_v62, %v1978_v20  ;;  %v2171_v56 = vmul.f32 %v2126_v58, %v1979_v34 }
 0x2aa   : > { %v2201_v11 = vadd.f32 %v2200_v49, %v2170_v8 }
 0x2ac   : > { %v2202_v36 = vadd.f32 %v2201_v11, %v2171_v56 }
 0x2ae   : > { %v2203_v31 = vadd.f32 %v2202_v36, %v2172_v44 }
 0x2af   : > { %v2141_v51 = vpop.permute.xlu1 %2140  ;;  %v2136_v55 = vpop.permute.xlu0 %2135 }
 0x2b0   : > { %v2173_v13 = vmul.f32 %v2136_v55, %v1981_v4  ;;  %v2174_v32 = vmul.f32 %v2141_v51, %v1982_v47 }
 0x2b2   : > { %v2204_v0 = vadd.f32 %v2203_v31, %v2173_v13 }
 0x2b4   : > { %v2205_v61 = vadd.f32 %v2204_v0, %v2174_v32 }
 0x2b6   : > { %2206 = vadd.xlane.f32.xlu2 %v2205_v61 }
 0x329   : > { %v2207_v28 = vpop.xlane.xlu2 %2206 }
 0x32a   : > { %v2208_v6 = vrot.slane %v2207_v28, 4 }
 0x32c   : > { %v2209_v57 = vadd.f32 %v2208_v6, %v2207_v28 }
 0x32e   : > { %v2210_v2 = vrot.slane %v2209_v57, 2 }
 0x330   : > { %v2211_v39 = vadd.f32 %v2210_v2, %v2209_v57 }
 0x332   : > { %v2212_v59 = vrot.slane %v2211_v39, 1 }
 0x334   : > { %v2213_v10 = vadd.f32 %v2212_v59, %v2211_v39 }
 0x336   : > { %3899 = vpush %v2213_v10 }
 0x367   : > { %s3900_s24 = spop %3899 }
 0x368   : > { %v2215_v33 = vstv %s3900_s24 }
 0x369   : > { %v2216_v16 = vmul.f32 12.5, %v2215_v33  ;;  %2223 = sbr.rel (%p3858_p13) target bundleno = 1369 (0x559), region = 182 }
 0x36b   : > { %v2217_v12 = vadd.f32 %v2216_v16, %v1950_v42 }
 0x36d   : > { %2219 = vst.msk [vmem:[#allocation13] sm:$0x1] %vm8700_vm7, %v2217_v12 }
 0x36e   : > { %v2224_v23 = vld [vmem:[%s8654_s5] sm:$0xff]  ;;  %v2225_v1 = vld [vmem:[%s8654_s5 + $0x8] sm:$0xff]  ;;  %v2226_v43 = vld [vmem:[%s8654_s5 + $0x10] sm:$0xff] }
 0x36f   : > { %v2227_v54 = vld [vmem:[%s8654_s5 + $0x18] sm:$0xff]  ;;  %v3859_v17 = vmul.f32 -1.442695, %v2224_v23  ;;  %v2228_v25 = vld [vmem:[%s8654_s5 + $0x20] sm:$0xff]  ;;  %v3860_v52 = vmul.f32 -1.442695, %v2225_v1 }
 0x370   : > { %v2229_v19 = vld [vmem:[%s8654_s5 + $0x28] sm:$0xff]  ;;  %v3861_v15 = vmul.f32 -1.442695, %v2226_v43  ;;  %v2230_v7 = vld [vmem:[%s8654_s5 + $0x30] sm:$0xff]  ;;  %v3862_v3 = vmul.f32 -1.442695, %v2227_v54 }
 0x371   : > { %v2231_v22 = vld [vmem:[%s8654_s5 + $0x38] sm:$0xff]  ;;  %4102 = vpow2.f32 %v3859_v17  ;;  %v3863_v41 = vmul.f32 -1.442695, %v2228_v25  ;;  %v2232_v27 = vld [vmem:[%s8654_s5 + $0x40] sm:$0xff]  ;;  %v3864_v38 = vmul.f32 -1.442695, %v2229_v19 }
 0x372   : > { %4104 = vpow2.f32 %v3860_v52  ;;  %v2233_v48 = vld [vmem:[%s8654_s5 + $0x48] sm:$0xff]  ;;  %v3865_v5 = vmul.f32 -1.442695, %v2230_v7  ;;  %v2234_v50 = vld [vmem:[%s8654_s5 + $0x50] sm:$0xff]  ;;  %v3866_v30 = vmul.f32 -1.442695, %v2231_v22 }
 0x373   : > { %4106 = vpow2.f32 %v3861_v15  ;;  %v2235_v37 = vld [vmem:[%s8654_s5 + $0x58] sm:$0xff]  ;;  %v3867_v21 = vmul.f32 -1.442695, %v2232_v27  ;;  %v2236_v18 = vld [vmem:[%s8654_s5 + $0x60] sm:$0xff]  ;;  %v3868_v53 = vmul.f32 -1.442695, %v2233_v48 }
 0x374   : > { %4108 = vpow2.f32 %v3862_v3  ;;  %v2237_v9 = vld [vmem:[%s8654_s5 + $0x68] sm:$0xff]  ;;  %v3869_v63 = vmul.f32 -1.442695, %v2234_v50  ;;  %v2238_v20 = vld [vmem:[%s8654_s5 + $0x70] sm:$0xff]  ;;  %v3870_v29 = vmul.f32 -1.442695, %v2235_v37 }
 0x375   : > { %4110 = vpow2.f32 %v3863_v41  ;;  %v2239_v34 = vld [vmem:[%s8654_s5 + $0x78] sm:$0xff]  ;;  %v3871_v58 = vmul.f32 -1.442695, %v2236_v18  ;;  %v2240_v8 = vld [vmem:[%s8654_s5 + $0x80] sm:$0xff]  ;;  %v3872_v49 = vmul.f32 -1.442695, %v2237_v9 }
 0x376   : > { %4112 = vpow2.f32 %v3864_v38  ;;  %v2241_v26 = vld [vmem:[%s8654_s5 + $0x88] sm:$0xff]  ;;  %v3873_v56 = vmul.f32 -1.442695, %v2238_v20  ;;  %v2242_v24 = vld [vmem:[%s8654_s5 + $0x90] sm:$0xff]  ;;  %v3874_v36 = vmul.f32 -1.442695, %v2239_v34 }
 0x377   : > { %v6593_v60 = vpop.eup %4102  ;;  %4114 = vpow2.f32 %v3865_v5  ;;  %v2243_v4 = vld [vmem:[%s8654_s5 + $0x98] sm:$0xff]  ;;  %v3875_v44 = vmul.f32 -1.442695, %v2240_v8  ;;  %v2244_v47 = vld [vmem:[%s8654_s5 + $0xa0] sm:$0xff]  ;;  %v3876_v51 = vmul.f32 -1.442695, %v2241_v26 }
 0x378   : > { %v6598_v14 = vpop.eup %4104  ;;  %4116 = vpow2.f32 %v3866_v30  ;;  %v2245_v13 = vld [vmem:[%s8654_s5 + $0xa8] sm:$0xff]  ;;  %v3877_v31 = vmul.f32 -1.442695, %v2242_v24  ;;  %v2246_v0 = vld [vmem:[%s8654_s5 + $0xb0] sm:$0xff]  ;;  %v3878_v61 = vmul.f32 -1.442695, %v2243_v4 }
 0x379   : > { %v6603_v46 = vpop.eup %4106  ;;  %4118 = vpow2.f32 %v3867_v21  ;;  %v2247_v6 = vld [vmem:[%s8654_s5 + $0xb8] sm:$0xff]  ;;  %v3879_v57 = vmul.f32 -1.442695, %v2244_v47  ;;  %v2248_v39 = vld [vmem:[%s8654_s5 + $0xc0] sm:$0xff]  ;;  %v3880_v59 = vmul.f32 -1.442695, %v2245_v13 }
 0x37a   : > { %v6608_v62 = vpop.eup %4108  ;;  %4120 = vpow2.f32 %v3868_v53  ;;  %v2249_v42 = vld [vmem:[%s8654_s5 + $0xc8] sm:$0xff]  ;;  %v3881_v33 = vmul.f32 -1.442695, %v2246_v0  ;;  %v3882_v12 = vmul.f32 -1.442695, %v2247_v6  ;;  %v2250_v54 = vld [vmem:[%s8654_s5 + $0xd0] sm:$0xff] }
 0x37b   : > { %v6613_v40 = vpop.eup %4110  ;;  %4122 = vpow2.f32 %v3869_v63  ;;  %v3883_v1 = vmul.f32 -1.442695, %v2248_v39  ;;  %v3884_v17 = vmul.f32 -1.442695, %v2249_v42  ;;  %v2251_v52 = vld [vmem:[%s8654_s5 + $0xd8] sm:$0xff]  ;;  %v6657_v19 = vadd.f32 1.0, %v6593_v60 }
 0x37c   : > { %v6618_v11 = vpop.eup %4112  ;;  %4124 = vpow2.f32 %v3870_v29  ;;  %v2252_v7 = vld [vmem:[%s8654_s5 + $0xe0] sm:$0xff]  ;;  %v2253_v3 = vld [vmem:[%s8654_s5 + $0xe8] sm:$0xff]  ;;  %v6666_v22 = vadd.f32 1.0, %v6598_v14  ;;  %v2254_v27 = vld [vmem:[%s8654_s5 + $0xf0] sm:$0xff]  ;;  %v3885_v48 = vmul.f32 -1.442695, %v2250_v54 }
 0x37d   : > { %v6623_v35 = vpop.eup %4114  ;;  %4126 = vpow2.f32 %v3871_v58  ;;  %v2255_v38 = vld [vmem:[%s8654_s5 + $0xf8] sm:$0xff]  ;;  %v3886_v50 = vmul.f32 -1.442695, %v2251_v52  ;;  %v6675_v30 = vadd.f32 1.0, %v6603_v46  ;;  %v3887_v21 = vmul.f32 -1.442695, %v2252_v7 }
 0x37e   : > { %v6628_v45 = vpop.eup %4116  ;;  %4128 = vpow2.f32 %v3872_v49  ;;  %v3888_v18 = vmul.f32 -1.442695, %v2253_v3  ;;  %v6678_v53 = vadd.f32 1.0, %v6608_v62  ;;  %v3889_v9 = vmul.f32 -1.442695, %v2254_v27 }
 0x37f   : > { %v6633_v55 = vpop.eup %4118  ;;  %4130 = vpow2.f32 %v3873_v56  ;;  %v3890_v63 = vmul.f32 -1.442695, %v2255_v38  ;;  %v6682_v14 = vadd.f32 1.0, %v6613_v40  ;;  %v6686_v29 = vadd.f32 1.0, %v6618_v11 }
 0x380   : > { %v4121_v32 = vpop.eup %4120  ;;  %4132 = vpow2.f32 %v3874_v36  ;;  %v6689_v46 = vadd.f32 1.0, %v6623_v35  ;;  %v6692_v34 = vadd.f32 1.0, %v6628_v45  ;;  %v6695_v62 = vadd.f32 1.0, %v6633_v55 }
 0x381   : > { %v4123_v28 = vpop.eup %4122  ;;  %4134 = vpow2.f32 %v3875_v44  ;;  %v6697_v8 = vadd.f32 1.0, %v4121_v32  ;;  %v2395_v49 = vand.u32 2147483648, %v6657_v19  ;;  %v2410_v11 = vand.u32 2147483648, %v6666_v22 }
 0x382   : > { %v4125_v2 = vpop.eup %4124  ;;  %4136 = vpow2.f32 %v3876_v51  ;;  %v6701_v26 = vadd.f32 1.0, %v4123_v28  ;;  %v2425_v32 = vand.u32 2147483648, %v6675_v30  ;;  %v2440_v6 = vand.u32 2147483648, %v6678_v53 }
 0x383   : > { %v4127_v10 = vpop.eup %4126  ;;  %4138 = vpow2.f32 %v3877_v31  ;;  %v6703_v56 = vadd.f32 1.0, %v4125_v2  ;;  %v6725_v31 = vor.u32 1.1754944e-38, %v2395_v49  ;;  %v6731_v28 = vor.u32 1.1754944e-38, %v2410_v11 }
 0x384   : > { %v4129_v16 = vpop.eup %4128  ;;  %4140 = vpow2.f32 %v3878_v61  ;;  %v6707_v36 = vadd.f32 1.0, %v4127_v10  ;;  %vm2389_vm4 = vweird.f32 %v6657_v19  ;;  %v2455_v52 = vand.u32 2147483648, %v6682_v14 }
 0x385   : > { %v4131_v23 = vpop.eup %4130  ;;  %4142 = vpow2.f32 %v3879_v57  ;;  %v6709_v35 = vadd.f32 1.0, %v4129_v16  ;;  %vm2404_vm9 = vweird.f32 %v6666_v22  ;;  %v2453_v3 = vand.u32 2147483647, %v6682_v14 }
 0x386   : > { %v4133_v43 = vpop.eup %4132  ;;  %4144 = vpow2.f32 %v3880_v59  ;;  %v6715_v45 = vadd.f32 1.0, %v4131_v23  ;;  %vm2419_vm3 = vweird.f32 %v6675_v30  ;;  %vm2434_vm10 = vweird.f32 %v6678_v53 }
 0x387   : > { %v4135_v25 = vpop.eup %4134  ;;  %4146 = vpow2.f32 %v3881_v33  ;;  %v6717_v47 = vadd.f32 1.0, %v4133_v43  ;;  %v6754_v43 = vor.u32 1.1754944e-38, %v2425_v32  ;;  %vm6859_vm2 = vcmp.eq.f32.partialorder %v2453_v3, 8.507059e+37 }
 0x388   : > { %v4137_v15 = vpop.eup %4136  ;;  %4148 = vpow2.f32 %v3882_v12  ;;  %v6723_v13 = vadd.f32 1.0, %v4135_v25  ;;  %v6762_v25 = vor.u32 1.1754944e-38, %v2440_v6 }
 0x389   : > { %v4139_v41 = vpop.eup %4138  ;;  %4150 = vpow2.f32 %v3883_v1  ;;  %v6729_v61 = vadd.f32 1.0, %v4137_v15 }
 0x38a   : > { %v4141_v5 = vpop.eup %4140  ;;  %4152 = vpow2.f32 %v3884_v17  ;;  %v6736_v2 = vadd.f32 1.0, %v4139_v41  ;;  %v2470_v41 = vand.u32 2147483648, %v6686_v29 }
 0x38b   : > { %v4143_v37 = vpop.eup %4142  ;;  %4154 = vrcp.f32 %v6657_v19  ;;  %v6738_v39 = vadd.f32 1.0, %v4141_v5 }
 0x38c   : > { %v4145_v60 = vpop.eup %4144  ;;  %4156 = vrcp.f32 %v6666_v22  ;;  %v6750_v23 = vadd.f32 1.0, %v4143_v37  ;;  %v6800_v6 = vor.u32 1.1754944e-38, %v2470_v41 }
 0x38d   : > { %v4147_v20 = vpop.eup %4146  ;;  %4158 = vpow2.f32 %v3885_v48  ;;  %v6752_v1 = vadd.f32 1.0, %v4145_v60 }
 0x38e   : > { %v4149_v58 = vpop.eup %4148  ;;  %4160 = vrcp.f32 %v6675_v30  ;;  %v6759_v17 = vadd.f32 1.0, %v4147_v20  ;;  %v6788_v20 = vor.u32 1.1754944e-38, %v2455_v52 }
 0x38f   : > { %v4151_v40 = vpop.eup %4150  ;;  %4162 = vrcp.f32 %v6678_v53  ;;  %v6767_v7 = vadd.f32 1.0, %v4149_v58  ;;  %v2468_v58 = vand.u32 2147483647, %v6686_v29 }
 0x390   : > { %v4153_v24 = vpop.eup %4152  ;;  %4164 = vrcp.f32 %v6682_v14  ;;  %v6772_v38 = vadd.f32 1.0, %v4151_v40 }
 0x391   : > { %v6713_v44 = vpop.eup %4154  ;;  %4166 = vrcp.f32 %v6686_v29 }
 0x392   : > { %v6721_v55 = vpop.eup %4156  ;;  %4168 = vrcp.f32 %v6689_v46  ;;  %v2385_v42 = vmul.f32 %v6713_v44, %v6657_v19  ;;  %9029 = vst [vmem:[#allocation42_spill] sm:$0xff] %v6772_v38  ;;  %vm2390_vm8 = vweird.f32 %v6713_v44 }
 0x393   : > { %v4159_v0 = vpop.eup %4158  ;;  %4170 = vpow2.f32 %v3886_v50  ;;  %v2400_v33 = vmul.f32 %v6721_v55, %v6666_v22  ;;  %vm2405_vm13 = vweird.f32 %v6721_v55  ;;  %vm6847_vm5 = vmor %vm2389_vm4, %vm2390_vm8  ;;  %vm6873_vm8 = vcmp.eq.f32.partialorder %v2468_v58, 8.507059e+37 }
 0x394   : > { %v6734_v57 = vpop.eup %4160  ;;  %4172 = vpow2.f32 %v3887_v21  ;;  %v2386_v48 = vsub.f32 1.0, %v2385_v42  ;;  %v6795_v11 = vadd.f32 1.0, %v4159_v0  ;;  %vm6869_vm4 = vmor %vm2404_vm9, %vm2405_vm13  ;;  %v2530_v58 = vand.u32 2147483648, %v6697_v8 }
 0x395   : > { %v6741_v10 = vpop.eup %4162  ;;  %4174 = vpow2.f32 %v3888_v18  ;;  %v2401_v5 = vsub.f32 1.0, %v2400_v33  ;;  %v2415_v50 = vmul.f32 %v6734_v57, %v6675_v30  ;;  %vm2420_vm6 = vweird.f32 %v6734_v57 }
 0x396   : > { %v6748_v12 = vpop.eup %4164  ;;  %4176 = vrcp.f32 %v6692_v34  ;;  %v2430_v21 = vmul.f32 %v6741_v10, %v6678_v53  ;;  %9031 = vst [vmem:[#allocation44_spill] sm:$0xff] %v6795_v11  ;;  %v2387_v52 = vmul.f32 %v6713_v44, %v2386_v48  ;;  %v9038_v48 = vand.u32 2147483647, %v6666_v22  ;;  %vm6891_vm9 = vmor %vm2419_vm3, %vm2420_vm6 }
 0x397   : > { %v6757_v54 = vpop.eup %4166  ;;  %4178 = vpow2.f32 %v3889_v9  ;;  %v2445_v18 = vmul.f32 %v6748_v12, %v6682_v14  ;;  %v2402_v16 = vmul.f32 %v6721_v55, %v2401_v5  ;;  %v2416_v59 = vsub.f32 1.0, %v2415_v50 }
 0x398   : > { %v6765_v15 = vpop.eup %4168  ;;  %4180 = vpow2.f32 %v3890_v63  ;;  %v2460_v60 = vmul.f32 %v6757_v54, %v6686_v29  ;;  %v6785_v63 = vadd.f32 1.0, %v4153_v24  ;;  %v2483_v24 = vand.u32 2147483647, %v6689_v46 }
 0x399   : > { %v4171_v27 = vpop.eup %4170  ;;  %4182 = vrcp.f32 %v6695_v62  ;;  %v2475_v49 = vmul.f32 %v6765_v15, %v6689_v46  ;;  %v2431_v51 = vsub.f32 1.0, %v2430_v21  ;;  %vm6820_vm1 = vcmp.eq.f32.partialorder %v9038_v48, 8.507059e+37 }
 0x39a   : > { %v4173_v37 = vpop.eup %4172  ;;  %9030 = vst [vmem:[#allocation43_spill] sm:$0xff] %v6785_v63  ;;  %v6797_v32 = vadd.f32 1.0, %v4171_v27  ;;  %v2446_v27 = vsub.f32 1.0, %v2445_v18  ;;  %v2461_v4 = vsub.f32 1.0, %v2460_v60  ;;  %vm2435_vm15 = vweird.f32 %v6741_v10 }
 0x39b   : > { %v4175_v9 = vpop.eup %4174  ;;  %v6803_v33 = vadd.f32 1.0, %v4173_v37  ;;  %v9035_v37 = vand.u32 2147483647, %v6657_v19  ;;  %v2476_v50 = vsub.f32 1.0, %v2475_v49  ;;  %v2498_v60 = vand.u32 2147483647, %v6692_v34  ;;  %vm6907_vm3 = vmor %vm2434_vm10, %vm2435_vm15 }
 0x39c   : > { %v6793_v40 = vpop.eup %4176  ;;  %9032 = vst [vmem:[#allocation45_spill] sm:$0xff] %v6797_v32  ;;  %v2485_v32 = vand.u32 2147483648, %v6689_v46  ;;  %v6809_v41 = vadd.f32 1.0, %v4175_v9  ;;  %v2388_v9 = vadd.f32 %v6713_v44, %v2387_v52  ;;  %v2417_v48 = vmul.f32 %v6734_v57, %v2416_v59 }
 0x39d   : > { %v4179_v42 = vpop.eup %4178  ;;  %9033 = vst [vmem:[#allocation46_spill] sm:$0xff] %v6803_v33  ;;  %vm6814_vm0 = vcmp.eq.f32.partialorder %v9035_v37, 8.507059e+37  ;;  %v2490_v21 = vmul.f32 %v6793_v40, %v6692_v34  ;;  %v2403_v37 = vadd.f32 %v6721_v55, %v2402_v16  ;;  %v9041_v49 = vand.u32 2147483647, %v6675_v30 }
 0x39e   : > { %v4181_v0 = vpop.eup %4180  ;;  %9034 = vst [vmem:[#allocation47_spill] sm:$0xff] %v6809_v41  ;;  %vm2450_vm12 = vweird.f32 %v6748_v12  ;;  %v2432_v59 = vmul.f32 %v6741_v10, %v2431_v51  ;;  %v9046_v16 = vand.u32 2147483647, %v6678_v53  ;;  %v2447_v11 = vmul.f32 %v6748_v12, %v2446_v27 }
 0x39f   : > { %v6826_v18 = vpop.eup %4182  ;;  %vm6837_vm11 = vcmp.eq.f32.partialorder %v9041_v49, 8.507059e+37  ;;  %v2462_v19 = vmul.f32 %v6757_v54, %v2461_v4  ;;  %4184 = vrcp.f32 %v6697_v8  ;;  %v2477_v3 = vmul.f32 %v6765_v15, %v2476_v50 }
 0x3a0   : > { %vm6854_vm14 = vcmp.eq.f32.partialorder %v9046_v16, 8.507059e+37  ;;  %vm6878_vm7 = vcmp.eq.f32.partialorder %v2483_v24, 8.507059e+37  ;;  %v9055_v27 = vmov 0  ;;  %v2491_v4 = vsub.f32 1.0, %v2490_v21 }
 0x3a1   : > { %v9056_v27 = vsel %vm6878_vm7, 4294967295, %v9055_v27  ;;  %v2505_v38 = vmul.f32 %v6826_v18, %v6695_v62  ;;  %4186 = vrcp.f32 %v6701_v26  ;;  %v6885_v22 = vadd.f32 1.0, %v4179_v42 }
 0x3a2   : > { %vm2465_vm13 = vweird.f32 %v6757_v54  ;;  %v2486_v24 = vor.u32 1.1754944e-38, %v2485_v32  ;;  %v2500_v50 = vand.u32 2147483648, %v6692_v34  ;;  %v6897_v21 = vadd.f32 1.0, %v4181_v0 }
 0x3a3   : > { %9057 = vst [vmem:[#allocation48_spill] sm:$0xff] %v6885_v22  ;;  %v2392_v42 = vsel %vm6847_vm5, %v6713_v44, %v2388_v9  ;;  %v2418_v22 = vadd.f32 %v6734_v57, %v2417_v48  ;;  %vm2480_vm6 = vweird.f32 %v6765_v15  ;;  %v2407_v32 = vsel %vm6869_vm4, %v6721_v55, %v2403_v37 }
 0x3a4   : > { %v2433_v0 = vadd.f32 %v6741_v10, %v2432_v59  ;;  %v2448_v44 = vadd.f32 %v6748_v12, %v2447_v11  ;;  %vm9062_vm5 = vweird.f32 %v6682_v14  ;;  %v2463_v9 = vadd.f32 %v6757_v54, %v2462_v19 }
 0x3a5   : > { %vm6921_vm7 = vmor %vm9062_vm5, %vm2450_vm12  ;;  %vm9065_vm10 = vweird.f32 %v6686_v29  ;;  %v2478_v55 = vadd.f32 %v6765_v15, %v2477_v3  ;;  %v2492_v11 = vmul.f32 %v6793_v40, %v2491_v4  ;;  %vm6934_vm4 = vcmp.eq.f32.partialorder %v2498_v60, 8.507059e+37  ;;  %v6939_v52 = vpop.eup %4184 }
 0x3a6   : > { %vm6928_vm15 = vmor %vm9065_vm10, %vm2465_vm13  ;;  %v2506_v14 = vsub.f32 1.0, %v2505_v38  ;;  %4188 = vrcp.f32 %v6703_v56  ;;  %vm9070_vm12 = vweird.f32 %v6689_v46  ;;  %v2501_v59 = vor.u32 1.1754944e-38, %v2500_v50 }
 0x3a7   : > { %vm6943_vm5 = vmor %vm9070_vm12, %vm2480_vm6  ;;  %vm2509_vm13 = vweird.f32 %v6695_v62  ;;  %v2513_v19 = vand.u32 2147483647, %v6695_v62  ;;  %4190 = vrcp.f32 %v6707_v36  ;;  %v6950_v60 = vpop.eup %4186  ;;  %v2422_v38 = vsel %vm6891_vm9, %v6734_v57, %v2418_v22 }
 0x3a8   : > { %vm2495_vm10 = vweird.f32 %v6793_v40  ;;  %v2515_v46 = vand.u32 2147483648, %v6695_v62  ;;  %4192 = vrcp.f32 %v6709_v35  ;;  %v6961_v51 = vsel %vm6814_vm0, %v6725_v31, %v2392_v42 }
 0x3a9   : > { %9073 = vst [vmem:[#allocation49_spill] sm:$0xff] %v6961_v51  ;;  %v6966_v3 = vsel %vm6820_vm1, %v6731_v28, %v2407_v32  ;;  %v2437_v57 = vsel %vm6907_vm3, %v6741_v10, %v2433_v0  ;;  %v2452_v4 = vsel %vm6921_vm7, %v6748_v12, %v2448_v44  ;;  %v2467_v22 = vsel %vm6928_vm15, %v6757_v54, %v2463_v9 }
 0x3aa   : > { %9074 = vst [vmem:[#allocation50_spill] sm:$0xff] %v6966_v3  ;;  %v2482_v31 = vsel %vm6943_vm5, %v6765_v15, %v2478_v55  ;;  %v2493_v33 = vadd.f32 %v6793_v40, %v2492_v11  ;;  %v2507_v28 = vmul.f32 %v6826_v18, %v2506_v14  ;;  %v6985_v10 = vsel %vm6837_vm11, %v6754_v43, %v2422_v38 }
 0x3ab   : > { %9075 = vst [vmem:[#allocation51_spill] sm:$0xff] %v6985_v10  ;;  %vm9076_vm0 = vweird.f32 %v6692_v34  ;;  %vm6993_vm1 = vcmp.eq.f32.partialorder %v2513_v19, 8.507059e+37  ;;  %v2520_v15 = vmul.f32 %v6939_v52, %v6697_v8  ;;  %v2535_v5 = vmul.f32 %v6950_v60, %v6701_v26 }
 0x3ac   : > { %vm6989_vm7 = vmor %vm9076_vm0, %vm2495_vm10  ;;  %4194 = vrcp.f32 %v6715_v45  ;;  %v7002_v43 = vpop.eup %4188  ;;  %v7007_v34 = vsel %vm6854_vm14, %v6762_v25, %v2437_v57  ;;  %v7012_v41 = vsel %vm6859_vm2, %v6788_v20, %v2452_v4  ;;  %vm2510_vm11 = vweird.f32 %v6826_v18 }
 0x3ad   : > { %9081 = vst [vmem:[#allocation52_spill] sm:$0xff] %v7007_v34  ;;  %v7016_v50 = vpop.eup %4190  ;;  %v7021_v42 = vsel %vm6873_vm8, %v6800_v6, %v2467_v22  ;;  %vm9084_vm9 = vnez %v9056_v27  ;;  %v2516_v49 = vor.u32 1.1754944e-38, %v2515_v46  ;;  %v2545_v63 = vand.u32 2147483648, %v6701_v26  ;;  %vm7038_vm2 = vmor %vm2509_vm13, %vm2510_vm11 }
 0x3ae   : > { %9082 = vst [vmem:[#allocation53_spill] sm:$0xff] %v7012_v41  ;;  %v7025_v25 = vsel %vm9084_vm9, %v2486_v24, %v2482_v31  ;;  %v7028_v20 = vpop.eup %4192  ;;  %v2497_v30 = vsel %vm6989_vm7, %v6793_v40, %v2493_v33  ;;  %v2508_v32 = vadd.f32 %v6826_v18, %v2507_v28  ;;  %v2528_v0 = vand.u32 2147483647, %v6697_v8 }
 0x3af   : > { %9083 = vst [vmem:[#allocation54_spill] sm:$0xff] %v7021_v42  ;;  %v2543_v6 = vand.u32 2147483647, %v6701_v26  ;;  %v2521_v27 = vsub.f32 1.0, %v2520_v15  ;;  %v2536_v24 = vsub.f32 1.0, %v2535_v5  ;;  %v2550_v44 = vmul.f32 %v7002_v43, %v6703_v56 }
 0x3b0   : > { %9085 = vst [vmem:[#allocation55_spill] sm:$0xff] %v7025_v25  ;;  %4196 = vrcp.f32 %v6717_v47  ;;  %vm2524_vm14 = vweird.f32 %v6697_v8  ;;  %v7046_v40 = vor.u32 1.1754944e-38, %v2530_v58  ;;  %vm2539_vm8 = vweird.f32 %v6701_v26 }
 0x3b1   : > { %v2565_v62 = vmul.f32 %v7016_v50, %v6707_v36  ;;  %v7055_v9 = vsel %vm6934_vm4, %v2501_v59, %v2497_v30  ;;  %v7057_v48 = vor.u32 1.1754944e-38, %v2545_v63  ;;  %vm2554_vm3 = vweird.f32 %v6703_v56 }
 0x3b2   : > { %v7051_v53 = vpop.eup %4194  ;;  %9088 = vst [vmem:[#allocation56_spill] sm:$0xff] %v7055_v9  ;;  %v2580_v55 = vmul.f32 %v7028_v20, %v6709_v35  ;;  %v2512_v11 = vsel %vm7038_vm2, %v6826_v18, %v2508_v32  ;;  %v2558_v14 = vand.u32 2147483647, %v6703_v56  ;;  %v2560_v29 = vand.u32 2147483648, %v6703_v56 }
 0x3b3   : > { %v2573_v19 = vand.u32 2147483647, %v6707_v36  ;;  %v2522_v37 = vmul.f32 %v6939_v52, %v2521_v27  ;;  %vm2525_vm6 = vweird.f32 %v6939_v52  ;;  %vm7070_vm15 = vcmp.eq.f32.partialorder %v2528_v0, 8.507059e+37 }
 0x3b4   : > { %v2537_v38 = vmul.f32 %v6950_v60, %v2536_v24  ;;  %vm7075_vm4 = vcmp.eq.f32.partialorder %v2543_v6, 8.507059e+37  ;;  %v2551_v18 = vsub.f32 1.0, %v2550_v44  ;;  %v2566_v57 = vsub.f32 1.0, %v2565_v62  ;;  %vm7099_vm10 = vmor %vm2524_vm14, %vm2525_vm6 }
 0x3b5   : > { %v2575_v4 = vand.u32 2147483648, %v6707_v36  ;;  %v2595_v22 = vmul.f32 %v7051_v53, %v6715_v45  ;;  %4198 = vrcp.f32 %v6723_v13  ;;  %vm2540_vm12 = vweird.f32 %v6950_v60 }
 0x3b6   : > { %v7083_v31 = vpop.eup %4196  ;;  %vm2569_vm5 = vweird.f32 %v6707_v36  ;;  %v2581_v33 = vsub.f32 1.0, %v2580_v55  ;;  %v2588_v28 = vand.u32 2147483647, %v6709_v35  ;;  %v7090_v12 = vsel %vm6993_vm1, %v2516_v49, %v2512_v11  ;;  %vm7112_vm1 = vmor %vm2539_vm8, %vm2540_vm12 }
 0x3b7   : > { %9093 = vst [vmem:[#allocation57_spill] sm:$0xff] %v7090_v12  ;;  %v2561_v15 = vor.u32 1.1754944e-38, %v2560_v29  ;;  %vm2584_vm13 = vweird.f32 %v6709_v35  ;;  %v2590_v5 = vand.u32 2147483648, %v6709_v35  ;;  %v2523_v58 = vadd.f32 %v6939_v52, %v2522_v37 }
 0x3b8   : > { %v2538_v30 = vadd.f32 %v6950_v60, %v2537_v38  ;;  %v2552_v54 = vmul.f32 %v7002_v43, %v2551_v18  ;;  %vm2555_vm0 = vweird.f32 %v7002_v43  ;;  %vm7106_vm7 = vcmp.eq.f32.partialorder %v2558_v14, 8.507059e+37 }
 0x3b9   : > { %v2567_v8 = vmul.f32 %v7016_v50, %v2566_v57  ;;  %vm7117_vm11 = vcmp.eq.f32.partialorder %v2573_v19, 8.507059e+37  ;;  %v2576_v6 = vor.u32 1.1754944e-38, %v2575_v4  ;;  %v2596_v16 = vsub.f32 1.0, %v2595_v22  ;;  %vm7147_vm6 = vmor %vm2554_vm3, %vm2555_vm0 }
 0x3ba   : > { %v2610_v27 = vmul.f32 %v7083_v31, %v6717_v47  ;;  %v2582_v24 = vmul.f32 %v7028_v20, %v2581_v33  ;;  %vm7124_vm9 = vcmp.eq.f32.partialorder %v2588_v28, 8.507059e+37  ;;  %vm2599_vm2 = vweird.f32 %v6715_v45 }
 0x3bb   : > { %4200 = vrcp.f32 %v6729_v61  ;;  %v7130_v26 = vpop.eup %4198  ;;  %vm2570_vm14 = vweird.f32 %v7016_v50  ;;  %v2591_v62 = vor.u32 1.1754944e-38, %v2590_v5  ;;  %v2603_v55 = vand.u32 2147483647, %v6715_v45 }
 0x3bc   : > { %4202 = vrcp.f32 %v6736_v2  ;;  %v2527_v11 = vsel %vm7099_vm10, %v6939_v52, %v2523_v58  ;;  %v2542_v14 = vsel %vm7112_vm1, %v6950_v60, %v2538_v30  ;;  %v2553_v29 = vadd.f32 %v7002_v43, %v2552_v54  ;;  %vm7156_vm12 = vmor %vm2569_vm5, %vm2570_vm14 }
 0x3bd   : > { %vm2585_vm8 = vweird.f32 %v7028_v20  ;;  %v2568_v37 = vadd.f32 %v7016_v50, %v2567_v8  ;;  %v2597_v52 = vmul.f32 %v7051_v53, %v2596_v16  ;;  %v2605_v38 = vand.u32 2147483648, %v6715_v45 }
 0x3be   : > { %v2611_v18 = vsub.f32 1.0, %v2610_v27  ;;  %v2583_v57 = vadd.f32 %v7028_v20, %v2582_v24  ;;  %vm2614_vm3 = vweird.f32 %v6717_v47  ;;  %v2625_v56 = vmul.f32 %v7130_v26, %v6723_v13  ;;  %vm7177_vm5 = vmor %vm2584_vm13, %vm2585_vm8 }
 0x3bf   : > { %4204 = vrcp.f32 %v6738_v39  ;;  %v7168_v4 = vsel %vm7070_vm15, %v7046_v40, %v2527_v11  ;;  %v7173_v36 = vsel %vm7075_vm4, %v7057_v48, %v2542_v14  ;;  %vm2600_vm10 = vweird.f32 %v7051_v53 }
 0x3c0   : > { %9108 = vst [vmem:[#allocation58_spill] sm:$0xff] %v7168_v4  ;;  %vm7182_vm0 = vcmp.eq.f32.partialorder %v2603_v55, 8.507059e+37  ;;  %v2557_v40 = vsel %vm7147_vm6, %v7002_v43, %v2553_v29  ;;  %v2618_v48 = vand.u32 2147483647, %v6717_v47  ;;  %v2620_v35 = vand.u32 2147483648, %v6717_v47  ;;  %vm7207_vm15 = vmor %vm2599_vm2, %vm2600_vm10 }
 0x3c1   : > { %9109 = vst [vmem:[#allocation59_spill] sm:$0xff] %v7173_v36  ;;  %v7186_v59 = vpop.eup %4200  ;;  %4206 = vrcp.f32 %v6750_v23  ;;  %v2572_v28 = vsel %vm7156_vm12, %v7016_v50, %v2568_v37  ;;  %v2598_v5 = vadd.f32 %v7051_v53, %v2597_v52  ;;  %v2612_v58 = vmul.f32 %v7083_v31, %v2611_v18 }
 0x3c2   : > { %v7194_v46 = vpop.eup %4202  ;;  %v2633_v63 = vand.u32 2147483647, %v6723_v13  ;;  %v2587_v43 = vsel %vm7177_vm5, %v7028_v20, %v2583_v57  ;;  %v2626_v54 = vsub.f32 1.0, %v2625_v56  ;;  %v2635_v32 = vand.u32 2147483648, %v6723_v13 }
 0x3c3   : > { %4208 = vrcp.f32 %v6752_v1  ;;  %v7215_v50 = vsel %vm7106_vm7, %v2561_v15, %v2557_v40  ;;  %v2606_v8 = vor.u32 1.1754944e-38, %v2605_v38  ;;  %vm2615_vm4 = vweird.f32 %v7083_v31 }
 0x3c4   : > { %9116 = vst [vmem:[#allocation60_spill] sm:$0xff] %v7215_v50  ;;  %v2640_v20 = vmul.f32 %v7186_v59, %v6729_v61  ;;  %v7224_v16 = vsel %vm7117_vm11, %v2576_v6, %v2572_v28  ;;  %vm7226_vm13 = vcmp.eq.f32.partialorder %v2618_v48, 8.507059e+37  ;;  %vm2629_vm1 = vweird.f32 %v6723_v13  ;;  %vm7245_vm7 = vmor %vm2614_vm3, %vm2615_vm4 }
 0x3c5   : > { %v7220_v45 = vpop.eup %4204  ;;  %9117 = vst [vmem:[#allocation61_spill] sm:$0xff] %v7224_v16  ;;  %v2655_v15 = vmul.f32 %v7194_v46, %v6736_v2  ;;  %v7235_v49 = vsel %vm7124_vm9, %v2591_v62, %v2587_v43  ;;  %v2602_v24 = vsel %vm7207_vm15, %v7051_v53, %v2598_v5  ;;  %v2613_v0 = vadd.f32 %v7083_v31, %v2612_v58 }
 0x3c6   : > { %9120 = vst [vmem:[#allocation62_spill] sm:$0xff] %v7235_v49  ;;  %v2621_v6 = vor.u32 1.1754944e-38, %v2620_v35  ;;  %v2627_v14 = vmul.f32 %v7130_v26, %v2626_v54  ;;  %vm7250_vm11 = vcmp.eq.f32.partialorder %v2633_v63, 8.507059e+37  ;;  %v2636_v62 = vor.u32 1.1754944e-38, %v2635_v32  ;;  %v9153_v35 = vld [vmem:[#allocation46_spill] sm:$0xff] }
 0x3c7   : > { %v7241_v55 = vpop.eup %4206  ;;  %vm2644_vm9 = vweird.f32 %v6729_v61  ;;  %v2650_v53 = vand.u32 2147483648, %v6729_v61  ;;  %v2641_v29 = vsub.f32 1.0, %v2640_v20  ;;  %v2648_v19 = vand.u32 2147483647, %v6729_v61 }
 0x3c8   : > { %v2670_v47 = vmul.f32 %v7220_v45, %v6738_v39  ;;  %4210 = vrcp.f32 %v6759_v17  ;;  %v7264_v52 = vsel %vm7182_vm0, %v2606_v8, %v2602_v24  ;;  %vm2630_vm2 = vweird.f32 %v7130_v26  ;;  %v9133_v24 = vld [vmem:[#allocation42_spill] sm:$0xff] }
 0x3c9   : > { %v7260_v37 = vpop.eup %4208  ;;  %9125 = vst [vmem:[#allocation63_spill] sm:$0xff] %v7264_v52  ;;  %v2656_v38 = vsub.f32 1.0, %v2655_v15  ;;  %v2663_v18 = vand.u32 2147483647, %v6736_v2  ;;  %v2617_v60 = vsel %vm7245_vm7, %v7083_v31, %v2613_v0  ;;  %v2665_v57 = vand.u32 2147483648, %v6736_v2  ;;  %vm7280_vm6 = vmor %vm2629_vm1, %vm2630_vm2 }
 0x3ca   : > { %v2680_v56 = vand.u32 2147483648, %v6738_v39  ;;  %v2685_v22 = vmul.f32 %v7241_v55, %v6750_v23  ;;  %v2628_v33 = vadd.f32 %v7130_v26, %v2627_v14  ;;  %v2651_v40 = vor.u32 1.1754944e-38, %v2650_v53 }
 0x3cb   : > { %vm2659_vm14 = vweird.f32 %v6736_v2  ;;  %vm2674_vm8 = vweird.f32 %v6738_v39  ;;  %v2642_v31 = vmul.f32 %v7186_v59, %v2641_v29  ;;  %vm7285_vm12 = vcmp.eq.f32.partialorder %v2648_v19, 8.507059e+37  ;;  %v9138_v19 = vld [vmem:[#allocation43_spill] sm:$0xff]  ;;  %v9144_v2 = vld [vmem:[#allocation44_spill] sm:$0xff] }
 0x3cc   : > { %v2671_v28 = vsub.f32 1.0, %v2670_v47  ;;  %v2678_v5 = vand.u32 2147483647, %v6738_v39  ;;  %v2700_v58 = vmul.f32 %v7260_v37, %v6752_v1  ;;  %v7294_v63 = vsel %vm7226_vm13, %v2621_v6, %v2617_v60 }
 0x3cd   : > { %9130 = vst [vmem:[#allocation64_spill] sm:$0xff] %v7294_v63  ;;  %vm2645_vm3 = vweird.f32 %v7186_v59  ;;  %v2657_v13 = vmul.f32 %v7194_v46, %v2656_v38  ;;  %4212 = vrcp.f32 %v6767_v7  ;;  %vm7301_vm5 = vcmp.eq.f32.partialorder %v2663_v18, 8.507059e+37 }
 0x3ce   : > { %v7299_v43 = vpop.eup %4210  ;;  %v2666_v54 = vor.u32 1.1754944e-38, %v2665_v57  ;;  %v7305_v32 = vor.u32 1.1754944e-38, %v2680_v56  ;;  %v2686_v8 = vsub.f32 1.0, %v2685_v22  ;;  %v2693_v20 = vand.u32 2147483647, %v6750_v23  ;;  %vm7325_vm4 = vmor %vm2644_vm9, %vm2645_vm3 }
 0x3cf   : > { %v2632_v27 = vsel %vm7280_vm6, %v7130_v26, %v2628_v33  ;;  %vm2660_vm10 = vweird.f32 %v7194_v46  ;;  %v2695_v15 = vand.u32 2147483648, %v6750_v23  ;;  %4214 = vrcp.f32 %v9133_v24 }
 0x3d0   : > { %v2643_v0 = vadd.f32 %v7186_v59, %v2642_v31  ;;  %v2672_v6 = vmul.f32 %v7220_v45, %v2671_v28  ;;  %vm7316_vm0 = vcmp.eq.f32.partialorder %v2678_v5, 8.507059e+37  ;;  %vm2689_vm15 = vweird.f32 %v6750_v23  ;;  %vm7340_vm1 = vmor %vm2659_vm14, %vm2660_vm10 }
 0x3d1   : > { %v2701_v14 = vsub.f32 1.0, %v2700_v58  ;;  %v2658_v53 = vadd.f32 %v7194_v46, %v2657_v13  ;;  %vm2704_vm13 = vweird.f32 %v6752_v1  ;;  %v2715_v29 = vmul.f32 %v7299_v43, %v6759_v17 }
 0x3d2   : > { %4216 = vrcp.f32 %v9138_v19  ;;  %v7336_v47 = vsel %vm7250_vm11, %v2636_v62, %v2632_v27  ;;  %vm2675_vm7 = vweird.f32 %v7220_v45  ;;  %v2687_v38 = vmul.f32 %v7241_v55, %v2686_v8 }
 0x3d3   : > { %9139 = vst [vmem:[#allocation42_spill] sm:$0xff] %v7336_v47  ;;  %vm7346_vm9 = vcmp.eq.f32.partialorder %v2693_v20, 8.507059e+37  ;;  %v7350_v60 = vpop.eup %4212  ;;  %v2696_v57 = vor.u32 1.1754944e-38, %v2695_v15  ;;  %v2708_v44 = vand.u32 2147483647, %v6752_v1  ;;  %v2710_v62 = vand.u32 2147483648, %v6752_v1  ;;  %vm7368_vm2 = vmor %vm2674_vm8, %vm2675_vm7 }
 0x3d4   : > { %4218 = vrcp.f32 %v9144_v2  ;;  %v2647_v56 = vsel %vm7325_vm4, %v7186_v59, %v2643_v0  ;;  %v2673_v22 = vadd.f32 %v7220_v45, %v2672_v6  ;;  %vm2690_vm11 = vweird.f32 %v7241_v55  ;;  %v9147_v59 = vld [vmem:[#allocation45_spill] sm:$0xff] }
 0x3d5   : > { %v2702_v33 = vmul.f32 %v7260_v37, %v2701_v14  ;;  %v7361_v48 = vpop.eup %4214  ;;  %v2662_v31 = vsel %vm7340_vm1, %v7194_v46, %v2658_v53  ;;  %v2716_v5 = vsub.f32 1.0, %v2715_v29  ;;  %vm2719_vm14 = vweird.f32 %v6759_v17  ;;  %vm7387_vm8 = vmor %vm2689_vm15, %vm2690_vm11 }
 0x3d6   : > { %4220 = vrcp.f32 %v9147_v59  ;;  %v2688_v58 = vadd.f32 %v7241_v55, %v2687_v38  ;;  %vm2705_vm6 = vweird.f32 %v7260_v37  ;;  %v2723_v13 = vand.u32 2147483647, %v6759_v17 }
 0x3d7   : > { %v2730_v46 = vmul.f32 %v7350_v60, %v6767_v7  ;;  %v7383_v39 = vsel %vm7285_vm12, %v2651_v40, %v2647_v56  ;;  %vm7391_vm3 = vcmp.eq.f32.partialorder %v2708_v44, 8.507059e+37  ;;  %v2711_v15 = vor.u32 1.1754944e-38, %v2710_v62  ;;  %vm7413_vm12 = vmor %vm2704_vm13, %vm2705_vm6 }
 0x3d8   : > { %v7379_v8 = vpop.eup %4216  ;;  %9148 = vst [vmem:[#allocation43_spill] sm:$0xff] %v7383_v39  ;;  %v2725_v0 = vand.u32 2147483648, %v6759_v17  ;;  %v2677_v6 = vsel %vm7368_vm2, %v7220_v45, %v2673_v22  ;;  %v2703_v40 = vadd.f32 %v7260_v37, %v2702_v33  ;;  %v2745_v23 = vmul.f32 %v7361_v48, %v9133_v24  ;;  %v7850_v39 = vld [vmem:[%s8654_s5 + $0xc8] sm:$0xff] }
 0x3d9   : > { %4222 = vrcp.f32 %v9153_v35  ;;  %v7407_v26 = vsel %vm7301_vm5, %v2666_v54, %v2662_v31  ;;  %v2717_v45 = vmul.f32 %v7299_v43, %v2716_v5  ;;  %vm2734_vm10 = vweird.f32 %v6767_v7  ;;  %9214 = vst [vmem:[#allocation76_spill] sm:$0xff] %v7850_v39 }
 0x3da   : > { %v7403_v14 = vpop.eup %4218  ;;  %9154 = vst [vmem:[#allocation44_spill] sm:$0xff] %v7407_v26  ;;  %v2740_v29 = vand.u32 2147483648, %v6767_v7  ;;  %v2692_v30 = vsel %vm7387_vm8, %v7241_v55, %v2688_v58  ;;  %vm7423_vm5 = vcmp.eq.f32.partialorder %v2723_v13, 8.507059e+37  ;;  %v2731_v61 = vsub.f32 1.0, %v2730_v46 }
 0x3db   : > { %v2738_v1 = vand.u32 2147483647, %v6767_v7  ;;  %v2760_v38 = vmul.f32 %v7379_v8, %v9138_v19  ;;  %v7435_v62 = vsel %vm7316_vm0, %v7305_v32, %v2677_v6  ;;  %vm2720_vm15 = vweird.f32 %v7299_v43 }
 0x3dc   : > { %v7430_v44 = vpop.eup %4220  ;;  %9159 = vst [vmem:[#allocation45_spill] sm:$0xff] %v7435_v62  ;;  %v2726_v55 = vor.u32 1.1754944e-38, %v2725_v0  ;;  %v2755_v56 = vand.u32 2147483648, %v9133_v24  ;;  %v2707_v22 = vsel %vm7413_vm12, %v7260_v37, %v2703_v40  ;;  %v2746_v33 = vsub.f32 1.0, %v2745_v23  ;;  %vm7455_vm4 = vmor %vm2719_vm14, %vm2720_vm15  ;;  %v7789_v62 = vld [vmem:[%s8654_s5 + $0x90] sm:$0xff] }
 0x3dd   : > { %v2753_v31 = vand.u32 2147483647, %v9133_v24  ;;  %v2775_v28 = vmul.f32 %v7403_v14, %v9144_v2  ;;  %v7447_v11 = vsel %vm7346_vm9, %v2696_v57, %v2692_v30  ;;  %v2718_v32 = vadd.f32 %v7299_v43, %v2717_v45  ;;  %v9168_v45 = vld [vmem:[#allocation47_spill] sm:$0xff] }
 0x3de   : > { %9160 = vst [vmem:[#allocation46_spill] sm:$0xff] %v7447_v11  ;;  %v2741_v5 = vor.u32 1.1754944e-38, %v2740_v29  ;;  %vm2749_vm0 = vweird.f32 %v9133_v24  ;;  %v2732_v13 = vmul.f32 %v7350_v60, %v2731_v61  ;;  %vm7460_vm13 = vcmp.eq.f32.partialorder %v2738_v1, 8.507059e+37 }
 0x3df   : > { %v7451_v58 = vpop.eup %4222  ;;  %v2761_v18 = vsub.f32 1.0, %v2760_v38  ;;  %vm2764_vm1 = vweird.f32 %v9138_v19  ;;  %v2790_v57 = vmul.f32 %v7430_v44, %v9147_v59  ;;  %v7469_v20 = vsel %vm7391_vm3, %v2711_v15, %v2707_v22  ;;  %v9169_v38 = vld [vmem:[#allocation48_spill] sm:$0xff] }
 0x3e0   : > { %9165 = vst [vmem:[#allocation65_spill] sm:$0xff] %v7469_v20  ;;  %vm2735_vm7 = vweird.f32 %v7350_v60  ;;  %v2756_v17 = vor.u32 1.1754944e-38, %v2755_v56  ;;  %v2768_v0 = vand.u32 2147483647, %v9138_v19  ;;  %v2747_v6 = vmul.f32 %v7361_v48, %v2746_v33 }
 0x3e1   : > { %vm7474_vm9 = vcmp.eq.f32.partialorder %v2753_v31, 8.507059e+37  ;;  %v2770_v23 = vand.u32 2147483648, %v9138_v19  ;;  %v2776_v53 = vsub.f32 1.0, %v2775_v28  ;;  %4224 = vrcp.f32 %v9168_v45  ;;  %vm7494_vm2 = vmor %vm2734_vm10, %vm2735_vm7  ;;  %v7835_v31 = vld [vmem:[%s8654_s5 + $0xb8] sm:$0xff] }
 0x3e2   : > { %v2722_v27 = vsel %vm7455_vm4, %v7299_v43, %v2718_v32  ;;  %vm2750_vm11 = vweird.f32 %v7361_v48  ;;  %v2783_v15 = vand.u32 2147483647, %v9144_v2  ;;  %v2805_v29 = vmul.f32 %v7451_v58, %v9153_v35  ;;  %9212 = vst [vmem:[#allocation74_spill] sm:$0xff] %v7835_v31 }
 0x3e3   : > { %v2733_v30 = vadd.f32 %v7350_v60, %v2732_v13  ;;  %v2762_v61 = vmul.f32 %v7379_v8, %v2761_v18  ;;  %v2791_v1 = vsub.f32 1.0, %v2790_v57  ;;  %4226 = vrcp.f32 %v9169_v38  ;;  %vm7517_vm3 = vmor %vm2749_vm0, %vm2750_vm11 }
 0x3e4   : > { %vm2779_vm14 = vweird.f32 %v9144_v2  ;;  %v2785_v56 = vand.u32 2147483648, %v9144_v2  ;;  %v2798_v22 = vand.u32 2147483647, %v9147_v59  ;;  %4228 = vrcp.f32 %v6897_v21 }
 0x3e5   : > { %v2748_v33 = vadd.f32 %v7361_v48, %v2747_v6  ;;  %vm2765_vm6 = vweird.f32 %v7379_v8  ;;  %vm7504_vm8 = vcmp.eq.f32.partialorder %v2768_v0, 8.507059e+37  ;;  %v2777_v7 = vmul.f32 %v7403_v14, %v2776_v53 }
 0x3e6   : > { %v7511_v28 = vsel %vm7423_vm5, %v2726_v55, %v2722_v27  ;;  %v2771_v37 = vor.u32 1.1754944e-38, %v2770_v23  ;;  %vm7521_vm12 = vcmp.eq.f32.partialorder %v2783_v15, 8.507059e+37  ;;  %v2806_v18 = vsub.f32 1.0, %v2805_v29  ;;  %vm7535_vm5 = vmor %vm2764_vm1, %vm2765_vm6  ;;  %v7657_v23 = vld [vmem:[%s8654_s5 + $0x8] sm:$0xff] }
 0x3e7   : > { %9174 = vst [vmem:[#allocation47_spill] sm:$0xff] %v7511_v28  ;;  %v7525_v57 = vpop.eup %4224  ;;  %v2737_v54 = vsel %vm7494_vm2, %v7350_v60, %v2733_v30  ;;  %v2763_v55 = vadd.f32 %v7379_v8, %v2762_v61  ;;  %vm2780_vm10 = vweird.f32 %v7403_v14  ;;  %v2792_v24 = vmul.f32 %v7430_v44, %v2791_v1  ;;  %v7634_v61 = vld [vmem:[%s8654_s5] sm:$0xff] }
 0x3e8   : > { %v2786_v6 = vor.u32 1.1754944e-38, %v2785_v56  ;;  %vm2794_vm15 = vweird.f32 %v9147_v59  ;;  %vm7540_vm0 = vcmp.eq.f32.partialorder %v2798_v22, 8.507059e+37  ;;  %v2800_v60 = vand.u32 2147483648, %v9147_v59  ;;  %vm7561_vm1 = vmor %vm2779_vm14, %vm2780_vm10 }
 0x3e9   : > { %v7545_v53 = vpop.eup %4226  ;;  %v2752_v27 = vsel %vm7517_vm3, %v7361_v48, %v2748_v33  ;;  %v2778_v19 = vadd.f32 %v7403_v14, %v2777_v7  ;;  %vm2795_vm4 = vweird.f32 %v7430_v44  ;;  %v2815_v15 = vand.u32 2147483648, %v9153_v35 }
 0x3ea   : > { %v7553_v29 = vpop.eup %4228  ;;  %v7557_v30 = vsel %vm7460_vm13, %v2741_v5, %v2737_v54  ;;  %v2807_v48 = vmul.f32 %v7451_v58, %v2806_v18  ;;  %vm2809_vm7 = vweird.f32 %v9153_v35  ;;  %v2820_v1 = vmul.f32 %v7525_v57, %v9168_v45  ;;  %vm7581_vm13 = vmor %vm2794_vm15, %vm2795_vm4 }
 0x3eb   : > { %9183 = vst [vmem:[#allocation48_spill] sm:$0xff] %v7557_v30  ;;  %v2767_v43 = vsel %vm7535_vm5, %v7379_v8, %v2763_v55  ;;  %v2793_v5 = vadd.f32 %v7430_v44, %v2792_v24  ;;  %v2813_v46 = vand.u32 2147483647, %v9153_v35  ;;  %v2830_v2 = vand.u32 2147483648, %v9168_v45  ;;  %v7697_v24 = vld [vmem:[%s8654_s5 + $0x30] sm:$0xff] }
 0x3ec   : > { %v7577_v56 = vsel %vm7474_vm9, %v2756_v17, %v2752_v27  ;;  %v2801_v33 = vor.u32 1.1754944e-38, %v2800_v60  ;;  %vm2810_vm11 = vweird.f32 %v7451_v58  ;;  %v2835_v8 = vmul.f32 %v7545_v53, %v9169_v38 }
 0x3ed   : > { %9186 = vst [vmem:[#allocation66_spill] sm:$0xff] %v7577_v56  ;;  %v2782_v7 = vsel %vm7561_vm1, %v7403_v14, %v2778_v19  ;;  %v7591_v32 = vor.u32 1.1754944e-38, %v2815_v15  ;;  %vm2824_vm9 = vweird.f32 %v9168_v45  ;;  %v2845_v59 = vand.u32 2147483648, %v9169_v38  ;;  %vm7610_vm2 = vmor %vm2809_vm7, %vm2810_vm11 }
 0x3ee   : > { %v2850_v17 = vmul.f32 %v7553_v29, %v6897_v21  ;;  %v7599_v40 = vsel %vm7504_vm8, %v2771_v37, %v2767_v43  ;;  %v7602_v18 = vadd.f32 %v7451_v58, %v2807_v48  ;;  %v2821_v54 = vsub.f32 1.0, %v2820_v1 }
 0x3ef   : > { %9189 = vst [vmem:[#allocation67_spill] sm:$0xff] %v7599_v40  ;;  %v2828_v55 = vand.u32 2147483647, %v9168_v45  ;;  %v2797_v14 = vsel %vm7581_vm13, %v7430_v44, %v2793_v5  ;;  %vm7614_vm14 = vcmp.eq.f32.partialorder %v2813_v46, 8.507059e+37  ;;  %v7618_v37 = vor.u32 1.1754944e-38, %v2830_v2  ;;  %v7762_v40 = vld [vmem:[%s8654_s5 + $0x78] sm:$0xff] }
 0x3f0   : > { %vm2839_vm6 = vweird.f32 %v9169_v38  ;;  %v2860_v0 = vand.u32 2147483648, %v6897_v21  ;;  %v7624_v60 = vsel %vm7521_vm12, %v2786_v6, %v2782_v7  ;;  %vm2825_vm8 = vweird.f32 %v7525_v57  ;;  %v7777_v45 = vld [vmem:[%s8654_s5 + $0x80] sm:$0xff] }
 0x3f1   : > { %9194 = vst [vmem:[#allocation68_spill] sm:$0xff] %v7624_v60  ;;  %v2836_v35 = vsub.f32 1.0, %v2835_v8  ;;  %v2843_v44 = vand.u32 2147483647, %v9169_v38  ;;  %v7628_v27 = vor.u32 1.1754944e-38, %v2845_v59  ;;  %v2851_v19 = vsub.f32 1.0, %v2850_v17  ;;  %vm7742_vm4 = vmor %vm2824_vm9, %vm2825_vm8 }
 0x3f2   : > { %v2858_v15 = vand.u32 2147483647, %v6897_v21  ;;  %v2864_v48 = vand.u32 2147483647, %v7634_v61  ;;  %v7639_v13 = vsel %vm7540_vm0, %v2801_v33, %v2797_v14  ;;  %v2812_v6 = vsel %vm7610_vm2, %v7451_v58, %v7602_v18  ;;  %v7663_v58 = vld [vmem:[%s8654_s5 + $0x10] sm:$0xff]  ;;  %v7674_v8 = vld [vmem:[%s8654_s5 + $0x18] sm:$0xff] }
 0x3f3   : > { %9195 = vst [vmem:[#allocation69_spill] sm:$0xff] %v7639_v13  ;;  %v2822_v1 = vmul.f32 %v7525_v57, %v2821_v54  ;;  %vm2854_vm3 = vweird.f32 %v6897_v21  ;;  %vm7647_vm12 = vcmp.eq.f32.partialorder %v2828_v55, 8.507059e+37  ;;  %vm2840_vm10 = vweird.f32 %v7545_v53  ;;  %v7680_v59 = vld [vmem:[%s8654_s5 + $0x20] sm:$0xff]  ;;  %v7686_v18 = vld [vmem:[%s8654_s5 + $0x28] sm:$0xff]  ;;  %v7729_v13 = vld [vmem:[%s8654_s5 + $0x58] sm:$0xff] }
 0x3f4   : > { %v7652_v5 = vor.u32 1.1754944e-38, %v2860_v0  ;;  %v2865_v46 = vand.u32 2147483647, %v7657_v23  ;;  %v2866_v2 = vand.u32 2147483647, %v7663_v58  ;;  %v2837_v22 = vmul.f32 %v7545_v53, %v2836_v35  ;;  %v7703_v35 = vld [vmem:[%s8654_s5 + $0x38] sm:$0xff]  ;;  %vm7769_vm1 = vmor %vm2839_vm6, %vm2840_vm10 }
 0x3f5   : > { %vm7667_vm5 = vcmp.eq.f32.partialorder %v2843_v44, 8.507059e+37  ;;  %v2867_v7 = vand.u32 2147483647, %v7674_v8  ;;  %v2868_v17 = vand.u32 2147483647, %v7680_v59  ;;  %v2852_v55 = vmul.f32 %v7553_v29, %v2851_v19  ;;  %v7716_v0 = vld [vmem:[%s8654_s5 + $0x48] sm:$0xff] }
 0x3f6   : > { %vm7690_vm15 = vcmp.eq.f32.partialorder %v2858_v15, 8.507059e+37  ;;  %v2896_v54 = vsub.f32 0.0, %v2864_v48  ;;  %v2823_v19 = vadd.f32 %v7525_v57, %v2822_v1  ;;  %v7710_v15 = vld [vmem:[%s8654_s5 + $0x40] sm:$0xff]  ;;  %v7722_v48 = vld [vmem:[%s8654_s5 + $0x50] sm:$0xff]  ;;  %vm2855_vm0 = vweird.f32 %v7553_v29  ;;  %v7750_v44 = vld [vmem:[%s8654_s5 + $0x68] sm:$0xff] }
 0x3f7   : > { %v7735_v60 = vld [vmem:[%s8654_s5 + $0x60] sm:$0xff]  ;;  %v2897_v56 = vsub.f32 0.0, %v2865_v46  ;;  %v2838_v30 = vadd.f32 %v7545_v53, %v2837_v22  ;;  %v7756_v46 = vld [vmem:[%s8654_s5 + $0x70] sm:$0xff]  ;;  %v2853_v20 = vadd.f32 %v7553_v29, %v2852_v55  ;;  %v7783_v22 = vld [vmem:[%s8654_s5 + $0x88] sm:$0xff]  ;;  %v7795_v26 = vsel %vm7614_vm14, %v7591_v32, %v2812_v6 }
 0x3f8   : > { %9206 = vst [vmem:[#allocation70_spill] sm:$0xff] %v7795_v26  ;;  %vm7801_vm7 = vmor %vm2854_vm3, %vm2855_vm0  ;;  %v7808_v38 = vld [vmem:[%s8654_s5 + $0x98] sm:$0xff]  ;;  %v7814_v32 = vld [vmem:[%s8654_s5 + $0xa0] sm:$0xff]  ;;  %v2827_v26 = vsel %vm7742_vm4, %v7525_v57, %v2823_v19  ;;  %v2898_v63 = vsub.f32 0.0, %v2866_v2  ;;  %v2899_v47 = vsub.f32 0.0, %v2867_v7  ;;  %v2900_v2 = vsub.f32 0.0, %v2868_v17 }
 0x3f9   : > { %9209 = vst [vmem:[#allocation71_spill] sm:$0xff] %v7814_v32  ;;  %v7820_v21 = vld [vmem:[%s8654_s5 + $0xa8] sm:$0xff]  ;;  %v7829_v55 = vld [vmem:[%s8654_s5 + $0xb0] sm:$0xff]  ;;  %v2842_v1 = vsel %vm7769_vm1, %v7545_v53, %v2838_v30  ;;  %v7844_v57 = vld [vmem:[%s8654_s5 + $0xc0] sm:$0xff]  ;;  %v2857_v28 = vsel %vm7801_vm7, %v7553_v29, %v2853_v20  ;;  %v2928_v19 = vmul.f32 1.442695, %v2896_v54  ;;  %v7865_v52 = vsel %vm7647_vm12, %v7618_v37, %v2827_v26 }
 0x3fa   : > { %9210 = vst [vmem:[#allocation72_spill] sm:$0xff] %v7820_v21  ;;  %v7859_v53 = vld [vmem:[%s8654_s5 + $0xd0] sm:$0xff]  ;;  %v7870_v7 = vld [vmem:[%s8654_s5 + $0xd8] sm:$0xff]  ;;  %v9218_v20 = vand.u32 2147483647, %v7686_v18  ;;  %v7878_v17 = vsel %vm7667_vm5, %v7628_v27, %v2842_v1  ;;  %v7883_v26 = vld [vmem:[%s8654_s5 + $0xe0] sm:$0xff] }
 0x3fb   : > { %9211 = vst [vmem:[#allocation73_spill] sm:$0xff] %v7829_v55  ;;  %v2891_v11 = vand.u32 2147483647, %v7870_v7  ;;  %v2930_v6 = vmul.f32 1.442695, %v2897_v56  ;;  %v7891_v56 = vsel %vm7690_vm15, %v7652_v5, %v2857_v28  ;;  %v7896_v27 = vld [vmem:[%s8654_s5 + $0xe8] sm:$0xff]  ;;  %4230 = vpow2.f32 %v2928_v19 }
 0x3fc   : > { %9213 = vst [vmem:[#allocation75_spill] sm:$0xff] %v7844_v57  ;;  %v2901_v29 = vsub.f32 0.0, %v9218_v20  ;;  %v2892_v37 = vand.u32 2147483647, %v7883_v26  ;;  %v9221_v43 = vand.u32 2147483647, %v7697_v24 }
 0x3fd   : > { %9215 = vst [vmem:[#allocation77_spill] sm:$0xff] %v7859_v53  ;;  %v2932_v30 = vmul.f32 1.442695, %v2898_v63  ;;  %v2893_v33 = vand.u32 2147483647, %v7896_v27  ;;  %v7904_v63 = vld [vmem:[%s8654_s5 + $0xf0] sm:$0xff]  ;;  %4232 = vpow2.f32 %v2930_v6 }
 0x3fe   : > { %9216 = vst [vmem:[#allocation78_spill] sm:$0xff] %v7865_v52  ;;  %v2902_v54 = vsub.f32 0.0, %v9221_v43  ;;  %v9224_v1 = vand.u32 2147483647, %v7703_v35  ;;  %v2894_v14 = vand.u32 2147483647, %v7904_v63 }
 0x3ff   : > { %9217 = vst [vmem:[#allocation79_spill] sm:$0xff] %v7870_v7  ;;  %v9226_v5 = vand.u32 2147483647, %v7710_v15  ;;  %v2936_v43 = vmul.f32 1.442695, %v2900_v2  ;;  %4234 = vpow2.f32 %v2932_v30  ;;  %v2923_v7 = vsub.f32 0.0, %v2891_v11 }
 0x400   : > { %9219 = vst [vmem:[#allocation80_spill] sm:$0xff] %v7878_v17  ;;  %v2903_v20 = vsub.f32 0.0, %v9224_v1  ;;  %v2934_v17 = vmul.f32 1.442695, %v2899_v47  ;;  %v9228_v47 = vand.u32 2147483647, %v7716_v0 }
 0x401   : > { %9220 = vst [vmem:[#allocation81_spill] sm:$0xff] %v7883_v26  ;;  %v2904_v28 = vsub.f32 0.0, %v9226_v5  ;;  %v2938_v49 = vmul.f32 1.442695, %v2901_v29  ;;  %v9229_v16 = vand.u32 2147483647, %v7722_v48  ;;  %v4231_v34 = vpop.eup %4230 }
 0x402   : > { %9222 = vst [vmem:[#allocation82_spill] sm:$0xff] %v7891_v56  ;;  %v7912_v56 = vld [vmem:[%s8654_s5 + $0xf8] sm:$0xff]  ;;  %v2905_v52 = vsub.f32 0.0, %v9228_v47  ;;  %v9230_v36 = vand.u32 2147483647, %v7729_v13  ;;  %4236 = vpow2.f32 %v2934_v17  ;;  %vm3376_vm13 = vcmask 7168  }
 0x403   : > { %9223 = vst [vmem:[#allocation83_spill] sm:$0xff] %v7896_v27  ;;  %v2895_v1 = vand.u32 2147483647, %v7912_v56  ;;  %v2906_v50 = vsub.f32 0.0, %v9229_v16  ;;  %v2940_v19 = vmul.f32 1.442695, %v2902_v54  ;;  %4238 = vpow2.f32 %v2936_v43 }
 0x404   : > { %9225 = vst [vmem:[#allocation84_spill] sm:$0xff] %v7904_v63  ;;  %v2907_v5 = vsub.f32 0.0, %v9230_v36  ;;  %v9231_v2 = vand.u32 2147483647, %v7735_v60  ;;  %v9232_v12 = vand.u32 2147483647, %v7750_v44  ;;  %4240 = vpow2.f32 %v2938_v49 }
 0x405   : > { %9227 = vst [vmem:[#allocation85_spill] sm:$0xff] %v7912_v56  ;;  %v2942_v25 = vmul.f32 1.442695, %v2903_v20  ;;  %v9233_v47 = vand.u32 2147483647, %v7756_v46  ;;  %4242 = vpow2.f32 %v2940_v19  ;;  %vm9428_vm11 = vcmask 0  }
 0x406   : > { %v2908_v4 = vsub.f32 0.0, %v9231_v2  ;;  %v2909_v9 = vsub.f32 0.0, %v9232_v12  ;;  %v9234_v29 = vand.u32 2147483647, %v7762_v40  ;;  %v2944_v16 = vmul.f32 1.442695, %v2904_v28 }
 0x407   : > { %v2910_v6 = vsub.f32 0.0, %v9233_v47  ;;  %v9235_v36 = vand.u32 2147483647, %v7777_v45  ;;  %v9236_v54 = vand.u32 2147483647, %v7783_v22  ;;  %4244 = vpow2.f32 %v2942_v25 }
 0x408   : > { %v2911_v42 = vsub.f32 0.0, %v9234_v29  ;;  %v2946_v2 = vmul.f32 1.442695, %v2905_v52  ;;  %v9237_v12 = vand.u32 2147483647, %v7789_v62  ;;  %v4233_v29 = vpop.eup %4232  ;;  %4246 = vpow2.f32 %v2944_v16 }
 0x409   : > { %v2912_v30 = vsub.f32 0.0, %v9235_v36  ;;  %v2913_v41 = vsub.f32 0.0, %v9236_v54  ;;  %v9238_v20 = vand.u32 2147483647, %v7808_v38  ;;  %v2948_v10 = vmul.f32 1.442695, %v2906_v50  ;;  %v4235_v49 = vpop.eup %4234 }
 0x40a   : > { %v2914_v17 = vsub.f32 0.0, %v9237_v12  ;;  %v9239_v28 = vand.u32 2147483647, %v7814_v32  ;;  %v9240_v36 = vand.u32 2147483647, %v7820_v21  ;;  %v4237_v19 = vpop.eup %4236  ;;  %4248 = vpow2.f32 %v2946_v2 }
 0x40b   : > { %v2915_v47 = vsub.f32 0.0, %v9238_v20  ;;  %v2950_v54 = vmul.f32 1.442695, %v2907_v5  ;;  %v9241_v52 = vand.u32 2147483647, %v7829_v55  ;;  %v4239_v25 = vpop.eup %4238  ;;  %4250 = vpow2.f32 %v2948_v10 }
 0x40c   : > { %v2916_v43 = vsub.f32 0.0, %v9239_v28  ;;  %v2917_v3 = vsub.f32 0.0, %v9240_v36  ;;  %v9242_v12 = vand.u32 2147483647, %v7835_v31  ;;  %v2952_v20 = vmul.f32 1.442695, %v2908_v4  ;;  %v4241_v31 = vpop.eup %4240 }
 0x40d   : > { %v2918_v51 = vsub.f32 0.0, %v9241_v52  ;;  %v9243_v50 = vand.u32 2147483647, %v7844_v57  ;;  %v9244_v28 = vand.u32 2147483647, %v7850_v39  ;;  %v2925_v16 = vsub.f32 0.0, %v2893_v33  ;;  %v4243_v55 = vpop.eup %4242 }
 0x40e   : > { %v2919_v56 = vsub.f32 0.0, %v9242_v12  ;;  %v2954_v36 = vmul.f32 1.442695, %v2909_v9  ;;  %v9245_v5 = vand.u32 2147483647, %v7859_v53  ;;  %v2924_v12 = vsub.f32 0.0, %v2892_v37 }
 0x40f   : > { %v2920_v63 = vsub.f32 0.0, %v9243_v50  ;;  %v2921_v27 = vsub.f32 0.0, %v9244_v28  ;;  %v2956_v52 = vmul.f32 1.442695, %v2910_v6  ;;  %4252 = vpow2.f32 %v2950_v54  ;;  %v4245_v28 = vpop.eup %4244 }
 0x410   : > { %v2922_v26 = vsub.f32 0.0, %v9245_v5  ;;  %v2958_v4 = vmul.f32 1.442695, %v2911_v42  ;;  %v2926_v57 = vsub.f32 0.0, %v2894_v14  ;;  %v2927_v50 = vsub.f32 0.0, %v2895_v1  ;;  %v4247_v53 = vpop.eup %4246 }
 0x411   : > { %4254 = vpow2.f32 %v2952_v20  ;;  %v2960_v39 = vmul.f32 1.442695, %v2912_v30  ;;  %v2962_v9 = vmul.f32 1.442695, %v2913_v41  ;;  %v2964_v2 = vmul.f32 1.442695, %v2914_v17  ;;  %v4249_v5 = vpop.eup %4248 }
 0x412   : > { %4256 = vpow2.f32 %v2954_v36  ;;  %v2966_v21 = vmul.f32 1.442695, %v2915_v47  ;;  %v2968_v11 = vmul.f32 1.442695, %v2916_v43  ;;  %v2970_v10 = vmul.f32 1.442695, %v2917_v3  ;;  %v4251_v54 = vpop.eup %4250 }
 0x413   : > { %4258 = vpow2.f32 %v2956_v52  ;;  %v2972_v6 = vmul.f32 1.442695, %v2918_v51  ;;  %v2974_v37 = vmul.f32 1.442695, %v2919_v56  ;;  %v2976_v33 = vmul.f32 1.442695, %v2920_v63 }
 0x414   : > { %4260 = vpow2.f32 %v2958_v4  ;;  %v2978_v42 = vmul.f32 1.442695, %v2921_v27  ;;  %v2980_v14 = vmul.f32 1.442695, %v2922_v26  ;;  %v2982_v1 = vmul.f32 1.442695, %v2923_v7 }
 0x415   : > { %4262 = vpow2.f32 %v2960_v39  ;;  %v2984_v30 = vmul.f32 1.442695, %v2924_v12  ;;  %v4253_v20 = vpop.eup %4252  ;;  %v2986_v41 = vmul.f32 1.442695, %v2925_v16  ;;  %v2988_v17 = vmul.f32 1.442695, %v2926_v57 }
 0x416   : > { %4264 = vpow2.f32 %v2962_v9  ;;  %v7951_v47 = vmul.f32 1.442695, %v2927_v50  ;;  %v7953_v3 = vadd.f32 1.0, %v4231_v34  ;;  %v7955_v51 = vadd.f32 1.0, %v4233_v29 }
 0x417   : > { %v4255_v36 = vpop.eup %4254  ;;  %4266 = vpow2.f32 %v2964_v2  ;;  %v7957_v56 = vadd.f32 1.0, %v4235_v49  ;;  %v7959_v39 = vadd.f32 1.0, %v4237_v19  ;;  %v3152_v26 = vsub.f32 0.0, %v7634_v61 }
 0x418   : > { %v4257_v27 = vpop.eup %4256  ;;  %4268 = vpow2.f32 %v2966_v21  ;;  %v7963_v57 = vadd.f32 1.0, %v4239_v25  ;;  %v3153_v34 = vsub.f32 0.0, %v7657_v23  ;;  %v7967_v49 = vadd.f32 1.0, %v4241_v31 }
 0x419   : > { %v4259_v63 = vpop.eup %4258  ;;  %4270 = vpow2.f32 %v2968_v11  ;;  %v3154_v19 = vsub.f32 0.0, %v7663_v58  ;;  %v7971_v12 = vadd.f32 1.0, %v4243_v55  ;;  %v3155_v25 = vsub.f32 0.0, %v7674_v8 }
 0x41a   : > { %v4261_v29 = vpop.eup %4260  ;;  %4272 = vpow2.f32 %v2970_v10  ;;  %v7975_v50 = vadd.f32 1.0, %v4245_v28  ;;  %v7978_v31 = vmax.f32 %v3152_v26, 0.0  ;;  %v7980_v11 = vadd.f32 1.0, %v4247_v53 }
 0x41b   : > { %v4263_v52 = vpop.eup %4262  ;;  %4274 = vpow2.f32 %v2972_v6  ;;  %v3156_v10 = vsub.f32 0.0, %v7680_v59  ;;  %v7983_v55 = vmax.f32 %v3153_v34, 0.0  ;;  %v7985_v16 = vadd.f32 1.0, %v4249_v5 }
 0x41c   : > { %v4265_v4 = vpop.eup %4264  ;;  %4276 = vpow2.f32 %v2974_v37  ;;  %9246 = vst [vmem:[#allocation86_spill] sm:$0xff] %v7978_v31  ;;  %v7988_v28 = vmax.f32 %v3154_v19, 0.0  ;;  %v7990_v26 = vadd.f32 1.0, %v4251_v54  ;;  %v7993_v53 = vmax.f32 %v3155_v25, 0.0 }
 0x41d   : > { %v4267_v2 = vpop.eup %4266  ;;  %4278 = vpow2.f32 %v2976_v33  ;;  %9247 = vst [vmem:[#allocation87_spill] sm:$0xff] %v7983_v55  ;;  %v3157_v33 = vsub.f32 0.0, %v7686_v18  ;;  %v7995_v34 = vadd.f32 1.0, %v4253_v20  ;;  %v3158_v5 = vsub.f32 0.0, %v7697_v24 }
 0x41e   : > { %v4269_v6 = vpop.eup %4268  ;;  %4280 = vpow2.f32 %v2978_v42  ;;  %9248 = vst [vmem:[#allocation88_spill] sm:$0xff] %v7988_v28  ;;  %v7999_v19 = vadd.f32 1.0, %v4255_v36  ;;  %v8001_v37 = vadd.f32 1.0, %v4257_v27  ;;  %v8003_v54 = vmax.f32 %v3156_v10, 0.0  ;;  %v9267_v28 = vld [vmem:[#allocation77_spill] sm:$0xff] }
 0x41f   : > { %v4271_v21 = vpop.eup %4270  ;;  %4282 = vpow2.f32 %v2980_v14  ;;  %9249 = vst [vmem:[#allocation89_spill] sm:$0xff] %v7993_v53  ;;  %v8005_v25 = vadd.f32 1.0, %v4259_v63  ;;  %v3159_v20 = vsub.f32 0.0, %v7703_v35  ;;  %v8009_v42 = vadd.f32 1.0, %v4261_v29 }
 0x420   : > { %v4273_v9 = vpop.eup %4272  ;;  %4284 = vpow2.f32 %v2982_v1  ;;  %9250 = vst [vmem:[#allocation90_spill] sm:$0xff] %v8003_v54  ;;  %v8012_v36 = vmax.f32 %v3157_v33, 0.0  ;;  %v8015_v10 = vadd.f32 1.0, %v4263_v52  ;;  %v8018_v63 = vmax.f32 %v3158_v5, 0.0 }
 0x421   : > { %v4275_v43 = vpop.eup %4274  ;;  %4286 = vpow2.f32 %v2984_v30  ;;  %v8020_v54 = vadd.f32 1.0, %v4265_v4  ;;  %v3161_v29 = vsub.f32 0.0, %v7716_v0  ;;  %v8025_v30 = vadd.f32 1.0, %v4267_v2 }
 0x422   : > { %v4277_v14 = vpop.eup %4276  ;;  %4288 = vpow2.f32 %v2986_v41  ;;  %9251 = vst [vmem:[#allocation91_spill] sm:$0xff] %v8012_v36  ;;  %v3160_v41 = vsub.f32 0.0, %v7710_v15  ;;  %v8027_v36 = vadd.f32 1.0, %v4269_v6  ;;  %v8032_v5 = vadd.f32 1.0, %v4271_v21 }
 0x423   : > { %v4279_v7 = vpop.eup %4278  ;;  %4290 = vpow2.f32 %v2988_v17  ;;  %9252 = vst [vmem:[#allocation92_spill] sm:$0xff] %v8018_v63  ;;  %v3162_v4 = vsub.f32 0.0, %v7722_v48  ;;  %v8037_v63 = vadd.f32 1.0, %v4273_v9  ;;  %v8047_v21 = vmax.f32 %v3161_v29, 0.0 }
 0x424   : > { %v4281_v27 = vpop.eup %4280  ;;  %4292 = vpow2.f32 %v7951_v47  ;;  %v8030_v47 = vmax.f32 %v3159_v20, 0.0  ;;  %v8041_v6 = vmax.f32 %v3160_v41, 0.0  ;;  %v8043_v20 = vadd.f32 1.0, %v4275_v43 }
 0x425   : > { %v4283_v1 = vpop.eup %4282  ;;  %4294 = vlog2.f32 %v7953_v3  ;;  %9255 = vst [vmem:[#allocation95_spill] sm:$0xff] %v8047_v21  ;;  %v3164_v9 = vsub.f32 0.0, %v7735_v60  ;;  %v8054_v2 = vadd.f32 1.0, %v4279_v7  ;;  %v8056_v43 = vadd.f32 1.0, %v4281_v27 }
 0x426   : > { %v4285_v33 = vpop.eup %4284  ;;  %4296 = vlog2.f32 %v7955_v51  ;;  %9253 = vst [vmem:[#allocation93_spill] sm:$0xff] %v8030_v47  ;;  %v8049_v47 = vadd.f32 1.0, %v4277_v14  ;;  %v8061_v21 = vadd.f32 1.0, %v4283_v1  ;;  %v3165_v14 = vsub.f32 0.0, %v7750_v44 }
 0x427   : > { %v4287_v52 = vpop.eup %4286  ;;  %4298 = vlog2.f32 %v7957_v56  ;;  %9254 = vst [vmem:[#allocation94_spill] sm:$0xff] %v8041_v6  ;;  %v3163_v56 = vsub.f32 0.0, %v7729_v13  ;;  %v8066_v6 = vadd.f32 1.0, %v4285_v33 }
 0x428   : > { %v4289_v17 = vpop.eup %4288  ;;  %4300 = vlog2.f32 %v7959_v39 }
 0x429   : > { %v4291_v51 = vpop.eup %4290  ;;  %4302 = vlog2.f32 %v7963_v57  ;;  %v8059_v57 = vmax.f32 %v3162_v4, 0.0  ;;  %v8070_v27 = vmax.f32 %v3163_v56, 0.0  ;;  %v8072_v4 = vadd.f32 1.0, %v4287_v52 }
 0x42a   : > { %v4293_v3 = vpop.eup %4292  ;;  %4304 = vlog2.f32 %v7967_v49  ;;  %v8074_v1 = vadd.f32 1.0, %v4289_v17  ;;  %v8088_v52 = vmax.f32 %v3165_v14, 0.0 }
 0x42b   : > { %v4295_v41 = vpop.eup %4294  ;;  %4306 = vlog2.f32 %v7971_v12  ;;  %9256 = vst [vmem:[#allocation96_spill] sm:$0xff] %v8059_v57  ;;  %v8079_v57 = vadd.f32 1.0, %v4291_v51  ;;  %v8084_v7 = vadd.f32 1.0, %v4293_v3 }
 0x42c   : > { %v4297_v29 = vpop.eup %4296  ;;  %4308 = vlog2.f32 %v7975_v50  ;;  %9257 = vst [vmem:[#allocation97_spill] sm:$0xff] %v8070_v27  ;;  %v8077_v50 = vmax.f32 %v3164_v9, 0.0  ;;  %v8090_v9 = vmul.f32 0.6931472, %v4295_v41  ;;  %v9262_v41 = vld [vmem:[#allocation72_spill] sm:$0xff]  ;;  %v9265_v27 = vld [vmem:[#allocation75_spill] sm:$0xff] }
 0x42d   : > { %v4299_v39 = vpop.eup %4298  ;;  %4310 = vlog2.f32 %v7980_v11  ;;  %9259 = vst [vmem:[#allocation99_spill] sm:$0xff] %v8079_v57  ;;  %v8095_v33 = vmul.f32 0.6931472, %v4297_v29  ;;  %v9264_v29 = vld [vmem:[#allocation74_spill] sm:$0xff] }
 0x42e   : > { %v4301_v12 = vpop.eup %4300  ;;  %4312 = vlog2.f32 %v7985_v16  ;;  %9258 = vst [vmem:[#allocation98_spill] sm:$0xff] %v8077_v50  ;;  %v8100_v17 = vmul.f32 0.6931472, %v4299_v39 }
 0x42f   : > { %v4303_v49 = vpop.eup %4302  ;;  %4314 = vlog2.f32 %v7990_v26  ;;  %9260 = vst [vmem:[#allocation100_spill] sm:$0xff] %v8084_v7  ;;  %v8105_v51 = vmul.f32 0.6931472, %v4301_v12  ;;  %v9268_v12 = vld [vmem:[#allocation79_spill] sm:$0xff] }
 0x430   : > { %v4305_v56 = vpop.eup %4304  ;;  %4316 = vlog2.f32 %v7995_v34  ;;  %9261 = vst [vmem:[#allocation101_spill] sm:$0xff] %v8088_v52  ;;  %v9263_v52 = vld [vmem:[#allocation73_spill] sm:$0xff]  ;;  %v8110_v3 = vmul.f32 0.6931472, %v4303_v49  ;;  %v9270_v49 = vld [vmem:[#allocation83_spill] sm:$0xff] }
 0x431   : > { %v4307_v16 = vpop.eup %4306  ;;  %4318 = vlog2.f32 %v7999_v19  ;;  %v8115_v26 = vmul.f32 0.6931472, %v4305_v56 }
 0x432   : > { %v4309_v11 = vpop.eup %4308  ;;  %4320 = vlog2.f32 %v8001_v37  ;;  %v8120_v34 = vmul.f32 0.6931472, %v4307_v16 }
 0x433   : > { %v4311_v14 = vpop.eup %4310  ;;  %4322 = vlog2.f32 %v8005_v25  ;;  %v8125_v19 = vmul.f32 0.6931472, %v4309_v11  ;;  %v9274_v11 = vmax.f32 %v7657_v23, 0.0 }
 0x434   : > { %v4313_v50 = vpop.eup %4312  ;;  %4324 = vlog2.f32 %v8009_v42  ;;  %v9273_v42 = vmax.f32 %v7634_v61, 0.0  ;;  %v8134_v31 = vmul.f32 0.6931472, %v4311_v14  ;;  %v9275_v61 = vmax.f32 %v7663_v58, 0.0 }
 0x435   : > { %v4315_v53 = vpop.eup %4314  ;;  %4326 = vlog2.f32 %v8015_v10  ;;  %v8142_v25 = vadd.f32 %v9274_v11, %v8095_v33 }
 0x436   : > { %v4317_v55 = vpop.eup %4316  ;;  %4328 = vlog2.f32 %v8020_v54  ;;  %v8132_v37 = vadd.f32 %v9273_v42, %v8090_v9  ;;  %v8144_v10 = vmul.f32 0.6931472, %v4315_v53  ;;  %v8150_v42 = vadd.f32 %v9275_v61, %v8100_v17 }
 0x437   : > { %v4319_v7 = vpop.eup %4318  ;;  %4330 = vlog2.f32 %v8025_v30  ;;  %v8136_v30 = vmul.f32 0.6931472, %v4313_v50  ;;  %v9276_v50 = vmax.f32 %v7674_v8, 0.0  ;;  %v8157_v54 = vmul.f32 0.6931472, %v4317_v55 }
 0x438   : > { %v4321_v39 = vpop.eup %4320  ;;  %4332 = vlog2.f32 %v8027_v36  ;;  %v8159_v23 = vmul.f32 0.6931472, %v4319_v7  ;;  %v9277_v53 = vmax.f32 %v7680_v59, 0.0  ;;  %v9278_v8 = vmax.f32 %v7686_v18, 0.0 }
 0x439   : > { %v4323_v16 = vpop.eup %4322  ;;  %4334 = vlog2.f32 %v8032_v5  ;;  %v8155_v14 = vadd.f32 %v9276_v50, %v8105_v51  ;;  %v8167_v11 = vmul.f32 0.6931472, %v4321_v39  ;;  %v9279_v55 = vmax.f32 %v7697_v24, 0.0 }
 0x43a   : > { %v4325_v36 = vpop.eup %4324  ;;  %4336 = vlog2.f32 %v8037_v63  ;;  %v8165_v63 = vadd.f32 %v9277_v53, %v8110_v3  ;;  %v8172_v61 = vadd.f32 %v9278_v8, %v8115_v26  ;;  %v8184_v53 = vmul.f32 0.6931472, %v4323_v16 }
 0x43b   : > { %v4327_v5 = vpop.eup %4326  ;;  %4338 = vlog2.f32 %v8043_v20  ;;  %v8177_v7 = vadd.f32 %v9279_v55, %v8120_v34  ;;  %v9281_v20 = vmax.f32 %v7703_v35, 0.0  ;;  %v9282_v18 = vmax.f32 %v7710_v15, 0.0 }
 0x43c   : > { %v4329_v58 = vpop.eup %4328  ;;  %4340 = vlog2.f32 %v8049_v47  ;;  %v9283_v24 = vmax.f32 %v7716_v0, 0.0  ;;  %v9284_v35 = vmax.f32 %v7722_v48, 0.0  ;;  %v9286_v0 = vmax.f32 %v7729_v13, 0.0 }
 0x43d   : > { %9280 = vst [vmem:[#allocation77_spill] sm:$0xff] %v8177_v7  ;;  %v8182_v50 = vadd.f32 %v9281_v20, %v8125_v19  ;;  %v4331_v59 = vpop.eup %4330  ;;  %v8190_v39 = vadd.f32 %v9282_v18, %v8134_v31  ;;  %v8197_v7 = vmul.f32 0.6931472, %v4325_v36  ;;  %4342 = vlog2.f32 %v8054_v2 }
 0x43e   : > { %v8195_v8 = vadd.f32 %v9283_v24, %v8136_v30  ;;  %v4333_v55 = vpop.eup %4332  ;;  %v8203_v16 = vadd.f32 %v9284_v35, %v8144_v10  ;;  %v8206_v20 = vmul.f32 0.6931472, %v4327_v5  ;;  %v8211_v18 = vadd.f32 %v9286_v0, %v8157_v54 }
 0x43f   : > { %v4335_v15 = vpop.eup %4334  ;;  %v9288_v36 = vmax.f32 %v7735_v60, 0.0  ;;  %v8219_v35 = vmul.f32 0.6931472, %v4329_v58  ;;  %4344 = vlog2.f32 %v8056_v43  ;;  %v9290_v5 = vmax.f32 %v7750_v44, 0.0 }
 0x440   : > { %9285 = vst [vmem:[#allocation79_spill] sm:$0xff] %v8206_v20  ;;  %v4337_v48 = vpop.eup %4336  ;;  %v8230_v60 = vmul.f32 0.6931472, %v4333_v55  ;;  %v8238_v43 = vmul.f32 0.6931472, %v4335_v15  ;;  %4346 = vlog2.f32 %v8061_v21  ;;  %v9297_v44 = vmax.f32 %v7762_v40, 0.0 }
 0x441   : > { %9287 = vst [vmem:[#allocation83_spill] sm:$0xff] %v8211_v18  ;;  %v8216_v24 = vadd.f32 %v9288_v36, %v8159_v23  ;;  %v8225_v47 = vadd.f32 %v9290_v5, %v8167_v11  ;;  %v4339_v0 = vpop.eup %4338  ;;  %v8228_v18 = vmul.f32 0.6931472, %v4331_v59  ;;  %v9294_v36 = vmax.f32 %v7756_v46, 0.0 }
 0x442   : > { %9289 = vst [vmem:[#allocation102_spill] sm:$0xff] %v8219_v35  ;;  %v8244_v5 = vadd.f32 %v9297_v44, %v8197_v7  ;;  %v4341_v55 = vpop.eup %4340  ;;  %v8247_v13 = vmul.f32 0.6931472, %v4337_v48  ;;  %4348 = vlog2.f32 %v8066_v6  ;;  %v9303_v44 = vmax.f32 %v7783_v22, 0.0 }
 0x443   : > { %9291 = vst [vmem:[#allocation103_spill] sm:$0xff] %v8225_v47  ;;  %v8235_v2 = vadd.f32 %v9294_v36, %v8184_v53  ;;  %v9300_v36 = vmax.f32 %v7777_v45, 0.0  ;;  %v4343_v21 = vpop.eup %4342  ;;  %v8256_v47 = vmul.f32 0.6931472, %v4339_v0  ;;  %4350 = vlog2.f32 %v8072_v4 }
 0x444   : > { %9292 = vst [vmem:[#allocation104_spill] sm:$0xff] %v8228_v18  ;;  %v8262_v59 = vadd.f32 %v9303_v44, %v8219_v35  ;;  %v9307_v0 = vmax.f32 %v7808_v38, 0.0  ;;  %4352 = vlog2.f32 %v8074_v1  ;;  %v9310_v4 = vmax.f32 %v7814_v32, 0.0  ;;  %v9317_v1 = vld [vmem:[#allocation100_spill] sm:$0xff] }
 0x445   : > { %9293 = vst [vmem:[#allocation105_spill] sm:$0xff] %v8230_v60  ;;  %v8286_v48 = vmul.f32 0.6931472, %v4343_v21  ;;  %v9325_v21 = vld [vmem:[#allocation49_spill] sm:$0xff] }
 0x446   : > { %9295 = vst [vmem:[#allocation106_spill] sm:$0xff] %v8235_v2  ;;  %v8252_v2 = vadd.f32 %v9300_v36, %v8206_v20  ;;  %v9305_v36 = vmax.f32 %v7789_v62, 0.0  ;;  %v8274_v58 = vadd.f32 %v9307_v0, %v8230_v60  ;;  %v8283_v44 = vadd.f32 %v9310_v4, %v8238_v43  ;;  %v9332_v20 = vld [vmem:[#allocation52_spill] sm:$0xff] }
 0x447   : > { %9296 = vst [vmem:[#allocation107_spill] sm:$0xff] %v8238_v43  ;;  %v9314_v0 = vmax.f32 %v9262_v41, 0.0  ;;  %v9318_v4 = vmax.f32 %v9263_v52, 0.0  ;;  %v9320_v43 = vld [vmem:[#allocation86_spill] sm:$0xff]  ;;  %v9327_v52 = vld [vmem:[#allocation51_spill] sm:$0xff] }
 0x448   : > { %9298 = vst [vmem:[#allocation108_spill] sm:$0xff] %v8244_v5  ;;  %v8269_v15 = vadd.f32 %v9305_v36, %v8228_v18  ;;  %v8277_v5 = vmul.f32 0.6931472, %v4341_v55  ;;  %v9316_v55 = vld [vmem:[#allocation76_spill] sm:$0xff]  ;;  %v9326_v36 = vld [vmem:[#allocation50_spill] sm:$0xff]  ;;  %v3282_v18 = vsub.f32 1.0, %v9327_v52 }
 0x449   : > { %9299 = vst [vmem:[#allocation109_spill] sm:$0xff] %v8247_v13  ;;  %v8292_v6 = vadd.f32 %v9314_v0, %v8247_v13  ;;  %v3216_v0 = vadd.f32 %v9320_v43, %v8090_v9  ;;  %v9322_v13 = vld [vmem:[#allocation88_spill] sm:$0xff] }
 0x44a   : > { %9301 = vst [vmem:[#allocation110_spill] sm:$0xff] %v8252_v2  ;;  %v4345_v2 = vpop.eup %4344 }
 0x44b   : > { %9302 = vst [vmem:[#allocation111_spill] sm:$0xff] %v8256_v47 }
 0x44c   : > { %9304 = vst [vmem:[#allocation112_spill] sm:$0xff] %v8262_v59  ;;  %v4347_v59 = vpop.eup %4346 }
 0x44d   : > { %9306 = vst [vmem:[#allocation113_spill] sm:$0xff] %v8269_v15  ;;  %v9313_v15 = vld [vmem:[#allocation99_spill] sm:$0xff]  ;;  %v4349_v60 = vpop.eup %4348  ;;  %v8319_v9 = vmul.f32 0.6931472, %v4347_v59  ;;  %v3283_v59 = vsub.f32 1.0, %v9332_v20 }
 0x44e   : > { %9308 = vst [vmem:[#allocation114_spill] sm:$0xff] %v8274_v58  ;;  %4354 = vlog2.f32 %v9313_v15  ;;  %v8303_v15 = vmul.f32 0.6931472, %v4345_v2  ;;  %v3281_v2 = vsub.f32 1.0, %v9326_v36  ;;  %v4351_v35 = vpop.eup %4350  ;;  %v8346_v57 = vmul.f32 0.6931472, %v4349_v60 }
 0x44f   : > { %9309 = vst [vmem:[#allocation115_spill] sm:$0xff] %v8277_v5  ;;  %4356 = vlog2.f32 %v9317_v1  ;;  %v3218_v1 = vadd.f32 %v9322_v13, %v8100_v17  ;;  %v9330_v17 = vld [vmem:[#allocation81_spill] sm:$0xff]  ;;  %v3315_v60 = vmul.f32 %v3283_v59, %v8155_v14  ;;  %v9344_v14 = vsub.f32 0.0, %v7777_v45 }
 0x450   : > { %9311 = vst [vmem:[#allocation116_spill] sm:$0xff] %v8283_v44  ;;  %v8299_v44 = vadd.f32 %v9318_v4, %v8256_v47  ;;  %v9323_v4 = vmax.f32 %v9264_v29, 0.0  ;;  %v3280_v47 = vsub.f32 1.0, %v9325_v21  ;;  %v9331_v29 = vld [vmem:[#allocation89_spill] sm:$0xff] }
 0x451   : > { %9312 = vst [vmem:[#allocation117_spill] sm:$0xff] %v8286_v48  ;;  %v3219_v41 = vadd.f32 %v9331_v29, %v8105_v51  ;;  %v3313_v51 = vmul.f32 %v3281_v2, %v8142_v25  ;;  %v3314_v29 = vmul.f32 %v3282_v18, %v8150_v42  ;;  %v9349_v45 = vld [vmem:[#allocation77_spill] sm:$0xff] }
 0x452   : > { %9315 = vst [vmem:[#allocation99_spill] sm:$0xff] %v8292_v6  ;;  %v9321_v6 = vld [vmem:[#allocation87_spill] sm:$0xff]  ;;  %v3312_v56 = vmul.f32 %v3280_v47, %v8132_v37  ;;  %v9340_v47 = vld [vmem:[#allocation54_spill] sm:$0xff] }
 0x453   : > { %9319 = vst [vmem:[#allocation76_spill] sm:$0xff] %v8299_v44  ;;  %v3217_v58 = vadd.f32 %v9321_v6, %v8095_v33  ;;  %v8314_v44 = vadd.f32 %v9323_v4, %v8277_v5  ;;  %v9328_v33 = vmax.f32 %v9265_v27, 0.0  ;;  %v4353_v4 = vpop.eup %4352  ;;  %v9333_v27 = vld [vmem:[#allocation90_spill] sm:$0xff]  ;;  %v3250_v6 = vmul.f32 %v3218_v1, %v9327_v52  ;;  %v9339_v37 = vld [vmem:[#allocation91_spill] sm:$0xff]  ;;  %v9341_v1 = vld [vmem:[#allocation92_spill] sm:$0xff] }
 0x454   : > { %v8333_v32 = vpop.eup %4354  ;;  %v3221_v25 = vadd.f32 %v9339_v37, %v8115_v26  ;;  %v3251_v42 = vmul.f32 %v3219_v41, %v9332_v20  ;;  %v3285_v18 = vsub.f32 1.0, %v9340_v47  ;;  %v9343_v41 = vmax.f32 %v9267_v28, 0.0 }
 0x455   : > { %9324 = vst [vmem:[#allocation100_spill] sm:$0xff] %v8314_v44  ;;  %v8324_v43 = vadd.f32 %v9328_v33, %v8286_v48  ;;  %v3220_v33 = vadd.f32 %v9333_v27, %v8110_v3  ;;  %v3249_v13 = vmul.f32 %v3217_v58, %v9326_v36  ;;  %v8340_v48 = vpop.eup %4356  ;;  %v9334_v44 = vld [vmem:[#allocation53_spill] sm:$0xff]  ;;  %v9335_v27 = vmax.f32 %v9316_v55, 0.0 }
 0x456   : > { %v3284_v5 = vsub.f32 1.0, %v9334_v44  ;;  %v9337_v58 = vsub.f32 0.0, %v7756_v46  ;;  %v9338_v36 = vsub.f32 0.0, %v7762_v40  ;;  %v3222_v46 = vadd.f32 %v9341_v1, %v8120_v34  ;;  %v9345_v34 = vld [vmem:[#allocation93_spill] sm:$0xff] }
 0x457   : > { %9329 = vst [vmem:[#allocation86_spill] sm:$0xff] %v8324_v43  ;;  %v3248_v43 = vmul.f32 %v3216_v0, %v9325_v21  ;;  %v8351_v3 = vadd.f32 %v9335_v27, %v8303_v15  ;;  %v8366_v0 = vmul.f32 0.6931472, %v4351_v35  ;;  %v3252_v2 = vmul.f32 %v3220_v33, %v9334_v44  ;;  %v9342_v27 = vld [vmem:[#allocation55_spill] sm:$0xff]  ;;  %v9346_v44 = vld [vmem:[#allocation94_spill] sm:$0xff] }
 0x458   : > { %v8355_v52 = vmax.f32 %v9337_v58, 0.0  ;;  %v8359_v21 = vmax.f32 %v9338_v36, 0.0  ;;  %v3286_v40 = vsub.f32 1.0, %v9342_v27  ;;  %v3316_v58 = vmul.f32 %v3284_v5, %v8165_v63 }
 0x459   : > { %9336 = vst [vmem:[#allocation87_spill] sm:$0xff] %v8351_v3  ;;  %v3344_v36 = vadd.f32 %v3312_v56, %v3248_v43  ;;  %v3345_v3 = vadd.f32 %v3313_v51, %v3249_v13  ;;  %v3346_v26 = vadd.f32 %v3314_v29, %v3250_v6  ;;  %v8376_v20 = vadd.f32 %v9343_v41, %v8319_v9  ;;  %v9347_v56 = vld [vmem:[#allocation56_spill] sm:$0xff]  ;;  %v9348_v51 = vld [vmem:[#allocation57_spill] sm:$0xff] }
 0x45a   : > { %v8380_v35 = vmax.f32 %v9344_v14, 0.0  ;;  %v3223_v59 = vadd.f32 %v9345_v34, %v8125_v19  ;;  %v3224_v33 = vadd.f32 %v9346_v44, %v8134_v31  ;;  %v3253_v63 = vmul.f32 %v3221_v25, %v9340_v47  ;;  %v9354_v34 = vld [vmem:[#allocation59_spill] sm:$0xff] }
 0x45b   : > { %v3287_v5 = vsub.f32 1.0, %v9347_v56  ;;  %v3317_v43 = vmul.f32 %v3285_v18, %v8172_v61  ;;  %v3347_v13 = vadd.f32 %v3315_v60, %v3251_v42  ;;  %v3254_v6 = vmul.f32 %v3222_v46, %v9342_v27  ;;  %v9351_v61 = vld [vmem:[#allocation95_spill] sm:$0xff]  ;;  %v9352_v46 = vld [vmem:[#allocation58_spill] sm:$0xff] }
 0x45c   : > { %v3288_v29 = vsub.f32 1.0, %v9348_v51  ;;  %v3318_v37 = vmul.f32 %v3286_v40, %v9349_v45  ;;  %v3348_v1 = vadd.f32 %v3316_v58, %v3252_v2  ;;  %v3377_v19 = vsel %vm3376_vm13, %v3344_v36, 0.0  ;;  %v9353_v36 = vld [vmem:[#allocation96_spill] sm:$0xff] }
 0x45d   : > { %v3378_v41 = vsel %vm3376_vm13, %v3345_v3, 0.0  ;;  %v3380_v31 = vsel %vm3376_vm13, %v3346_v26, 0.0  ;;  %v9350_v25 = vsub.f32 0.0, %v7783_v22  ;;  %v3225_v42 = vadd.f32 %v9351_v61, %v8136_v30 }
 0x45e   : > { %v3255_v18 = vmul.f32 %v3223_v59, %v9347_v56  ;;  %v3379_v60 = vadd.f32 %v3378_v41, %v3377_v19  ;;  %v3289_v27 = vsub.f32 1.0, %v9352_v46  ;;  %v3319_v2 = vmul.f32 %v3287_v5, %v8182_v50 }
 0x45f   : > { %v8397_v47 = vmax.f32 %v9350_v25, 0.0  ;;  %v3349_v40 = vadd.f32 %v3317_v43, %v3253_v63  ;;  %v3382_v58 = vsel %vm3376_vm13, %v3347_v13, 0.0  ;;  %v8405_v3 = vmul.f32 0.6931472, %v4353_v4  ;;  %v9356_v4 = vld [vmem:[#allocation97_spill] sm:$0xff] }
 0x460   : > { %v3226_v22 = vadd.f32 %v9353_v36, %v8144_v10  ;;  %v3256_v26 = vmul.f32 %v3224_v33, %v9348_v51  ;;  %v3381_v14 = vadd.f32 %v3380_v31, %v3379_v60  ;;  %v3290_v30 = vsub.f32 1.0, %v9354_v34  ;;  %v9357_v33 = vld [vmem:[#allocation60_spill] sm:$0xff]  ;;  %v9362_v60 = vld [vmem:[#allocation101_spill] sm:$0xff] }
 0x461   : > { %v3320_v59 = vmul.f32 %v3288_v29, %v8190_v39  ;;  %v3350_v44 = vadd.f32 %v3318_v37, %v3254_v6  ;;  %v3384_v56 = vsel %vm3376_vm13, %v3348_v1, 0.0  ;;  %v9355_v50 = vmax.f32 %v9268_v12, 0.0  ;;  %v9359_v37 = vld [vmem:[#allocation98_spill] sm:$0xff] }
 0x462   : > { %v3227_v5 = vadd.f32 %v9356_v4, %v8157_v54  ;;  %v3257_v10 = vmul.f32 %v3225_v42, %v9352_v46  ;;  %v3383_v43 = vadd.f32 %v3382_v58, %v3381_v14  ;;  %v3291_v13 = vsub.f32 1.0, %v9357_v33  ;;  %v9360_v54 = vld [vmem:[#allocation61_spill] sm:$0xff]  ;;  %v9367_v4 = vld [vmem:[#allocation64_spill] sm:$0xff] }
 0x463   : > { %v8416_v63 = vadd.f32 %v9355_v50, %v8346_v57  ;;  %v3321_v51 = vmul.f32 %v3289_v27, %v8195_v8  ;;  %v3351_v45 = vadd.f32 %v3319_v2, %v3255_v18  ;;  %v3386_v39 = vsel %vm3376_vm13, %v3349_v40, 0.0  ;;  %v9364_v40 = vld [vmem:[#allocation83_spill] sm:$0xff] }
 0x464   : > { %v9358_v6 = vsub.f32 0.0, %v7789_v62  ;;  %v3228_v1 = vadd.f32 %v9359_v37, %v8159_v23  ;;  %v3258_v19 = vmul.f32 %v3226_v22, %v9354_v34  ;;  %v3385_v41 = vadd.f32 %v3384_v56, %v3383_v43  ;;  %v9363_v23 = vld [vmem:[#allocation62_spill] sm:$0xff] }
 0x465   : > { %v3292_v31 = vsub.f32 1.0, %v9360_v54  ;;  %v3322_v25 = vmul.f32 %v3290_v30, %v8203_v16  ;;  %v3352_v61 = vadd.f32 %v3320_v59, %v3256_v26  ;;  %v3388_v42 = vsel %vm3376_vm13, %v3350_v44, 0.0 }
 0x466   : > { %v3202_v29 = vmax.f32 %v9358_v6, 0.0  ;;  %v9361_v8 = vsub.f32 0.0, %v7808_v38  ;;  %v3229_v62 = vadd.f32 %v9362_v60, %v8167_v11  ;;  %v3259_v46 = vmul.f32 %v3227_v5, %v9357_v33  ;;  %v9365_v11 = vld [vmem:[#allocation63_spill] sm:$0xff] }
 0x467   : > { %v3387_v27 = vadd.f32 %v3386_v39, %v3385_v41  ;;  %v3293_v2 = vsub.f32 1.0, %v9363_v23  ;;  %v3323_v58 = vmul.f32 %v3291_v13, %v9364_v40  ;;  %v3353_v36 = vadd.f32 %v3321_v51, %v3257_v10  ;;  %v9368_v10 = vld [vmem:[#allocation103_spill] sm:$0xff] }
 0x468   : > { %v3203_v18 = vmax.f32 %v9361_v8, 0.0  ;;  %v3390_v22 = vsel %vm3376_vm13, %v3351_v45, 0.0  ;;  %v8441_v16 = vmul.f32 0.6931472, %v8333_v32  ;;  %v3230_v38 = vadd.f32 %v8355_v52, %v8184_v53  ;;  %v9369_v13 = vld [vmem:[#allocation71_spill] sm:$0xff]  ;;  %v9376_v8 = vld [vmem:[#allocation102_spill] sm:$0xff] }
 0x469   : > { %v3260_v26 = vmul.f32 %v3228_v1, %v9360_v54  ;;  %v3389_v14 = vadd.f32 %v3388_v42, %v3387_v27  ;;  %v3294_v34 = vsub.f32 1.0, %v9365_v11  ;;  %v3324_v30 = vmul.f32 %v3292_v31, %v8216_v24  ;;  %v9371_v39 = vld [vmem:[#allocation79_spill] sm:$0xff] }
 0x46a   : > { %v3354_v59 = vadd.f32 %v3322_v25, %v3258_v19  ;;  %v3392_v44 = vsel %vm3376_vm13, %v3352_v61, 0.0  ;;  %v9366_v56 = vmax.f32 %v9330_v17, 0.0  ;;  %v3231_v32 = vadd.f32 %v8359_v21, %v8197_v7  ;;  %v9372_v7 = vld [vmem:[#allocation42_spill] sm:$0xff]  ;;  %v9374_v25 = vld [vmem:[#allocation72_spill] sm:$0xff] }
 0x46b   : > { %v3261_v53 = vmul.f32 %v3229_v62, %v9363_v23  ;;  %v3391_v52 = vadd.f32 %v3390_v22, %v3389_v14  ;;  %v3295_v5 = vsub.f32 1.0, %v9367_v4  ;;  %v3325_v43 = vmul.f32 %v3293_v2, %v9368_v10  ;;  %v9373_v19 = vld [vmem:[#allocation106_spill] sm:$0xff]  ;;  %v9378_v23 = vld [vmem:[#allocation108_spill] sm:$0xff] }
 0x46c   : > { %v8452_v50 = vadd.f32 %v9366_v56, %v8366_v0  ;;  %v3355_v33 = vadd.f32 %v3323_v58, %v3259_v46  ;;  %v3394_v24 = vsel %vm3376_vm13, %v3353_v36, 0.0  ;;  %v9370_v51 = vsub.f32 0.0, %v9369_v13  ;;  %v9379_v22 = vld [vmem:[#allocation104_spill] sm:$0xff]  ;;  %v9386_v13 = vld [vmem:[#allocation73_spill] sm:$0xff] }
 0x46d   : > { %v3232_v6 = vadd.f32 %v8380_v35, %v9371_v39  ;;  %v3262_v37 = vmul.f32 %v3230_v38, %v9365_v11  ;;  %v3393_v1 = vadd.f32 %v3392_v44, %v3391_v52  ;;  %v3296_v21 = vsub.f32 1.0, %v9372_v7  ;;  %v9377_v35 = vld [vmem:[#allocation43_spill] sm:$0xff]  ;;  %v9380_v11 = vld [vmem:[#allocation44_spill] sm:$0xff] }
 0x46e   : > { %v3204_v45 = vmax.f32 %v9370_v51, 0.0  ;;  %v3326_v41 = vmul.f32 %v3294_v34, %v9373_v19  ;;  %v3356_v54 = vadd.f32 %v3324_v30, %v3260_v26  ;;  %v3396_v31 = vsel %vm3376_vm13, %v3354_v59, 0.0  ;;  %v9381_v34 = vld [vmem:[#allocation110_spill] sm:$0xff]  ;;  %v9385_v10 = vld [vmem:[#allocation112_spill] sm:$0xff]  ;;  %v9390_v19 = vld [vmem:[#allocation113_spill] sm:$0xff] }
 0x46f   : > { %v9375_v61 = vsub.f32 0.0, %v9374_v25  ;;  %v3233_v60 = vadd.f32 %v8397_v47, %v9376_v8  ;;  %v3263_v62 = vmul.f32 %v3231_v32, %v9367_v4  ;;  %v3395_v46 = vadd.f32 %v3394_v24, %v3393_v1  ;;  %v9384_v4 = vld [vmem:[#allocation45_spill] sm:$0xff]  ;;  %v9391_v25 = vld [vmem:[#allocation74_spill] sm:$0xff] }
 0x470   : > { %v3297_v27 = vsub.f32 1.0, %v9377_v35  ;;  %v3327_v2 = vmul.f32 %v3295_v5, %v9378_v23  ;;  %v3357_v40 = vadd.f32 %v3325_v43, %v3261_v53  ;;  %v3398_v58 = vsel %vm3376_vm13, %v3355_v33, 0.0  ;;  %v9383_v53 = vld [vmem:[#allocation105_spill] sm:$0xff]  ;;  %v9395_v23 = vld [vmem:[#allocation114_spill] sm:$0xff] }
 0x471   : > { %v3205_v42 = vmax.f32 %v9375_v61, 0.0  ;;  %v8477_v36 = vmul.f32 0.6931472, %v8340_v48  ;;  %v3234_v38 = vadd.f32 %v3202_v29, %v9379_v22  ;;  %v3264_v26 = vmul.f32 %v3232_v6, %v9372_v7  ;;  %v9388_v6 = vld [vmem:[#allocation107_spill] sm:$0xff] }
 0x472   : > { %v3397_v14 = vadd.f32 %v3396_v31, %v3395_v46  ;;  %v3298_v47 = vsub.f32 1.0, %v9380_v11  ;;  %v3328_v30 = vmul.f32 %v3296_v21, %v9381_v34  ;;  %v3358_v59 = vadd.f32 %v3326_v41, %v3262_v37  ;;  %v9389_v21 = vld [vmem:[#allocation46_spill] sm:$0xff]  ;;  %v9396_v22 = vld [vmem:[#allocation75_spill] sm:$0xff] }
 0x473   : > { %v3400_v44 = vsel %vm3376_vm13, %v3356_v54, 0.0  ;;  %v9382_v56 = vmax.f32 %v9270_v49, 0.0  ;;  %v3235_v48 = vadd.f32 %v3203_v18, %v9383_v53  ;;  %v3265_v52 = vmul.f32 %v3233_v60, %v9377_v35  ;;  %v9393_v60 = vld [vmem:[#allocation109_spill] sm:$0xff] }
 0x474   : > { %v3399_v29 = vadd.f32 %v3398_v58, %v3397_v14  ;;  %v3299_v5 = vsub.f32 1.0, %v9384_v4  ;;  %v3329_v43 = vmul.f32 %v3297_v27, %v9385_v10  ;;  %v3359_v33 = vadd.f32 %v3327_v2, %v3263_v62  ;;  %v9394_v27 = vld [vmem:[#allocation65_spill] sm:$0xff]  ;;  %v9398_v14 = vld [vmem:[#allocation111_spill] sm:$0xff] }
 0x475   : > { %v8487_v32 = vadd.f32 %v9382_v56, %v8405_v3  ;;  %v3402_v24 = vsel %vm3376_vm13, %v3357_v40, 0.0  ;;  %v9387_v51 = vsub.f32 0.0, %v9386_v13  ;;  %v3236_v37 = vadd.f32 %v3204_v45, %v9388_v6 }
 0x476   : > { %v3266_v1 = vmul.f32 %v3234_v38, %v9380_v11  ;;  %v3401_v7 = vadd.f32 %v3400_v44, %v3399_v29  ;;  %v3300_v18 = vsub.f32 1.0, %v9389_v21  ;;  %v3330_v41 = vmul.f32 %v3298_v47, %v9390_v19  ;;  %v9402_v29 = vld [vmem:[#allocation115_spill] sm:$0xff] }
 0x477   : > { %v3206_v39 = vmax.f32 %v9387_v51, 0.0  ;;  %v3360_v54 = vadd.f32 %v3328_v30, %v3264_v26  ;;  %v3404_v31 = vsel %vm3376_vm13, %v3358_v59, 0.0  ;;  %v9392_v61 = vsub.f32 0.0, %v9391_v25  ;;  %v9399_v30 = vld [vmem:[#allocation47_spill] sm:$0xff]  ;;  %v9400_v59 = vld [vmem:[#allocation116_spill] sm:$0xff] }
 0x478   : > { %v3237_v62 = vadd.f32 %v3205_v42, %v9393_v60  ;;  %v3267_v46 = vmul.f32 %v3235_v48, %v9384_v4  ;;  %v3403_v35 = vadd.f32 %v3402_v24, %v3401_v7  ;;  %v3301_v45 = vsub.f32 1.0, %v9394_v27  ;;  %v9404_v24 = vld [vmem:[#allocation99_spill] sm:$0xff] }
 0x479   : > { %v3207_v8 = vmax.f32 %v9392_v61, 0.0  ;;  %v3331_v2 = vmul.f32 %v3299_v5, %v9395_v23  ;;  %v3361_v40 = vadd.f32 %v3329_v43, %v3265_v52  ;;  %v3406_v58 = vsel %vm3376_vm13, %v3359_v33, 0.0  ;;  %v9403_v43 = vld [vmem:[#allocation48_spill] sm:$0xff] }
 0x47a   : > { %v9397_v38 = vsub.f32 0.0, %v9396_v22  ;;  %v3238_v11 = vadd.f32 %v3206_v39, %v9398_v14  ;;  %v3268_v47 = vmul.f32 %v3236_v37, %v9389_v21  ;;  %v3405_v34 = vadd.f32 %v3404_v31, %v3403_v35  ;;  %v9414_v14 = vld [vmem:[#allocation86_spill] sm:$0xff] }
 0x47b   : > { %v3302_v42 = vsub.f32 1.0, %v9399_v30  ;;  %v3332_v44 = vmul.f32 %v3300_v18, %v9400_v59  ;;  %v3362_v56 = vadd.f32 %v3330_v41, %v3266_v1  ;;  %v3408_v53 = vsel %vm3376_vm13, %v3360_v54, 0.0  ;;  %v9406_v1 = vld [vmem:[#allocation117_spill] sm:$0xff]  ;;  %v9407_v18 = vld [vmem:[#allocation66_spill] sm:$0xff]  ;;  %v9408_v41 = vld [vmem:[#allocation76_spill] sm:$0xff] }
 0x47c   : > { %v3208_v26 = vmax.f32 %v9397_v38, 0.0  ;;  %v9401_v48 = vsub.f32 0.0, %v9316_v55  ;;  %v3239_v4 = vadd.f32 %v3207_v8, %v9402_v29  ;;  %v3269_v5 = vmul.f32 %v3237_v62, %v9394_v27  ;;  %v9411_v27 = vld [vmem:[#allocation100_spill] sm:$0xff] }
 0x47d   : > { %v3407_v10 = vadd.f32 %v3406_v58, %v3405_v34  ;;  %v3303_v33 = vsub.f32 1.0, %v9403_v43  ;;  %v3333_v13 = vmul.f32 %v3301_v45, %v9404_v24  ;;  %v3363_v51 = vadd.f32 %v3331_v2, %v3267_v46  ;;  %v9410_v46 = vld [vmem:[#allocation67_spill] sm:$0xff]  ;;  %v9420_v24 = vld [vmem:[#allocation70_spill] sm:$0xff] }
 0x47e   : > { %v3209_v52 = vmax.f32 %v9401_v48, 0.0  ;;  %v3410_v39 = vsel %vm3376_vm13, %v3361_v40, 0.0  ;;  %v9405_v6 = vsub.f32 0.0, %v9267_v28  ;;  %v3240_v7 = vadd.f32 %v3208_v26, %v9406_v1  ;;  %v9413_v26 = vld [vmem:[#allocation68_spill] sm:$0xff] }
 0x47f   : > { %v3270_v55 = vmul.f32 %v3238_v11, %v9399_v30  ;;  %v3409_v21 = vadd.f32 %v3408_v53, %v3407_v10  ;;  %v3304_v19 = vsub.f32 1.0, %v9407_v18  ;;  %v3334_v54 = vmul.f32 %v3302_v42, %v9408_v41  ;;  %v9417_v53 = vld [vmem:[#allocation87_spill] sm:$0xff] }
 0x480   : > { %v3210_v37 = vmax.f32 %v9405_v6, 0.0  ;;  %v3364_v31 = vadd.f32 %v3332_v44, %v3268_v47  ;;  %v3412_v25 = vsel %vm3376_vm13, %v3362_v56, 0.0  ;;  %v9409_v61 = vsub.f32 0.0, %v9268_v12  ;;  %v9416_v56 = vld [vmem:[#allocation69_spill] sm:$0xff] }
 0x481   : > { %v3241_v60 = vadd.f32 %v3209_v52, %v8303_v15  ;;  %v3271_v28 = vmul.f32 %v3239_v4, %v9403_v43  ;;  %v3411_v62 = vadd.f32 %v3410_v39, %v3409_v21  ;;  %v3305_v35 = vsub.f32 1.0, %v9410_v46  ;;  %v9418_v4 = vld [vmem:[#allocation84_spill] sm:$0xff]  ;;  %v9421_v6 = vld [vmem:[#allocation85_spill] sm:$0xff] }
 0x482   : > { %v3211_v8 = vmax.f32 %v9409_v61, 0.0  ;;  %v3335_v45 = vmul.f32 %v3303_v33, %v9411_v27  ;;  %v3365_v23 = vadd.f32 %v3333_v13, %v3269_v5  ;;  %v3414_v2 = vsel %vm3376_vm13, %v3363_v51, 0.0 }
 0x483   : > { %v9412_v40 = vsub.f32 0.0, %v9330_v17  ;;  %v3242_v22 = vadd.f32 %v3210_v37, %v8319_v9  ;;  %v3272_v12 = vmul.f32 %v3240_v7, %v9407_v18  ;;  %v3413_v38 = vadd.f32 %v3412_v25, %v3411_v62  ;;  %v9423_v18 = vld [vmem:[#allocation78_spill] sm:$0xff] }
 0x484   : > { %v3306_v15 = vsub.f32 1.0, %v9413_v26  ;;  %v3336_v11 = vmul.f32 %v3304_v19, %v9414_v14  ;;  %v3366_v47 = vadd.f32 %v3334_v54, %v3270_v55  ;;  %v3416_v34 = vsel %vm3376_vm13, %v3364_v31, 0.0 }
 0x485   : > { %v3212_v58 = vmax.f32 %v9412_v40, 0.0  ;;  %v9415_v30 = vsub.f32 0.0, %v9270_v49  ;;  %v3243_v59 = vadd.f32 %v3211_v8, %v8346_v57  ;;  %v3273_v17 = vmul.f32 %v3241_v60, %v9410_v46 }
 0x486   : > { %v3415_v44 = vadd.f32 %v3414_v2, %v3413_v38  ;;  %v3307_v9 = vsub.f32 1.0, %v9416_v56  ;;  %v3337_v48 = vmul.f32 %v3305_v35, %v9417_v53  ;;  %v3367_v52 = vadd.f32 %v3335_v45, %v3271_v28 }
 0x487   : > { %v3213_v42 = vmax.f32 %v9415_v30, 0.0  ;;  %v3418_v29 = vsel %vm3376_vm13, %v3365_v23, 0.0  ;;  %v9419_v5 = vsub.f32 0.0, %v9418_v4  ;;  %v3244_v43 = vadd.f32 %v3212_v58, %v8366_v0 }
 0x488   : > { %v3274_v49 = vmul.f32 %v3242_v22, %v9413_v26  ;;  %v3417_v33 = vadd.f32 %v3416_v34, %v3415_v44  ;;  %v3308_v57 = vsub.f32 1.0, %v9420_v24  ;;  %v3338_v13 = vmul.f32 %v3306_v15, %v8376_v20 }
 0x489   : > { %v3214_v10 = vmax.f32 %v9419_v5, 0.0  ;;  %v3368_v51 = vadd.f32 %v3336_v11, %v3272_v12  ;;  %v3420_v39 = vsel %vm3376_vm13, %v3366_v47, 0.0  ;;  %v9422_v37 = vsub.f32 0.0, %v9421_v6 }
 0x48a   : > { %v3245_v7 = vadd.f32 %v3213_v42, %v8405_v3  ;;  %v3275_v55 = vmul.f32 %v3243_v59, %v9416_v56  ;;  %v3419_v21 = vadd.f32 %v3418_v29, %v3417_v33  ;;  %v3309_v0 = vsub.f32 1.0, %v9423_v18  ;;  %v9425_v3 = vld [vmem:[#allocation80_spill] sm:$0xff] }
 0x48b   : > { %v3215_v1 = vmax.f32 %v9422_v37, 0.0  ;;  %v3339_v19 = vmul.f32 %v3307_v9, %v8416_v63  ;;  %v3369_v41 = vadd.f32 %v3337_v48, %v3273_v17  ;;  %v3422_v54 = vsel %vm3376_vm13, %v3367_v52, 0.0 }
 0x48c   : > { %v9424_v20 = vmax.f32 %v9418_v4, 0.0  ;;  %v3246_v25 = vadd.f32 %v3214_v10, %v8441_v16  ;;  %v3276_v61 = vmul.f32 %v3244_v43, %v9420_v24  ;;  %v3421_v8 = vadd.f32 %v3420_v39, %v3419_v21 }
 0x48d   : > { %v3310_v60 = vsub.f32 1.0, %v9425_v3  ;;  %v3340_v28 = vmul.f32 %v3308_v57, %v8452_v50  ;;  %v3370_v62 = vadd.f32 %v3338_v13, %v3274_v49  ;;  %v3424_v46 = vsel %vm3376_vm13, %v3368_v51, 0.0  ;;  %v3450_v57 = vld [vmem:[#allocation13] sm:$0x1] }
 0x48e   : > { %v3150_v31 = vadd.f32 %v9424_v20, %v8441_v16  ;;  %v9426_v63 = vmax.f32 %v9421_v6, 0.0  ;;  %v3247_v27 = vadd.f32 %v3215_v1, %v8477_v36  ;;  %v3277_v45 = vmul.f32 %v3245_v7, %v9423_v18  ;;  %v9427_v16 = vld [vmem:[#allocation82_spill] sm:$0xff] }
 0x48f   : > { %v3423_v23 = vadd.f32 %v3422_v54, %v3421_v8  ;;  %v3311_v2 = vsub.f32 1.0, %v9427_v16  ;;  %v3341_v40 = vmul.f32 %v3309_v0, %v8487_v32  ;;  %v3371_v58 = vadd.f32 %v3339_v19, %v3275_v55 }
 0x490   : > { %v3151_v35 = vadd.f32 %v9426_v63, %v8477_v36  ;;  %v3426_v22 = vsel %vm3376_vm13, %v3369_v41, 0.0  ;;  %v3278_v12 = vmul.f32 %v3246_v25, %v9425_v3  ;;  %v3342_v38 = vmul.f32 %v3310_v60, %v3150_v31 }
 0x491   : > { %v3425_v50 = vadd.f32 %v3424_v46, %v3423_v23  ;;  %v3372_v26 = vadd.f32 %v3340_v28, %v3276_v61  ;;  %v3428_v15 = vsel %vm3376_vm13, %v3370_v62, 0.0  ;;  %v3279_v36 = vmul.f32 %v3247_v27, %v9427_v16 }
 0x492   : > { %v3343_v11 = vmul.f32 %v3311_v2, %v3151_v35  ;;  %v3373_v47 = vadd.f32 %v3341_v40, %v3277_v45  ;;  %v3430_v34 = vsel %vm3376_vm13, %v3371_v58, 0.0  ;;  %v3374_v42 = vadd.f32 %v3342_v38, %v3278_v12 }
 0x493   : > { %v3427_v14 = vadd.f32 %v3426_v22, %v3425_v50  ;;  %v3432_v32 = vsel %vm3376_vm13, %v3372_v26, 0.0 }
 0x494   : > { %v3375_v17 = vadd.f32 %v3343_v11, %v3279_v36  ;;  %v3434_v44 = vsel %vm3376_vm13, %v3373_v47, 0.0  ;;  %v3436_v9 = vsel %vm3376_vm13, %v3374_v42, 0.0 }
 0x495   : > { %v3429_v30 = vadd.f32 %v3428_v15, %v3427_v14 }
 0x496   : > { %v3438_v48 = vsel %vm3376_vm13, %v3375_v17, 0.0 }
 0x497   : > { %v3431_v59 = vadd.f32 %v3430_v34, %v3429_v30 }
 0x499   : > { %v3433_v56 = vadd.f32 %v3432_v32, %v3431_v59 }
 0x49b   : > { %v3435_v53 = vadd.f32 %v3434_v44, %v3433_v56 }
 0x49d   : > { %v3437_v52 = vadd.f32 %v3436_v9, %v3435_v53 }
 0x49f   : > { %v3439_v29 = vadd.f32 %v3438_v48, %v3437_v52 }
 0x4a1   : > { %3440 = vadd.xlane.f32.xlu0 %v3439_v29 }
 0x514   : > { %v3441_v4 = vpop.xlane.xlu0 %3440 }
 0x515   : > { %v3442_v5 = vrot.slane %v3441_v4, 4 }
 0x517   : > { %v3443_v10 = vadd.f32 %v3442_v5, %v3441_v4 }
 0x519   : > { %v3444_v43 = vrot.slane %v3443_v10, 2 }
 0x51b   : > { %v3445_v49 = vadd.f32 %v3444_v43, %v3443_v10 }
 0x51d   : > { %v3446_v33 = vrot.slane %v3445_v49, 1 }
 0x51f   : > { %v3447_v24 = vadd.f32 %v3446_v33, %v3445_v49 }
 0x521   : > { %3901 = vpush %v3447_v24 }
 0x552   : > { %s3902_s28 = spop %3901 }
 0x553   : > { %v3449_v13 = vstv %s3902_s28 }
 0x554   : > { %v3451_v51 = vsub.f32 %v3450_v57, %v3449_v13 }
 0x556   : > { %v3452_v39 = vmul.f32 0.00390625, %v3451_v51 }
 0x558   : > { %3453 = vst.msk [vmem:[#allocation13] sm:$0x1] %vm9428_vm11, %v3452_v39 }
 0x559 PF: > { %s3459_s26 = sand.u32 1, %s4669_s21   ;;  %s3893_s13 = sshll.u32 %s4669_s21, 3 }
 0x55a   : > { %s3484_s30 = scalar_lea.hbm %s8659_s10, %s3893_s13  ;;  %s3486_s11 = sshll.u32 %s6446_s9, 4  ;;  %s3487_s11 = int_to_ptr.vmem [resolvable:$true] %s3486_s11 }
 0x55b   : > { %s3488_s22 = sshll.u32 %s3484_s30, 4  ;;  %s3460_s23 = scalar_lea.sflag [#allocation12], %s3459_s26  ;;  %s3489_s22 = int_to_ptr.hbm [resolvable:$true] %s3488_s22 }
 0x55c   : > { %s4460_s25 = sshra.s32 %s3489_s22, 4  ;;  %s4466_s17 = scalar_lea.hbm %s8659_s10, 16  ;;  %s4461_s25 = int_to_ptr.hbm [resolvable:$true] %s4460_s25 }
 0x55d   : > { %s4462_s27 = scalar_lea.hbm %s4461_s25, 8  ;;  %p4467_p3 = scmp.lt.s32.totalorder %s4461_s25, %s8659_s10 }
 0x55e   : > { %p4463_p0 = scmp.ne.s32.totalorder %s4461_s25, %s4462_s27  ;;  %p4468_p4 = scmp.lt.s32.totalorder %s4466_s17, %s4462_s27 }
 0x560   : > { %p4464_p1 = pnand %p4463_p0, %p4700_p9  ;;  %p4469_p8 = por %p4468_p4, %p4467_p3 }
 0x562   : > { %p4465_p2 = pneg %p4464_p1 }
 0x564   : > { %p4470_p12 = pnand %p4469_p8, %p4465_p2 }
 0x566   : > { %4473 = shalt.err (!%p4470_p12)
}
 0x567   : > { %3908 = dma.vmem_to_hbm [thread:$0]  (%p4700_p9), %s3487_s11, 128, %s3489_s22, %s3460_s23  }
 0x568   : > { %s9429_s12 = sld [smem:[#allocation119_spill]]  ;;  %s3472_s30 = sshll.u32 %s6449_s14, 4  ;;  %s3473_s30 = int_to_ptr.vmem [resolvable:$true] %s3472_s30 }
 0x569   : > { %s3455_s0 = scalar_lea.sflag [#allocation4], %s4782_s15 }
 0x56e   : > { %s3470_s19 = scalar_lea.hbm %s9429_s12, %s3893_s13  ;;  %s4494_s11 = scalar_lea.hbm %s9429_s12, 16 }
 0x56f   : > { %s3474_s24 = sshll.u32 %s3470_s19, 4  ;;  %s3475_s24 = int_to_ptr.hbm [resolvable:$true] %s3474_s24 }
 0x570   : > { %s4488_s25 = sshra.s32 %s3475_s24, 4  ;;  %s4489_s25 = int_to_ptr.hbm [resolvable:$true] %s4488_s25 }
 0x571   : > { %s4490_s27 = scalar_lea.hbm %s4489_s25, 8  ;;  %p4495_p0 = scmp.lt.s32.totalorder %s4489_s25, %s9429_s12 }
 0x572   : > { %p4491_p5 = scmp.ne.s32.totalorder %s4489_s25, %s4490_s27  ;;  %p4496_p1 = scmp.lt.s32.totalorder %s4494_s11, %s4490_s27 }
 0x574   : > { %p4492_p6 = pnand %p4491_p5, %p4700_p9  ;;  %p4497_p2 = por %p4496_p1, %p4495_p0 }
 0x576   : > { %p4493_p13 = pneg %p4492_p6 }
 0x578   : > { %p4498_p3 = pnand %p4497_p2, %p4493_p13 }
 0x57a   : > { %4501 = shalt.err (!%p4498_p3)
}
 0x57b   : > { %3907 = dma.vmem_to_hbm [thread:$0]  (%p4700_p9), %s3473_s30, 128, %s3475_s24, %s3455_s0  }
 0x57c   : > { %s9430_s13 = sld [smem:[#allocation120_spill]]  ;;  %s4587_s9 = smov [#allocation13]  }
 0x57d   : > { %s3498_s26 = sshll.u32 %s4587_s9, 4  ;;  %s3499_s26 = int_to_ptr.vmem [resolvable:$true] %s3498_s26 }
 0x582   : > { %s3500_s28 = sshll.u32 %s9430_s13, 4  ;;  %s3501_s28 = int_to_ptr.hbm [resolvable:$true] %s3500_s28 }
 0x583   : > { %3910 = dma.vmem_to_hbm [thread:$0]  (%p271_p7), %s3499_s26, 16, %s3501_s28, [#allocation12]  }
 0x584   : > { %4555 = dma.done.wait (%p271_p7), [#allocation12], 16  }
 0x585   : > { %4557 = vsyncadd (%p271_p7), [#allocation12], 4294967280 }
 0x586 PF: > { %s9431_s29 = sld [smem:[#allocation19_spill]]  ;;  %p3916_p9 = pnand %p3703_p11, %p4704_p10 }
 0x588   : > { %p3917_p4 = pneg %p3916_p9 }
 0x58c   : > { %s3517_s30 = sand.u32 1, %s9431_s29  }
 0x58d   : > { %s3518_s24 = scalar_lea.sflag [#allocation4], %s3517_s30 }
 0x58e   : > { %4559 = dma.done.wait (%p3917_p4), %s3518_s24, 128  }
 0x58f   : > { %4561 = vsyncadd (%p3917_p4), %s3518_s24, 4294967168  ;;  %s9433_s0 = sadd.s32 4294967294, %s4580_s20  }
 0x590   : > { %s3527_s25 = sand.u32 1, %s9433_s0  }
 0x591   : > { %s3528_s27 = scalar_lea.sflag [#allocation12], %s3527_s25 }
 0x592   : > { %4563 = dma.done.wait (%p3917_p4), %s3528_s27, 128  }
 0x593   : > { %4565 = vsyncadd (%p3917_p4), %s3528_s27, 4294967168  ;;  %s9434_s20 = sld [smem:[#allocation21_spill]]  ;;  %s9437_s17 = smov %s4572_s18 }
 0x594   : > { %s9435_s21 = sld [smem:[#allocation20_spill]] }
 0x595   : > { %s9436_s19 = sld [smem:[#allocation22_spill]] }
 0x599   : > { %p31_p7 = scmp.ge.s32.totalorder %s9434_s20, 4  }
 0x59a   : > { %s9438_s18 = smov %s9435_s21 }
 0x59b   :  { %33 = sbr.rel (!%p31_p7) target bundleno = 13 (0xd), region = 284 }
 0x5a0   :  { %3534 = vsyncpa [#allocation3], 1 }
 0x5a1   :  { %3536 = vsyncpa [#allocation3 + $0x1], 1 }
 0x5a2   :  { %3537 = vsyncpa [#allocation9], 1 }
 0x5a3   :  { %3539 = vsyncpa [#allocation9 + $0x1], 1 }
 0x5a4   :  { %3540 = vsyncpa [#allocation4], 1 }
 0x5a5   :  { %3542 = vsyncpa [#allocation4 + $0x1], 1 }
 0x5a6   :  { %3543 = vsyncpa [#allocation12], 1 }
 0x5a7   :  { %3545 = vsyncpa [#allocation12 + $0x1], 1 }

</bundles_post_ra>
